<compile_context>
chip_gen: v6e
topology: v6e:2x2x1
jax: 0.10.0
libtpu: 0.0.40
codegen_flags: <defaults>
</compile_context>

<pallas_src>
import math

import jax
import jax.numpy as jnp
from jax import lax
from jax.experimental import pallas as pl
from jax.experimental.pallas import tpu as pltpu

D_MODEL = 128            # module-level constant in the reference code
NHEAD = 2
HEAD_DIM = D_MODEL // NHEAD
NUM_LAYERS = 2
DIM_FF = 2048            # nn.TransformerEncoderLayer default dim_feedforward
OUTPUT_DIM = 4
LN_EPS = 1e-5

ROWS_PER_LAYER = 8                                   # bqkv, bo, b1, b2, g1, be1, g2, be2
VEC_LANES = DIM_FF                                   # widest packed vector (linear1 bias)
HEAD_LANES = OUTPUT_DIM + (-OUTPUT_DIM) % 128        # lane-dense head output width (128)


# ----------------------------- kernel helpers --------------------------------
def _layernorm(x, g, b):
    # x: (rows, D) f32, g/b: (1, D) f32 (biased variance, eps inside sqrt)
    mu = jnp.mean(x, axis=-1, keepdims=True)
    var = jnp.mean((x - mu) ** 2, axis=-1, keepdims=True)
    return (x - mu) * lax.rsqrt(var + LN_EPS) * g + b


def _encoder_block(x, B, L, wqkv, wo, w1, w2, bqkv, bo, b1, b2, g1, be1, g2, be2):
    """One post-norm nn.TransformerEncoderLayer over the whole batch at once.

    x: (B*L, D) f32 residual stream; weights bf16 (in, out); biases f32 (1, out).
    The 1/sqrt(dk) attention scale is pre-folded into the Q columns of wqkv/bqkv.
    """
    d, dk = D_MODEL, HEAD_DIM

    # Fused in_proj: batch folded into the MXU M dimension (M = B*L rows).
    qkv = jnp.dot(x.astype(jnp.bfloat16), wqkv,
                  preferred_element_type=jnp.float32) + bqkv            # (B*L, 3D) f32
    q = qkv[:, :d].reshape(B, L, d).astype(jnp.bfloat16)
    k = qkv[:, d:2 * d].reshape(B, L, d).astype(jnp.bfloat16)
    v = qkv[:, 2 * d:].reshape(B, L, d).astype(jnp.bfloat16)

    # Fold heads into the batch dim: one batched score/PV contraction pair
    # (single-batch-dim rank-3 einsums) instead of a per-head Python loop.
    qh = jnp.concatenate([q[..., h * dk:(h + 1) * dk] for h in range(NHEAD)], axis=0)
    kh = jnp.concatenate([k[..., h * dk:(h + 1) * dk] for h in range(NHEAD)], axis=0)
    vh = jnp.concatenate([v[..., h * dk:(h + 1) * dk] for h in range(NHEAD)], axis=0)

    s = jnp.einsum('bqd,bkd->bqk', qh, kh,
                   preferred_element_type=jnp.float32)                  # (B*H, L, L) f32
    s = s - jnp.max(s, axis=-1, keepdims=True)
    p = jnp.exp(s)
    p = p * pl.reciprocal(jnp.sum(p, axis=-1, keepdims=True), approx=True)
    o = jnp.einsum('bqk,bkd->bqd', p.astype(jnp.bfloat16), vh,
                   preferred_element_type=jnp.float32)                  # (B*H, L, dk) f32

    # Heads back to the lane dim (PyTorch MHA concat order), batch back to rows.
    attn = jnp.concatenate([o[h * B:(h + 1) * B] for h in range(NHEAD)],
                           axis=-1).reshape(B * L, d)
    attn = jnp.dot(attn.astype(jnp.bfloat16), wo,
                   preferred_element_type=jnp.float32) + bo             # out_proj

    y = _layernorm(x + attn, g1, be1)                                   # norm1 (f32)
    h1 = jnp.maximum(jnp.dot(y.astype(jnp.bfloat16), w1,
                             preferred_element_type=jnp.float32) + b1, 0.0)
    ff = jnp.dot(h1.astype(jnp.bfloat16), w2,
                 preferred_element_type=jnp.float32) + b2
    return _layernorm(y + ff, g2, be2)                                  # norm2 (f32)


# ------------------------------- fused kernel ---------------------------------
def _fused_kernel(x_ref, wqkv_ref, wo_ref, w1_ref, w2_ref, vec_ref, o_ref):
    B, L, D = x_ref.shape

    # Positional encoding rows 0..L-1 of the vector slab (dropout = identity).
    pe = vec_ref[0:L, 0:D]                                              # (L, D) f32
    x = (x_ref[...] + pe[None, :, :]).reshape(B * L, D)

    for li in range(NUM_LAYERS):
        r = L + li * ROWS_PER_LAYER
        bqkv = vec_ref[r + 0:r + 1, 0:3 * D]
        bo   = vec_ref[r + 1:r + 2, 0:D]
        b1   = vec_ref[r + 2:r + 3, 0:DIM_FF]
        b2   = vec_ref[r + 3:r + 4, 0:D]
        g1   = vec_ref[r + 4:r + 5, 0:D]
        be1  = vec_ref[r + 5:r + 6, 0:D]
        g2   = vec_ref[r + 6:r + 7, 0:D]
        be2  = vec_ref[r + 7:r + 8, 0:D]
        x = _encoder_block(x, B, L, wqkv_ref[li], wo_ref[li], w1_ref[li],
                           w2_ref[li], bqkv, bo, b1, b2, g1, be1, g2, be2)

    # torch.mean(x, dim=1) in the original (L, B, D) layout == mean over batch.
    xm = jnp.mean(x.reshape(B, L, D), axis=0)                           # (L, D)

    # Final linear_layer: lane-dense (128-wide) padded output, sliced in wrapper.
    head_row = L + NUM_LAYERS * ROWS_PER_LAYER
    b_head = vec_ref[head_row:head_row + 1, 0:HEAD_LANES]
    o_ref[...] = jnp.dot(xm.astype(jnp.bfloat16), wo_ref[NUM_LAYERS],
                         preferred_element_type=jnp.float32) + b_head


# ------------------------------ pallas wrapper --------------------------------
@jax.jit
def gated_transformer_forward(x_lbd, packed):
    # x_lbd: (L, B, D) float32
    L, B, _ = x_lbd.shape
    x_bld = jnp.transpose(x_lbd, (1, 0, 2)).astype(jnp.float32)         # x.permute(1,0,2)

    inputs = [x_bld, packed['wqkv'], packed['wo'], packed['w1'],
              packed['w2'], packed['vec']]

    # VMEM budget from actual slab sizes (+ activation / relayout headroom).
    in_bytes = sum(a.size * a.dtype.itemsize for a in inputs)
    out_bytes = L * HEAD_LANES * 4
    vmem_limit = int(in_bytes + out_bytes) + 8 * 1024 * 1024

    # Whole-array, single-buffered VMEM residency (no grid, no double-buffering).
    vmem_spec = pl.BlockSpec(memory_space=pltpu.MemorySpace.VMEM)

    out_padded = pl.pallas_call(
        _fused_kernel,
        out_shape=jax.ShapeDtypeStruct((L, HEAD_LANES), jnp.float32),
        in_specs=[vmem_spec] * len(inputs),
        out_specs=vmem_spec,
        compiler_params=pltpu.CompilerParams(vmem_limit_bytes=vmem_limit),
    )(*inputs)
    return out_padded[:, :OUTPUT_DIM]


# ------------------------------ params / packing ------------------------------
def make_pe(length, d_model):
    position = jnp.arange(length, dtype=jnp.float32)[:, None]
    div_term = jnp.exp(jnp.arange(0, d_model, 2, dtype=jnp.float32)
                       * (-math.log(10000.0) / d_model))
    pe = jnp.zeros((length, d_model), jnp.float32)
    pe = pe.at[:, 0::2].set(jnp.sin(position * div_term))
    pe = pe.at[:, 1::2].set(jnp.cos(position * div_term))
    return pe


def pack_params(layers, head, seq_len):
    """Pack all parameters into 5 DMA-friendly slabs:
       - wqkv / wo / w1 / w2 stacked over layers, cast to bf16
         (the head weight, lane-padded to 128, is appended to the wo slab);
       - one f32 (rows, 2048) slab holding pe rows, all biases, LN gamma/beta
         and the head bias, one vector per row, unpacked by static slicing.
       The 1/sqrt(dk) attention scale is folded into the Q columns of wqkv/bqkv.
    """
    scale = 1.0 / math.sqrt(HEAD_DIM)

    def vrow(v):
        v = jnp.asarray(v, jnp.float32).reshape(-1)
        return jnp.pad(v, (0, VEC_LANES - v.shape[0]))

    rows = [vrow(r) for r in make_pe(seq_len, D_MODEL)]                 # pe rows
    wqkv_l, wo_l, w1_l, w2_l = [], [], [], []
    for (wqkv, bqkv, wo, bo, w1, b1, w2, b2, g1, be1, g2, be2) in layers:
        wqkv = wqkv.at[:, :D_MODEL].multiply(scale)                     # fold scale into Q
        bqkv = bqkv.at[:, :D_MODEL].multiply(scale)
        wqkv_l.append(wqkv); wo_l.append(wo); w1_l.append(w1); w2_l.append(w2)
        rows += [vrow(v) for v in (bqkv, bo, b1, b2, g1, be1, g2, be2)]

    w_out, b_out = head
    wo_l.append(jnp.pad(w_out, ((0, 0), (0, HEAD_LANES - OUTPUT_DIM)))) # head rides with wo
    rows.append(vrow(b_out))

    stack_bf16 = lambda ts: jnp.stack([t.astype(jnp.bfloat16) for t in ts])
    return dict(wqkv=stack_bf16(wqkv_l),               # (2, 128, 384)  bf16
                wo=stack_bf16(wo_l),                   # (3, 128, 128)  bf16
                w1=stack_bf16(w1_l),                   # (2, 128, 2048) bf16
                w2=stack_bf16(w2_l),                   # (2, 2048, 128) bf16
                vec=jnp.stack(rows))                   # (25, 2048)     f32


def init_params(key):
    # Weights stored PRE-TRANSPOSED as (in_dim, out_dim): plain x @ W in-kernel.
    def dense(k, in_dim, out_dim, scale=0.02):
        kw, kb = jax.random.split(k)
        w = scale * jax.random.normal(kw, (in_dim, out_dim), jnp.float32)
        b = scale * jax.random.normal(kb, (1, out_dim), jnp.float32)
        return w, b

    layers = []
    for _ in range(NUM_LAYERS):
        key, k1, k2, k3, k4 = jax.random.split(key, 5)
        wqkv, bqkv = dense(k1, D_MODEL, 3 * D_MODEL)   # in_proj (fused q,k,v)
        wo, bo = dense(k2, D_MODEL, D_MODEL)           # out_proj
        w1, b1 = dense(k3, D_MODEL, DIM_FF)            # linear1
        w2, b2 = dense(k4, DIM_FF, D_MODEL)            # linear2
        g1 = jnp.ones((1, D_MODEL), jnp.float32)
        be1 = jnp.zeros((1, D_MODEL), jnp.float32)
        g2 = jnp.ones((1, D_MODEL), jnp.float32)
        be2 = jnp.zeros((1, D_MODEL), jnp.float32)
        layers.append((wqkv, bqkv, wo, bo, w1, b1, w2, b2, g1, be1, g2, be2))

    key, ko = jax.random.split(key)
    w_out, b_out = dense(ko, D_MODEL, OUTPUT_DIM)      # self.linear_layer
    return layers, (w_out, b_out)


if __name__ == "__main__":
    L, B = 8, 2
    key = jax.random.PRNGKey(0)
    kx, kp = jax.random.split(key)
    x = jax.random.normal(kx, (L, B, D_MODEL), jnp.float32)
    layers, head = init_params(kp)
    packed = pack_params(layers, head, L)
    out = gated_transformer_forward(x, packed)
    out = jax.block_until_ready(out)
    assert out.shape == (L, OUTPUT_DIM), out.shape
    assert bool(jnp.all(jnp.isfinite(out)))
    print("KERNEL_OK")
</pallas_src>

<mosaic_0001>
module attributes {stable_mosaic.version = 11 : i64} {
  func.func @_fused_kernel(%arg0: memref<2x8x128xf32, #tpu.memory_space<vmem>>, %arg1: memref<2x128x384xbf16, #tpu.memory_space<vmem>>, %arg2: memref<3x128x128xbf16, #tpu.memory_space<vmem>>, %arg3: memref<2x128x2048xbf16, #tpu.memory_space<vmem>>, %arg4: memref<2x2048x128xbf16, #tpu.memory_space<vmem>>, %arg5: memref<25x2048xf32, #tpu.memory_space<vmem>>, %arg6: memref<8x128xf32, #tpu.memory_space<vmem>>) attributes {dimension_semantics = [], scalar_prefetch = 0 : i64, scratch_operands = 0 : i64, tpu.core_type = #tpu.core_type<tc>} {
    %c0 = arith.constant 0 : index
    %c0_0 = arith.constant 0 : index
    %0 = vector.load %arg5[%c0, %c0_0] : memref<25x2048xf32, #tpu.memory_space<vmem>>, vector<8x128xf32>
    %c0_1 = arith.constant 0 : index
    %c0_2 = arith.constant 0 : index
    %c0_3 = arith.constant 0 : index
    %1 = vector.load %arg0[%c0_1, %c0_2, %c0_3] : memref<2x8x128xf32, #tpu.memory_space<vmem>>, vector<2x8x128xf32>
    %2 = vector.shape_cast %0 : vector<8x128xf32> to vector<1x8x128xf32>
    %3 = vector.broadcast %2 : vector<1x8x128xf32> to vector<2x8x128xf32>
    %4 = arith.addf %1, %3 : vector<2x8x128xf32>
    %5 = vector.shape_cast %4 : vector<2x8x128xf32> to vector<16x128xf32>
    %c8 = arith.constant 8 : index
    %c0_4 = arith.constant 0 : index
    %6 = vector.load %arg5[%c8, %c0_4] : memref<25x2048xf32, #tpu.memory_space<vmem>>, vector<1x384xf32>
    %c9 = arith.constant 9 : index
    %c0_5 = arith.constant 0 : index
    %7 = vector.load %arg5[%c9, %c0_5] : memref<25x2048xf32, #tpu.memory_space<vmem>>, vector<1x128xf32>
    %c10 = arith.constant 10 : index
    %c0_6 = arith.constant 0 : index
    %8 = vector.load %arg5[%c10, %c0_6] : memref<25x2048xf32, #tpu.memory_space<vmem>>, vector<1x2048xf32>
    %c11 = arith.constant 11 : index
    %c0_7 = arith.constant 0 : index
    %9 = vector.load %arg5[%c11, %c0_7] : memref<25x2048xf32, #tpu.memory_space<vmem>>, vector<1x128xf32>
    %c12 = arith.constant 12 : index
    %c0_8 = arith.constant 0 : index
    %10 = vector.load %arg5[%c12, %c0_8] : memref<25x2048xf32, #tpu.memory_space<vmem>>, vector<1x128xf32>
    %c13 = arith.constant 13 : index
    %c0_9 = arith.constant 0 : index
    %11 = vector.load %arg5[%c13, %c0_9] : memref<25x2048xf32, #tpu.memory_space<vmem>>, vector<1x128xf32>
    %c14 = arith.constant 14 : index
    %c0_10 = arith.constant 0 : index
    %12 = vector.load %arg5[%c14, %c0_10] : memref<25x2048xf32, #tpu.memory_space<vmem>>, vector<1x128xf32>
    %c15 = arith.constant 15 : index
    %c0_11 = arith.constant 0 : index
    %13 = vector.load %arg5[%c15, %c0_11] : memref<25x2048xf32, #tpu.memory_space<vmem>>, vector<1x128xf32>
    %c0_12 = arith.constant 0 : index
    %c0_13 = arith.constant 0 : index
    %c0_14 = arith.constant 0 : index
    %14 = vector.load %arg1[%c0_12, %c0_13, %c0_14] : memref<2x128x384xbf16, #tpu.memory_space<vmem>>, vector<1x128x384xbf16>
    %15 = vector.shape_cast %14 : vector<1x128x384xbf16> to vector<128x384xbf16>
    %c0_15 = arith.constant 0 : index
    %c0_16 = arith.constant 0 : index
    %c0_17 = arith.constant 0 : index
    %16 = vector.load %arg2[%c0_15, %c0_16, %c0_17] : memref<3x128x128xbf16, #tpu.memory_space<vmem>>, vector<1x128x128xbf16>
    %17 = vector.shape_cast %16 : vector<1x128x128xbf16> to vector<128x128xbf16>
    %c0_18 = arith.constant 0 : index
    %c0_19 = arith.constant 0 : index
    %c0_20 = arith.constant 0 : index
    %18 = vector.load %arg3[%c0_18, %c0_19, %c0_20] : memref<2x128x2048xbf16, #tpu.memory_space<vmem>>, vector<1x128x2048xbf16>
    %19 = vector.shape_cast %18 : vector<1x128x2048xbf16> to vector<128x2048xbf16>
    %c0_21 = arith.constant 0 : index
    %c0_22 = arith.constant 0 : index
    %c0_23 = arith.constant 0 : index
    %20 = vector.load %arg4[%c0_21, %c0_22, %c0_23] : memref<2x2048x128xbf16, #tpu.memory_space<vmem>>, vector<1x2048x128xbf16>
    %21 = vector.shape_cast %20 : vector<1x2048x128xbf16> to vector<2048x128xbf16>
    %22 = arith.truncf %5 : vector<16x128xf32> to vector<16x128xbf16>
    %cst = arith.constant dense<0.000000e+00> : vector<16x384xf32>
    %23 = tpu.matmul %22, %15, %cst {dimension_numbers = #tpu.dot_dimension_numbers<[1], [0], [0], [1], [0, 0, 1, 1], [], []>} : vector<16x128xbf16>, vector<128x384xbf16>, vector<16x384xf32> -> vector<16x384xf32>
    %24 = vector.broadcast %6 : vector<1x384xf32> to vector<16x384xf32>
    %25 = arith.addf %23, %24 : vector<16x384xf32>
    %26 = vector.extract_strided_slice %25 {offsets = [0, 0], sizes = [16, 128], strides = [1, 1]} : vector<16x384xf32> to vector<16x128xf32>
    %27 = vector.shape_cast %26 : vector<16x128xf32> to vector<2x8x128xf32>
    %28 = arith.truncf %27 : vector<2x8x128xf32> to vector<2x8x128xbf16>
    %29 = vector.extract_strided_slice %25 {offsets = [0, 128], sizes = [16, 128], strides = [1, 1]} : vector<16x384xf32> to vector<16x128xf32>
    %30 = vector.shape_cast %29 : vector<16x128xf32> to vector<2x8x128xf32>
    %31 = arith.truncf %30 : vector<2x8x128xf32> to vector<2x8x128xbf16>
    %32 = vector.extract_strided_slice %25 {offsets = [0, 256], sizes = [16, 128], strides = [1, 1]} : vector<16x384xf32> to vector<16x128xf32>
    %33 = vector.shape_cast %32 : vector<16x128xf32> to vector<2x8x128xf32>
    %34 = arith.truncf %33 : vector<2x8x128xf32> to vector<2x8x128xbf16>
    %35 = vector.extract_strided_slice %28 {offsets = [0, 0, 0], sizes = [2, 8, 64], strides = [1, 1, 1]} : vector<2x8x128xbf16> to vector<2x8x64xbf16>
    %36 = vector.extract_strided_slice %28 {offsets = [0, 0, 64], sizes = [2, 8, 64], strides = [1, 1, 1]} : vector<2x8x128xbf16> to vector<2x8x64xbf16>
    %37 = tpu.concatenate %35, %36 in 0 : vector<2x8x64xbf16>, vector<2x8x64xbf16> -> vector<4x8x64xbf16>
    %38 = vector.extract_strided_slice %31 {offsets = [0, 0, 0], sizes = [2, 8, 64], strides = [1, 1, 1]} : vector<2x8x128xbf16> to vector<2x8x64xbf16>
    %39 = vector.extract_strided_slice %31 {offsets = [0, 0, 64], sizes = [2, 8, 64], strides = [1, 1, 1]} : vector<2x8x128xbf16> to vector<2x8x64xbf16>
    %40 = tpu.concatenate %38, %39 in 0 : vector<2x8x64xbf16>, vector<2x8x64xbf16> -> vector<4x8x64xbf16>
    %41 = vector.extract_strided_slice %34 {offsets = [0, 0, 0], sizes = [2, 8, 64], strides = [1, 1, 1]} : vector<2x8x128xbf16> to vector<2x8x64xbf16>
    %42 = vector.extract_strided_slice %34 {offsets = [0, 0, 64], sizes = [2, 8, 64], strides = [1, 1, 1]} : vector<2x8x128xbf16> to vector<2x8x64xbf16>
    %43 = tpu.concatenate %41, %42 in 0 : vector<2x8x64xbf16>, vector<2x8x64xbf16> -> vector<4x8x64xbf16>
    "tpu.trace_start"() <{level = 10 : i32, message = "bqd,bkd->bqk"}> : () -> ()
    %cst_24 = arith.constant dense<0.000000e+00> : vector<4x8x8xf32>
    %44 = tpu.matmul %37, %40, %cst_24 {dimension_numbers = #tpu.dot_dimension_numbers<[2], [2], [1], [1], [0, 0, 0, 1, 1, 1], [0], [0]>} : vector<4x8x64xbf16>, vector<4x8x64xbf16>, vector<4x8x8xf32> -> vector<4x8x8xf32>
    "tpu.trace_stop"() : () -> ()
    %cst_25 = arith.constant dense<0xFF800000> : vector<4x8xf32>
    %45 = vector.multi_reduction <maximumf>, %44, %cst_25 [2] : vector<4x8x8xf32> to vector<4x8xf32>
    %46 = vector.shape_cast %45 : vector<4x8xf32> to vector<4x8x1xf32>
    %47 = vector.broadcast %46 : vector<4x8x1xf32> to vector<4x8x8xf32>
    %48 = arith.subf %44, %47 : vector<4x8x8xf32>
    %49 = math.exp %48 : vector<4x8x8xf32>
    %cst_26 = arith.constant dense<0.000000e+00> : vector<4x8xf32>
    %50 = vector.multi_reduction <add>, %49, %cst_26 [2] : vector<4x8x8xf32> to vector<4x8xf32>
    %51 = vector.shape_cast %50 : vector<4x8xf32> to vector<4x8x1xf32>
    %52 = tpu.reciprocal %51 {approx = true} : vector<4x8x1xf32> -> vector<4x8x1xf32>
    %53 = vector.broadcast %52 : vector<4x8x1xf32> to vector<4x8x8xf32>
    %54 = arith.mulf %49, %53 : vector<4x8x8xf32>
    %55 = arith.truncf %54 : vector<4x8x8xf32> to vector<4x8x8xbf16>
    "tpu.trace_start"() <{level = 10 : i32, message = "bqk,bkd->bqd"}> : () -> ()
    %cst_27 = arith.constant dense<0.000000e+00> : vector<4x8x64xf32>
    %56 = tpu.matmul %55, %43, %cst_27 {dimension_numbers = #tpu.dot_dimension_numbers<[2], [1], [1], [2], [0, 0, 0, 1, 1, 2], [0], [0]>} : vector<4x8x8xbf16>, vector<4x8x64xbf16>, vector<4x8x64xf32> -> vector<4x8x64xf32>
    "tpu.trace_stop"() : () -> ()
    %57 = vector.extract_strided_slice %56 {offsets = [0, 0, 0], sizes = [2, 8, 64], strides = [1, 1, 1]} : vector<4x8x64xf32> to vector<2x8x64xf32>
    %58 = vector.extract_strided_slice %56 {offsets = [2, 0, 0], sizes = [2, 8, 64], strides = [1, 1, 1]} : vector<4x8x64xf32> to vector<2x8x64xf32>
    %59 = tpu.concatenate %57, %58 in 2 : vector<2x8x64xf32>, vector<2x8x64xf32> -> vector<2x8x128xf32>
    %60 = vector.shape_cast %59 : vector<2x8x128xf32> to vector<16x128xf32>
    %61 = arith.truncf %60 : vector<16x128xf32> to vector<16x128xbf16>
    %cst_28 = arith.constant dense<0.000000e+00> : vector<16x128xf32>
    %62 = tpu.matmul %61, %17, %cst_28 {dimension_numbers = #tpu.dot_dimension_numbers<[1], [0], [0], [1], [0, 0, 1, 1], [], []>} : vector<16x128xbf16>, vector<128x128xbf16>, vector<16x128xf32> -> vector<16x128xf32>
    %63 = vector.broadcast %7 : vector<1x128xf32> to vector<16x128xf32>
    %64 = arith.addf %62, %63 : vector<16x128xf32>
    %65 = arith.addf %5, %64 : vector<16x128xf32>
    %cst_29 = arith.constant dense<0.000000e+00> : vector<16xf32>
    %66 = vector.multi_reduction <add>, %65, %cst_29 [1] : vector<16x128xf32> to vector<16xf32>
    %67 = vector.shape_cast %66 : vector<16xf32> to vector<16x1xf32>
    %cst_30 = arith.constant 1.280000e+02 : f32
    %68 = vector.broadcast %cst_30 : f32 to vector<16x1xf32>
    %69 = arith.divf %67, %68 : vector<16x1xf32>
    %70 = vector.broadcast %69 : vector<16x1xf32> to vector<16x128xf32>
    %71 = arith.subf %65, %70 : vector<16x128xf32>
    %72 = arith.mulf %71, %71 : vector<16x128xf32>
    %cst_31 = arith.constant dense<0.000000e+00> : vector<16xf32>
    %73 = vector.multi_reduction <add>, %72, %cst_31 [1] : vector<16x128xf32> to vector<16xf32>
    %74 = vector.shape_cast %73 : vector<16xf32> to vector<16x1xf32>
    %cst_32 = arith.constant 1.280000e+02 : f32
    %75 = vector.broadcast %cst_32 : f32 to vector<16x1xf32>
    %76 = arith.divf %74, %75 : vector<16x1xf32>
    %77 = vector.broadcast %69 : vector<16x1xf32> to vector<16x128xf32>
    %78 = arith.subf %65, %77 : vector<16x128xf32>
    %cst_33 = arith.constant 9.99999974E-6 : f32
    %79 = vector.broadcast %cst_33 : f32 to vector<16x1xf32>
    %80 = arith.addf %76, %79 : vector<16x1xf32>
    %81 = math.rsqrt %80 : vector<16x1xf32>
    %82 = vector.broadcast %81 : vector<16x1xf32> to vector<16x128xf32>
    %83 = arith.mulf %78, %82 : vector<16x128xf32>
    %84 = vector.broadcast %10 : vector<1x128xf32> to vector<16x128xf32>
    %85 = arith.mulf %83, %84 : vector<16x128xf32>
    %86 = vector.broadcast %11 : vector<1x128xf32> to vector<16x128xf32>
    %87 = arith.addf %85, %86 : vector<16x128xf32>
    %88 = arith.truncf %87 : vector<16x128xf32> to vector<16x128xbf16>
    %cst_34 = arith.constant dense<0.000000e+00> : vector<16x2048xf32>
    %89 = tpu.matmul %88, %19, %cst_34 {dimension_numbers = #tpu.dot_dimension_numbers<[1], [0], [0], [1], [0, 0, 1, 1], [], []>} : vector<16x128xbf16>, vector<128x2048xbf16>, vector<16x2048xf32> -> vector<16x2048xf32>
    %90 = vector.broadcast %8 : vector<1x2048xf32> to vector<16x2048xf32>
    %91 = arith.addf %89, %90 : vector<16x2048xf32>
    %cst_35 = arith.constant 0.000000e+00 : f32
    %92 = vector.broadcast %cst_35 : f32 to vector<16x2048xf32>
    %93 = arith.maximumf %91, %92 : vector<16x2048xf32>
    %94 = arith.truncf %93 : vector<16x2048xf32> to vector<16x2048xbf16>
    %cst_36 = arith.constant dense<0.000000e+00> : vector<16x128xf32>
    %95 = tpu.matmul %94, %21, %cst_36 {dimension_numbers = #tpu.dot_dimension_numbers<[1], [0], [0], [1], [0, 0, 1, 1], [], []>} : vector<16x2048xbf16>, vector<2048x128xbf16>, vector<16x128xf32> -> vector<16x128xf32>
    %96 = vector.broadcast %9 : vector<1x128xf32> to vector<16x128xf32>
    %97 = arith.addf %95, %96 : vector<16x128xf32>
    %98 = arith.addf %87, %97 : vector<16x128xf32>
    %cst_37 = arith.constant dense<0.000000e+00> : vector<16xf32>
    %99 = vector.multi_reduction <add>, %98, %cst_37 [1] : vector<16x128xf32> to vector<16xf32>
    %100 = vector.shape_cast %99 : vector<16xf32> to vector<16x1xf32>
    %cst_38 = arith.constant 1.280000e+02 : f32
    %101 = vector.broadcast %cst_38 : f32 to vector<16x1xf32>
    %102 = arith.divf %100, %101 : vector<16x1xf32>
    %103 = vector.broadcast %102 : vector<16x1xf32> to vector<16x128xf32>
    %104 = arith.subf %98, %103 : vector<16x128xf32>
    %105 = arith.mulf %104, %104 : vector<16x128xf32>
    %cst_39 = arith.constant dense<0.000000e+00> : vector<16xf32>
    %106 = vector.multi_reduction <add>, %105, %cst_39 [1] : vector<16x128xf32> to vector<16xf32>
    %107 = vector.shape_cast %106 : vector<16xf32> to vector<16x1xf32>
    %cst_40 = arith.constant 1.280000e+02 : f32
    %108 = vector.broadcast %cst_40 : f32 to vector<16x1xf32>
    %109 = arith.divf %107, %108 : vector<16x1xf32>
    %110 = vector.broadcast %102 : vector<16x1xf32> to vector<16x128xf32>
    %111 = arith.subf %98, %110 : vector<16x128xf32>
    %cst_41 = arith.constant 9.99999974E-6 : f32
    %112 = vector.broadcast %cst_41 : f32 to vector<16x1xf32>
    %113 = arith.addf %109, %112 : vector<16x1xf32>
    %114 = math.rsqrt %113 : vector<16x1xf32>
    %115 = vector.broadcast %114 : vector<16x1xf32> to vector<16x128xf32>
    %116 = arith.mulf %111, %115 : vector<16x128xf32>
    %117 = vector.broadcast %12 : vector<1x128xf32> to vector<16x128xf32>
    %118 = arith.mulf %116, %117 : vector<16x128xf32>
    %119 = vector.broadcast %13 : vector<1x128xf32> to vector<16x128xf32>
    %120 = arith.addf %118, %119 : vector<16x128xf32>
    %c16 = arith.constant 16 : index
    %c0_42 = arith.constant 0 : index
    %121 = vector.load %arg5[%c16, %c0_42] : memref<25x2048xf32, #tpu.memory_space<vmem>>, vector<1x384xf32>
    %c17 = arith.constant 17 : index
    %c0_43 = arith.constant 0 : index
    %122 = vector.load %arg5[%c17, %c0_43] : memref<25x2048xf32, #tpu.memory_space<vmem>>, vector<1x128xf32>
    %c18 = arith.constant 18 : index
    %c0_44 = arith.constant 0 : index
    %123 = vector.load %arg5[%c18, %c0_44] : memref<25x2048xf32, #tpu.memory_space<vmem>>, vector<1x2048xf32>
    %c19 = arith.constant 19 : index
    %c0_45 = arith.constant 0 : index
    %124 = vector.load %arg5[%c19, %c0_45] : memref<25x2048xf32, #tpu.memory_space<vmem>>, vector<1x128xf32>
    %c20 = arith.constant 20 : index
    %c0_46 = arith.constant 0 : index
    %125 = vector.load %arg5[%c20, %c0_46] : memref<25x2048xf32, #tpu.memory_space<vmem>>, vector<1x128xf32>
    %c21 = arith.constant 21 : index
    %c0_47 = arith.constant 0 : index
    %126 = vector.load %arg5[%c21, %c0_47] : memref<25x2048xf32, #tpu.memory_space<vmem>>, vector<1x128xf32>
    %c22 = arith.constant 22 : index
    %c0_48 = arith.constant 0 : index
    %127 = vector.load %arg5[%c22, %c0_48] : memref<25x2048xf32, #tpu.memory_space<vmem>>, vector<1x128xf32>
    %c23 = arith.constant 23 : index
    %c0_49 = arith.constant 0 : index
    %128 = vector.load %arg5[%c23, %c0_49] : memref<25x2048xf32, #tpu.memory_space<vmem>>, vector<1x128xf32>
    %c1 = arith.constant 1 : index
    %c0_50 = arith.constant 0 : index
    %c0_51 = arith.constant 0 : index
    %129 = vector.load %arg1[%c1, %c0_50, %c0_51] : memref<2x128x384xbf16, #tpu.memory_space<vmem>>, vector<1x128x384xbf16>
    %130 = vector.shape_cast %129 : vector<1x128x384xbf16> to vector<128x384xbf16>
    %c1_52 = arith.constant 1 : index
    %c0_53 = arith.constant 0 : index
    %c0_54 = arith.constant 0 : index
    %131 = vector.load %arg2[%c1_52, %c0_53, %c0_54] : memref<3x128x128xbf16, #tpu.memory_space<vmem>>, vector<1x128x128xbf16>
    %132 = vector.shape_cast %131 : vector<1x128x128xbf16> to vector<128x128xbf16>
    %c1_55 = arith.constant 1 : index
    %c0_56 = arith.constant 0 : index
    %c0_57 = arith.constant 0 : index
    %133 = vector.load %arg3[%c1_55, %c0_56, %c0_57] : memref<2x128x2048xbf16, #tpu.memory_space<vmem>>, vector<1x128x2048xbf16>
    %134 = vector.shape_cast %133 : vector<1x128x2048xbf16> to vector<128x2048xbf16>
    %c1_58 = arith.constant 1 : index
    %c0_59 = arith.constant 0 : index
    %c0_60 = arith.constant 0 : index
    %135 = vector.load %arg4[%c1_58, %c0_59, %c0_60] : memref<2x2048x128xbf16, #tpu.memory_space<vmem>>, vector<1x2048x128xbf16>
    %136 = vector.shape_cast %135 : vector<1x2048x128xbf16> to vector<2048x128xbf16>
    %137 = arith.truncf %120 : vector<16x128xf32> to vector<16x128xbf16>
    %cst_61 = arith.constant dense<0.000000e+00> : vector<16x384xf32>
    %138 = tpu.matmul %137, %130, %cst_61 {dimension_numbers = #tpu.dot_dimension_numbers<[1], [0], [0], [1], [0, 0, 1, 1], [], []>} : vector<16x128xbf16>, vector<128x384xbf16>, vector<16x384xf32> -> vector<16x384xf32>
    %139 = vector.broadcast %121 : vector<1x384xf32> to vector<16x384xf32>
    %140 = arith.addf %138, %139 : vector<16x384xf32>
    %141 = vector.extract_strided_slice %140 {offsets = [0, 0], sizes = [16, 128], strides = [1, 1]} : vector<16x384xf32> to vector<16x128xf32>
    %142 = vector.shape_cast %141 : vector<16x128xf32> to vector<2x8x128xf32>
    %143 = arith.truncf %142 : vector<2x8x128xf32> to vector<2x8x128xbf16>
    %144 = vector.extract_strided_slice %140 {offsets = [0, 128], sizes = [16, 128], strides = [1, 1]} : vector<16x384xf32> to vector<16x128xf32>
    %145 = vector.shape_cast %144 : vector<16x128xf32> to vector<2x8x128xf32>
    %146 = arith.truncf %145 : vector<2x8x128xf32> to vector<2x8x128xbf16>
    %147 = vector.extract_strided_slice %140 {offsets = [0, 256], sizes = [16, 128], strides = [1, 1]} : vector<16x384xf32> to vector<16x128xf32>
    %148 = vector.shape_cast %147 : vector<16x128xf32> to vector<2x8x128xf32>
    %149 = arith.truncf %148 : vector<2x8x128xf32> to vector<2x8x128xbf16>
    %150 = vector.extract_strided_slice %143 {offsets = [0, 0, 0], sizes = [2, 8, 64], strides = [1, 1, 1]} : vector<2x8x128xbf16> to vector<2x8x64xbf16>
    %151 = vector.extract_strided_slice %143 {offsets = [0, 0, 64], sizes = [2, 8, 64], strides = [1, 1, 1]} : vector<2x8x128xbf16> to vector<2x8x64xbf16>
    %152 = tpu.concatenate %150, %151 in 0 : vector<2x8x64xbf16>, vector<2x8x64xbf16> -> vector<4x8x64xbf16>
    %153 = vector.extract_strided_slice %146 {offsets = [0, 0, 0], sizes = [2, 8, 64], strides = [1, 1, 1]} : vector<2x8x128xbf16> to vector<2x8x64xbf16>
    %154 = vector.extract_strided_slice %146 {offsets = [0, 0, 64], sizes = [2, 8, 64], strides = [1, 1, 1]} : vector<2x8x128xbf16> to vector<2x8x64xbf16>
    %155 = tpu.concatenate %153, %154 in 0 : vector<2x8x64xbf16>, vector<2x8x64xbf16> -> vector<4x8x64xbf16>
    %156 = vector.extract_strided_slice %149 {offsets = [0, 0, 0], sizes = [2, 8, 64], strides = [1, 1, 1]} : vector<2x8x128xbf16> to vector<2x8x64xbf16>
    %157 = vector.extract_strided_slice %149 {offsets = [0, 0, 64], sizes = [2, 8, 64], strides = [1, 1, 1]} : vector<2x8x128xbf16> to vector<2x8x64xbf16>
    %158 = tpu.concatenate %156, %157 in 0 : vector<2x8x64xbf16>, vector<2x8x64xbf16> -> vector<4x8x64xbf16>
    "tpu.trace_start"() <{level = 10 : i32, message = "bqd,bkd->bqk"}> : () -> ()
    %cst_62 = arith.constant dense<0.000000e+00> : vector<4x8x8xf32>
    %159 = tpu.matmul %152, %155, %cst_62 {dimension_numbers = #tpu.dot_dimension_numbers<[2], [2], [1], [1], [0, 0, 0, 1, 1, 1], [0], [0]>} : vector<4x8x64xbf16>, vector<4x8x64xbf16>, vector<4x8x8xf32> -> vector<4x8x8xf32>
    "tpu.trace_stop"() : () -> ()
    %cst_63 = arith.constant dense<0xFF800000> : vector<4x8xf32>
    %160 = vector.multi_reduction <maximumf>, %159, %cst_63 [2] : vector<4x8x8xf32> to vector<4x8xf32>
    %161 = vector.shape_cast %160 : vector<4x8xf32> to vector<4x8x1xf32>
    %162 = vector.broadcast %161 : vector<4x8x1xf32> to vector<4x8x8xf32>
    %163 = arith.subf %159, %162 : vector<4x8x8xf32>
    %164 = math.exp %163 : vector<4x8x8xf32>
    %cst_64 = arith.constant dense<0.000000e+00> : vector<4x8xf32>
    %165 = vector.multi_reduction <add>, %164, %cst_64 [2] : vector<4x8x8xf32> to vector<4x8xf32>
    %166 = vector.shape_cast %165 : vector<4x8xf32> to vector<4x8x1xf32>
    %167 = tpu.reciprocal %166 {approx = true} : vector<4x8x1xf32> -> vector<4x8x1xf32>
    %168 = vector.broadcast %167 : vector<4x8x1xf32> to vector<4x8x8xf32>
    %169 = arith.mulf %164, %168 : vector<4x8x8xf32>
    %170 = arith.truncf %169 : vector<4x8x8xf32> to vector<4x8x8xbf16>
    "tpu.trace_start"() <{level = 10 : i32, message = "bqk,bkd->bqd"}> : () -> ()
    %cst_65 = arith.constant dense<0.000000e+00> : vector<4x8x64xf32>
    %171 = tpu.matmul %170, %158, %cst_65 {dimension_numbers = #tpu.dot_dimension_numbers<[2], [1], [1], [2], [0, 0, 0, 1, 1, 2], [0], [0]>} : vector<4x8x8xbf16>, vector<4x8x64xbf16>, vector<4x8x64xf32> -> vector<4x8x64xf32>
    "tpu.trace_stop"() : () -> ()
    %172 = vector.extract_strided_slice %171 {offsets = [0, 0, 0], sizes = [2, 8, 64], strides = [1, 1, 1]} : vector<4x8x64xf32> to vector<2x8x64xf32>
    %173 = vector.extract_strided_slice %171 {offsets = [2, 0, 0], sizes = [2, 8, 64], strides = [1, 1, 1]} : vector<4x8x64xf32> to vector<2x8x64xf32>
    %174 = tpu.concatenate %172, %173 in 2 : vector<2x8x64xf32>, vector<2x8x64xf32> -> vector<2x8x128xf32>
    %175 = vector.shape_cast %174 : vector<2x8x128xf32> to vector<16x128xf32>
    %176 = arith.truncf %175 : vector<16x128xf32> to vector<16x128xbf16>
    %cst_66 = arith.constant dense<0.000000e+00> : vector<16x128xf32>
    %177 = tpu.matmul %176, %132, %cst_66 {dimension_numbers = #tpu.dot_dimension_numbers<[1], [0], [0], [1], [0, 0, 1, 1], [], []>} : vector<16x128xbf16>, vector<128x128xbf16>, vector<16x128xf32> -> vector<16x128xf32>
    %178 = vector.broadcast %122 : vector<1x128xf32> to vector<16x128xf32>
    %179 = arith.addf %177, %178 : vector<16x128xf32>
    %180 = arith.addf %120, %179 : vector<16x128xf32>
    %cst_67 = arith.constant dense<0.000000e+00> : vector<16xf32>
    %181 = vector.multi_reduction <add>, %180, %cst_67 [1] : vector<16x128xf32> to vector<16xf32>
    %182 = vector.shape_cast %181 : vector<16xf32> to vector<16x1xf32>
    %cst_68 = arith.constant 1.280000e+02 : f32
    %183 = vector.broadcast %cst_68 : f32 to vector<16x1xf32>
    %184 = arith.divf %182, %183 : vector<16x1xf32>
    %185 = vector.broadcast %184 : vector<16x1xf32> to vector<16x128xf32>
    %186 = arith.subf %180, %185 : vector<16x128xf32>
    %187 = arith.mulf %186, %186 : vector<16x128xf32>
    %cst_69 = arith.constant dense<0.000000e+00> : vector<16xf32>
    %188 = vector.multi_reduction <add>, %187, %cst_69 [1] : vector<16x128xf32> to vector<16xf32>
    %189 = vector.shape_cast %188 : vector<16xf32> to vector<16x1xf32>
    %cst_70 = arith.constant 1.280000e+02 : f32
    %190 = vector.broadcast %cst_70 : f32 to vector<16x1xf32>
    %191 = arith.divf %189, %190 : vector<16x1xf32>
    %192 = vector.broadcast %184 : vector<16x1xf32> to vector<16x128xf32>
    %193 = arith.subf %180, %192 : vector<16x128xf32>
    %cst_71 = arith.constant 9.99999974E-6 : f32
    %194 = vector.broadcast %cst_71 : f32 to vector<16x1xf32>
    %195 = arith.addf %191, %194 : vector<16x1xf32>
    %196 = math.rsqrt %195 : vector<16x1xf32>
    %197 = vector.broadcast %196 : vector<16x1xf32> to vector<16x128xf32>
    %198 = arith.mulf %193, %197 : vector<16x128xf32>
    %199 = vector.broadcast %125 : vector<1x128xf32> to vector<16x128xf32>
    %200 = arith.mulf %198, %199 : vector<16x128xf32>
    %201 = vector.broadcast %126 : vector<1x128xf32> to vector<16x128xf32>
    %202 = arith.addf %200, %201 : vector<16x128xf32>
    %203 = arith.truncf %202 : vector<16x128xf32> to vector<16x128xbf16>
    %cst_72 = arith.constant dense<0.000000e+00> : vector<16x2048xf32>
    %204 = tpu.matmul %203, %134, %cst_72 {dimension_numbers = #tpu.dot_dimension_numbers<[1], [0], [0], [1], [0, 0, 1, 1], [], []>} : vector<16x128xbf16>, vector<128x2048xbf16>, vector<16x2048xf32> -> vector<16x2048xf32>
    %205 = vector.broadcast %123 : vector<1x2048xf32> to vector<16x2048xf32>
    %206 = arith.addf %204, %205 : vector<16x2048xf32>
    %cst_73 = arith.constant 0.000000e+00 : f32
    %207 = vector.broadcast %cst_73 : f32 to vector<16x2048xf32>
    %208 = arith.maximumf %206, %207 : vector<16x2048xf32>
    %209 = arith.truncf %208 : vector<16x2048xf32> to vector<16x2048xbf16>
    %cst_74 = arith.constant dense<0.000000e+00> : vector<16x128xf32>
    %210 = tpu.matmul %209, %136, %cst_74 {dimension_numbers = #tpu.dot_dimension_numbers<[1], [0], [0], [1], [0, 0, 1, 1], [], []>} : vector<16x2048xbf16>, vector<2048x128xbf16>, vector<16x128xf32> -> vector<16x128xf32>
    %211 = vector.broadcast %124 : vector<1x128xf32> to vector<16x128xf32>
    %212 = arith.addf %210, %211 : vector<16x128xf32>
    %213 = arith.addf %202, %212 : vector<16x128xf32>
    %cst_75 = arith.constant dense<0.000000e+00> : vector<16xf32>
    %214 = vector.multi_reduction <add>, %213, %cst_75 [1] : vector<16x128xf32> to vector<16xf32>
    %215 = vector.shape_cast %214 : vector<16xf32> to vector<16x1xf32>
    %cst_76 = arith.constant 1.280000e+02 : f32
    %216 = vector.broadcast %cst_76 : f32 to vector<16x1xf32>
    %217 = arith.divf %215, %216 : vector<16x1xf32>
    %218 = vector.broadcast %217 : vector<16x1xf32> to vector<16x128xf32>
    %219 = arith.subf %213, %218 : vector<16x128xf32>
    %220 = arith.mulf %219, %219 : vector<16x128xf32>
    %cst_77 = arith.constant dense<0.000000e+00> : vector<16xf32>
    %221 = vector.multi_reduction <add>, %220, %cst_77 [1] : vector<16x128xf32> to vector<16xf32>
    %222 = vector.shape_cast %221 : vector<16xf32> to vector<16x1xf32>
    %cst_78 = arith.constant 1.280000e+02 : f32
    %223 = vector.broadcast %cst_78 : f32 to vector<16x1xf32>
    %224 = arith.divf %222, %223 : vector<16x1xf32>
    %225 = vector.broadcast %217 : vector<16x1xf32> to vector<16x128xf32>
    %226 = arith.subf %213, %225 : vector<16x128xf32>
    %cst_79 = arith.constant 9.99999974E-6 : f32
    %227 = vector.broadcast %cst_79 : f32 to vector<16x1xf32>
    %228 = arith.addf %224, %227 : vector<16x1xf32>
    %229 = math.rsqrt %228 : vector<16x1xf32>
    %230 = vector.broadcast %229 : vector<16x1xf32> to vector<16x128xf32>
    %231 = arith.mulf %226, %230 : vector<16x128xf32>
    %232 = vector.broadcast %127 : vector<1x128xf32> to vector<16x128xf32>
    %233 = arith.mulf %231, %232 : vector<16x128xf32>
    %234 = vector.broadcast %128 : vector<1x128xf32> to vector<16x128xf32>
    %235 = arith.addf %233, %234 : vector<16x128xf32>
    %236 = vector.shape_cast %235 : vector<16x128xf32> to vector<2x8x128xf32>
    %cst_80 = arith.constant dense<0.000000e+00> : vector<8x128xf32>
    %237 = vector.multi_reduction <add>, %236, %cst_80 [0] : vector<2x8x128xf32> to vector<8x128xf32>
    %cst_81 = arith.constant 2.000000e+00 : f32
    %238 = vector.broadcast %cst_81 : f32 to vector<8x128xf32>
    %239 = arith.divf %237, %238 : vector<8x128xf32>
    %c24 = arith.constant 24 : index
    %c0_82 = arith.constant 0 : index
    %240 = vector.load %arg5[%c24, %c0_82] : memref<25x2048xf32, #tpu.memory_space<vmem>>, vector<1x128xf32>
    %241 = arith.truncf %239 : vector<8x128xf32> to vector<8x128xbf16>
    %c2 = arith.constant 2 : index
    %c0_83 = arith.constant 0 : index
    %c0_84 = arith.constant 0 : index
    %242 = vector.load %arg2[%c2, %c0_83, %c0_84] : memref<3x128x128xbf16, #tpu.memory_space<vmem>>, vector<1x128x128xbf16>
    %243 = vector.shape_cast %242 : vector<1x128x128xbf16> to vector<128x128xbf16>
    %cst_85 = arith.constant dense<0.000000e+00> : vector<8x128xf32>
    %244 = tpu.matmul %241, %243, %cst_85 {dimension_numbers = #tpu.dot_dimension_numbers<[1], [0], [0], [1], [0, 0, 1, 1], [], []>} : vector<8x128xbf16>, vector<128x128xbf16>, vector<8x128xf32> -> vector<8x128xf32>
    %245 = vector.broadcast %240 : vector<1x128xf32> to vector<8x128xf32>
    %246 = arith.addf %244, %245 : vector<8x128xf32>
    %c0_86 = arith.constant 0 : index
    %c0_87 = arith.constant 0 : index
    %247 = vector.load %arg6[%c0_86, %c0_87] : memref<8x128xf32, #tpu.memory_space<vmem>>, vector<8x128xf32>
    tpu.vector_store %arg6[%c0_86, %c0_87], %246 {strides = array<i32>} : memref<8x128xf32, #tpu.memory_space<vmem>>, vector<8x128xf32>,
    return
  }
}

</mosaic_0001>

<bundles_post_ra>
// kernel: gated_transformer_forward.1
= control target key start
LH: loop header
LB: loop body
LE: loop exit
PB: predicated region body
PF: predicated region fallthrough
CT: control target
= control target key end

     0   :  { %11 = vsyncpa [#allocation3], 0  ;;  %s9398_s0 = inlined_call_operand.vmem [shape: f32[2,8,128], index: 0, kind: input, shape index: {}]   ;;  %s9399_s1 = inlined_call_operand.hbm [shape: bf16[2,128,384], index: 1, kind: input, shape index: {}]   ;;  %s9400_s2 = inlined_call_operand.hbm [shape: bf16[3,128,128], index: 2, kind: input, shape index: {}]   ;;  %s9401_s3 = inlined_call_operand.hbm [shape: bf16[2,128,2048], index: 3, kind: input, shape index: {}]   ;;  %s9402_s4 = inlined_call_operand.hbm [shape: bf16[2,2048,128], index: 4, kind: input, shape index: {}]   ;;  %s9403_s5 = inlined_call_operand.hbm [shape: f32[25,2048], index: 5, kind: input, shape index: {}]   ;;  %s9404_s6 = inlined_call_operand.vmem [shape: f32[8,128], index: 6, kind: output, shape index: {}]  }
   0x1   :  { %12 = vsyncpa [#allocation5], 0 }
   0x2   :  { %13 = vsyncpa [#allocation8], 0  ;;  %s8939_s21 = smov [#allocation4]  }
   0x3   :  { %s33_s22 = sshll.u32 %s8939_s21, 4  ;;  %s34_s22 = int_to_ptr.vmem [resolvable:$true] %s33_s22 }
   0x4   :  { %s8841_s23 = scalar_lea.vmem %s34_s22, 3072  ;;  %p8846_p1 = scmp.lt.s32.totalorder %s34_s22, %s34_s22 }
   0x5   :  { %p8842_p0 = scmp.ne.s32.totalorder %s34_s22, %s8841_s23  ;;  %p8847_p2 = scmp.lt.s32.totalorder %s8841_s23, %s8841_s23 }
   0x7   :  { %p8848_p3 = por %p8847_p2, %p8846_p1 }
   0x9   :  { %p8849_p4 = pnand %p8848_p3, %p8842_p0 }
   0xb   :  { %8852 = shalt.err (!%p8849_p4)
}
   0xc   :  { %s8940_s24 = smov 64   ;;  %s8941_s25 = smov 4  }
   0xd   :  { %39 = dma.hbm_to_vmem [thread:$0]  %s9400_s2, 3072, %s34_s22, [#allocation5], %s8940_s24, %s8940_s24, %s8941_s25  }
   0xe   :  { %s8942_s28 = smov [#allocation7]   ;;  %s8943_s30 = smov [#allocation2]  }
   0xf   :  { %s57_s29 = sshll.u32 %s8942_s28, 4  ;;  %s21_s7 = sshll.u32 %s8943_s30, 4  ;;  %s58_s29 = int_to_ptr.vmem [resolvable:$true] %s57_s29  ;;  %s22_s7 = int_to_ptr.vmem [resolvable:$true] %s21_s7 }
  0x10   :  { %s8861_s8 = scalar_lea.vmem %s58_s29, 32768  ;;  %p8866_p6 = scmp.lt.s32.totalorder %s58_s29, %s58_s29 }
  0x11   :  { %p8862_p5 = scmp.ne.s32.totalorder %s58_s29, %s8861_s8  ;;  %p8867_p7 = scmp.lt.s32.totalorder %s8861_s8, %s8861_s8 }
  0x13   :  { %p8868_p8 = por %p8867_p7, %p8866_p6 }
  0x15   :  { %p8869_p9 = pnand %p8868_p8, %p8862_p5 }
  0x17   :  { %8872 = shalt.err (!%p8869_p9)
}
  0x18   :  { %63 = dma.hbm_to_vmem [thread:$0]  %s9402_s4, 32768, %s58_s29, [#allocation8], %s8940_s24, %s8940_s24, %s8941_s25  }
  0x19   :  { %s8881_s2 = scalar_lea.vmem %s22_s7, 6144  ;;  %p8886_p11 = scmp.lt.s32.totalorder %s22_s7, %s22_s7 }
  0x1a   :  { %p8882_p10 = scmp.ne.s32.totalorder %s22_s7, %s8881_s2  ;;  %p8887_p12 = scmp.lt.s32.totalorder %s8881_s2, %s8881_s2 }
  0x1c   :  { %p8888_p13 = por %p8887_p12, %p8886_p11 }
  0x1e   :  { %p8889_p0 = pnand %p8888_p13, %p8882_p10 }
  0x20   :  { %8892 = shalt.err (!%p8889_p0)
}
  0x21   :  { %s8944_s11 = smov 192   ;;  %s8945_s12 = smov 12  }
  0x22   :  { %27 = dma.hbm_to_vmem [thread:$0]  %s9399_s1, 6144, %s22_s7, [#allocation3], %s8944_s11, %s8944_s11, %s8945_s12  }
  0x23   :  { %s8946_s15 = smov [#allocation6]  }
  0x24   :  { %s45_s16 = sshll.u32 %s8946_s15, 4  ;;  %s46_s16 = int_to_ptr.vmem [resolvable:$true] %s45_s16 }
  0x25   :  { %s8901_s17 = scalar_lea.vmem %s46_s16, 32768  ;;  %p8906_p2 = scmp.lt.s32.totalorder %s46_s16, %s46_s16 }
  0x26   :  { %p8902_p1 = scmp.ne.s32.totalorder %s46_s16, %s8901_s17  ;;  %p8907_p3 = scmp.lt.s32.totalorder %s8901_s17, %s8901_s17 }
  0x28   :  { %p8908_p4 = por %p8907_p3, %p8906_p2 }
  0x2a   :  { %p8909_p5 = pnand %p8908_p4, %p8902_p1 }
  0x2c   :  { %8912 = shalt.err (!%p8909_p5)
}
  0x2d   :  { %s8947_s4 = smov 1024   ;;  %s8948_s20 = smov [#allocation9]  }
  0x2e   :  { %51 = dma.hbm_to_vmem [thread:$0]  %s9401_s3, 32768, %s46_s16, [#allocation5], %s8947_s4, %s8947_s4, %s8940_s24  }
  0x2f   :  { %s69_s21 = sshll.u32 %s8948_s20, 4  ;;  %s70_s21 = int_to_ptr.vmem [resolvable:$true] %s69_s21 }
  0x30   :  { %s8921_s1 = scalar_lea.vmem %s70_s21, 8192  ;;  %p8926_p7 = scmp.lt.s32.totalorder %s70_s21, %s70_s21 }
  0x31   :  { %p8922_p6 = scmp.ne.s32.totalorder %s70_s21, %s8921_s1  ;;  %p8927_p8 = scmp.lt.s32.totalorder %s8921_s1, %s8921_s1 }
  0x33   :  { %p8928_p9 = por %p8927_p8, %p8926_p7 }
  0x35   :  { %p8929_p10 = pnand %p8928_p9, %p8922_p6 }
  0x37   :  { %8932 = shalt.err (!%p8929_p10)
}
  0x38   :  { %s8949_s22 = smov 2048   ;;  %s8950_s23 = smov 128  }
  0x39   :  { %75 = dma.hbm_to_vmem [thread:$0]  %s9403_s5, 8192, %s70_s21, [#allocation8], %s8949_s22, %s8949_s22, %s8950_s23  }
  0x3a   :  { %8933 = dma.done.wait [#allocation3], 6144  }
  0x3b   :  { %8934 = vsyncadd [#allocation3], 4294961152 }
  0x3c   :  { %8935 = dma.done.wait [#allocation5], 35840  }
  0x3d   :  { %8936 = vsyncadd [#allocation5], 4294931456 }
  0x3e   :  { %8937 = dma.done.wait [#allocation8], 40960  }
  0x3f   :  { %8938 = vsyncadd [#allocation8], 4294926336  ;;  %v8951_v0 = vmov 0   ;;  %v8952_v1 = vmov 0.0   ;;  %v8441_v2 = vld [vmem:[#allocation2 + $0xac] ss:$12 sps:$4 sm:$0xff]   ;;  %v547_v32 = vlaneseq }
  0x40   :  { %722 = vmatprep.mubr.bf16.mxu0 %v8951_v0  ;;  %8220 = vmatprep.subr.bf16.mxu1 %v8952_v1  ;;  %v8443_v3 = vld [vmem:[#allocation2 + $0xa8] ss:$12 sps:$4 sm:$0xff]   ;;  %v8446_v5 = vld [vmem:[#allocation2 + $0x90] ss:$12 sps:$4 sm:$0xff]   ;;  %v8449_v7 = vld [vmem:[#allocation2 + $0x78] ss:$12 sps:$4 sm:$0xff]  }
  0x41   :  { %690 = vmatprep.subr.bf16.mxu0 %v8441_v2  ;;  %v8444_v4 = vld [vmem:[#allocation2 + $0x94] ss:$12 sps:$4 sm:$0xff]   ;;  %v8447_v6 = vld [vmem:[#allocation2 + $0x7c] ss:$12 sps:$4 sm:$0xff]   ;;  %v8450_v8 = vld [vmem:[#allocation2 + $0x64] ss:$12 sps:$4 sm:$0xff]  }
  0x42   :  { %691 = vmatpush1.bf16.msra.mxu0 %v8443_v3  ;;  %v8452_v9 = vld [vmem:[#allocation2 + $0x60] ss:$12 sps:$4 sm:$0xff]   ;;  %v8465_v11 = vld [vmem:[#allocation2 + $0xb0] ss:$12 sps:$4 sm:$0xff]   ;;  %v8466_v12 = vld [vmem:[#allocation2 + $0x98] ss:$12 sps:$4 sm:$0xff]  }
  0x43   :  { %692 = vmatprep.subr.bf16.mxu0 %v8444_v4  ;;  %v8453_v10 = vld [vmem:[#allocation2 + $0x4c] ss:$12 sps:$4 sm:$0xff]   ;;  %8221 = vmatpush3.bf16.msra.mxu1 %v8465_v11  ;;  %v8455_v13 = vld [vmem:[#allocation2 + $0x48] ss:$12 sps:$4 sm:$0xff]   ;;  %v8458_v15 = vld [vmem:[#allocation2 + $0x30] ss:$12 sps:$4 sm:$0xff]  }
  0x44   :  { %8222 = vmatprep.subr.bf16.mxu1 %v8952_v1  ;;  %v8456_v14 = vld [vmem:[#allocation2 + $0x34] ss:$12 sps:$4 sm:$0xff]   ;;  %v8459_v17 = vld [vmem:[#allocation2 + $0x1c] ss:$12 sps:$4 sm:$0xff]   ;;  %v8461_v19 = vld [vmem:[#allocation2 + $0x18] ss:$12 sps:$4 sm:$0xff]  }
  0x45   :  { %v8467_v16 = vld [vmem:[#allocation2 + $0x80] ss:$12 sps:$4 sm:$0xff]   ;;  %v8468_v18 = vld [vmem:[#allocation2 + $0x68] ss:$12 sps:$4 sm:$0xff]   ;;  %v8462_v23 = vld [vmem:[#allocation2 + $0x4] ss:$12 sps:$4 sm:$0xff]  }
  0x46   :  { %693 = vmatpush1.bf16.msra.mxu0 %v8446_v5  ;;  %v92_v20 = vld [vmem:[#allocation9] sm:$0xff]  ;;  %v94_v22 = vld [vmem:[%s9398_s0 + $0x8] sm:$0xff]  ;;  %v8469_v24 = vld [vmem:[#allocation2 + $0x50] ss:$12 sps:$4 sm:$0xff]   ;;  %vm8953_vm0 = vmmov 0   ;;  %v9038_v33 = vshrl.u32 %v547_v32, 7 }
  0x47   :  { %694 = vmatprep.subr.bf16.mxu0 %v8447_v6  ;;  %8223 = vmatpush3.bf16.msra.mxu1 %v8466_v12  ;;  %v93_v21 = vld [vmem:[%s9398_s0] sm:$0xff]  ;;  %v9022_v27 = vadd.f32 %v94_v22, %v92_v20  ;;  %v8472_v31 = vld [vmem:[#allocation2 + $0x8] ss:$12 sps:$4 sm:$0xff]   ;;  %vm798_vm1 = vcmask 523264   ;;  %vm1035_vm2 = vcmask 1043456   ;;  %vm983_vm3 = vcmask 64512  }
  0x48   :  { %8224 = vmatprep.subr.bf16.mxu1 %v8952_v1  ;;  %v8464_v25 = vld [vmem:[#allocation2] ss:$12 sps:$4 sm:$0xff]   ;;  %v9020_v26 = vadd.f32 %v93_v21, %v92_v20  ;;  %v8470_v29 = vld [vmem:[#allocation2 + $0x38] ss:$12 sps:$4 sm:$0xff]   ;;  %8236 = vmatprep.mubr.msk.bf16.mxu1 %vm8953_vm0, %v8952_v1  ;;  %v9041_v34 = vsub.s32 0, %v9038_v33  ;;  %v9044_v36 = vsub.s32 1, %v9038_v33 }
  0x49   :  { %v8471_v30 = vld [vmem:[#allocation2 + $0x20] ss:$12 sps:$4 sm:$0xff]   ;;  %v9063_v57 = vsub.s32 2, %v9038_v33 }
  0x4a   :  { %695 = vmatpush1.bf16.msra.mxu0 %v8449_v7  ;;  %v545_v28 = vpack.c.bf16 %v9022_v27, %v9020_v26  ;;  %v98_v35 = vld [vmem:[#allocation9 + $0x80] ss:$8 sm:$0x7] }
  0x4b   :  { %696 = vmatprep.subr.bf16.mxu0 %v8450_v8  ;;  %8225 = vmatpush3.bf16.msra.mxu1 %v8467_v16  ;;  %v550_v37 = vrot.slane %v98_v35, %v9041_v34  ;;  %v554_v38 = vrot.slane %v98_v35, %v9044_v36  ;;  %v558_v58 = vrot.slane %v98_v35, %v9063_v57 }
  0x4c   :  { %8226 = vmatprep.subr.bf16.mxu1 %v8952_v1 }
  0x4e   :  { %697 = vmatpush1.bf16.msra.mxu0 %v8452_v9 }
  0x4f   :  { %698 = vmatprep.subr.bf16.mxu0 %v8453_v10  ;;  %8227 = vmatpush3.bf16.msra.mxu1 %v8468_v18 }
  0x50   :  { %8228 = vmatprep.subr.bf16.mxu1 %v8952_v1 }
  0x52   :  { %699 = vmatpush1.bf16.msra.mxu0 %v8455_v13 }
  0x53   :  { %700 = vmatprep.subr.bf16.mxu0 %v8456_v14  ;;  %8229 = vmatpush3.bf16.msra.mxu1 %v8469_v24 }
  0x54   :  { %8230 = vmatprep.subr.bf16.mxu1 %v8952_v1 }
  0x56   :  { %701 = vmatpush1.bf16.msra.mxu0 %v8458_v15 }
  0x57   :  { %702 = vmatprep.subr.bf16.mxu0 %v8459_v17  ;;  %8231 = vmatpush3.bf16.msra.mxu1 %v8470_v29 }
  0x58   :  { %8232 = vmatprep.subr.bf16.mxu1 %v8952_v1 }
  0x5a   :  { %703 = vmatpush1.bf16.msra.mxu0 %v8461_v19 }
  0x5b   :  { %704 = vmatprep.subr.bf16.mxu0 %v8462_v23  ;;  %8233 = vmatpush3.bf16.msra.mxu1 %v8471_v30 }
  0x5c   :  { %8234 = vmatprep.subr.bf16.mxu1 %v8952_v1 }
  0x5e   :  { %705 = vmatpush1.bf16.msra.mxu0 %v8464_v25 }
  0x5f   :  { %8240 = vmatprep.subr.bf16.mxu0 %v8952_v1  ;;  %8235 = vmatpush3.bf16.msra.mxu1 %v8472_v31 }
  0x60   :  { %8246 = vmatprep.subr.bf16.mxu1 %v8952_v1 }
  0x61   :  { %723 = vmatmul.mubr.bf16.vlgmr.msra.gmra.mxu0 %v545_v28 }
  0x62   :  { %8242 = vmatprep.mubr.msk.bf16.mxu0 %vm8953_vm0, %v8952_v1  ;;  %8237 = vmatmul.mubr.bf16.vlgmr.msra.gmra.mxu1 %v545_v28 }
  0x63   :  { %8248 = vmatprep.mubr.msk.bf16.mxu1 %vm8953_vm0, %v8952_v1 }
 0x121   :  { %v724_v39 = vpop.f32.mrf.mxu0 }
 0x122   :  { %v725_v40 = vadd.f32 %v724_v39, %v550_v37  ;;  %v767_v53 = vpop.f32.mrf.mxu1 }
 0x123   :  { %v726_v41 = vpop.f32.mrf.mxu0  ;;  %v768_v59 = vadd.f32 %v767_v53, %v558_v58 }
 0x124   :  { %v774_v42 = vpack.c.bf16 %v725_v40, %v725_v40  ;;  %v727_v43 = vadd.f32 %v726_v41, %v554_v38  ;;  %v8238_v54 = vpop.f32.mrf.mxu1 }
 0x125   :  { %v728_v44 = vpop.f32.mrf.mxu0  ;;  %v9067_v62 = vpack.c.bf16 %v768_v59, %v768_v59 }
 0x126   :  { %v776_v45 = vpack.c.bf16 %v727_v43, %v727_v43  ;;  %v729_v46 = vadd.f32 %v728_v44, %v550_v37  ;;  %782 = vrot.lane.b32.xlu1 %v774_v42, %s8940_s24  ;;  %v770_v55 = vpop.f32.mrf.mxu1 }
 0x127   :  { %v730_v47 = vpop.f32.mrf.mxu0  ;;  %v771_v63 = vadd.f32 %v770_v55, %v558_v58  ;;  %v1037_v5 = vsel %vm1035_vm2, %v9067_v62, 0 }
 0x128   :  { %v803_v48 = vsel %vm798_vm1, %v776_v45, 0  ;;  %v775_v49 = vpack.c.bf16 %v729_v46, %v729_v46  ;;  %v731_v50 = vadd.f32 %v730_v47, %v554_v38  ;;  %788 = vrot.lane.b32.xlu0 %v776_v45, %s8940_s24  ;;  %v8239_v56 = vpop.f32.mrf.mxu1 }
 0x129   :  { %8241 = vmatpush3.bf16.xpose.msra.mxu0 %v803_v48  ;;  %v9073_v6 = vpack.c.bf16 %v771_v63, %v771_v63 }
 0x12a   :  { %v777_v51 = vpack.c.bf16 %v731_v50, %v731_v50  ;;  %784 = vrot.lane.b32.xlu1 %v775_v49, %s8940_s24  ;;  %8252 = vmatprep.subr.bf16.mxu0 %v8952_v1 }
 0x12b   :  { %v1083_v7 = vsel %vm1035_vm2, %v9073_v6, 0 }
 0x12c   :  { %v849_v52 = vsel %vm798_vm1, %v777_v51, 0  ;;  %790 = vrot.lane.b32.xlu0 %v777_v51, %s8940_s24 }
 0x12d   :  { %8247 = vmatpush3.bf16.xpose.msra.mxu1 %v849_v52 }
 0x12e   :  { %8258 = vmatprep.subr.bf16.mxu1 %v8952_v1 }
 0x130   :  { %8243 = vmatmul.mubr.msk.bf16.vlgmr.msra.gmra.mxu0 %vm798_vm1, %v774_v42 }
 0x131   :  { %8254 = vmatprep.mubr.msk.bf16.mxu0 %vm8953_vm0, %v8952_v1 }
 0x134   :  { %8249 = vmatmul.mubr.msk.bf16.vlgmr.msra.gmra.mxu1 %vm798_vm1, %v775_v49 }
 0x135   :  { %8260 = vmatprep.mubr.msk.bf16.mxu1 %vm8953_vm0, %v8952_v1 }
 0x198   :  { %v783_v4 = vpop.permute.xlu1 %782 }
 0x19a   :  { %v789_v60 = vpop.permute.xlu0 %788 }
 0x19b   :  { %v895_v61 = vsel %vm798_vm1, %v789_v60, 0 }
 0x19c   :  { %8253 = vmatpush3.bf16.xpose.msra.mxu0 %v895_v61  ;;  %v785_v8 = vpop.permute.xlu1 %784 }
 0x19d   :  { %8264 = vmatprep.subr.bf16.mxu0 %v8952_v1 }
 0x19e   :  { %v791_v2 = vpop.permute.xlu0 %790 }
 0x19f   :  { %v941_v3 = vsel %vm798_vm1, %v791_v2, 0 }
 0x1a0   :  { %8259 = vmatpush3.bf16.xpose.msra.mxu1 %v941_v3 }
 0x1a1   :  { %8270 = vmatprep.subr.bf16.mxu1 %v8952_v1 }
 0x1a3   :  { %8255 = vmatmul.mubr.msk.bf16.vlgmr.msra.gmra.mxu0 %vm798_vm1, %v783_v4 }
 0x1a4   :  { %8265 = vmatpush3.bf16.msra.mxu0 %v1037_v5  ;;  %8266 = vmatprep.mubr.msk.bf16.mxu0 %vm8953_vm0, %v8952_v1 }
 0x1a5   :  { %8276 = vmatprep.subr.bf16.mxu0 %v8952_v1 }
 0x1a7   :  { %8261 = vmatmul.mubr.msk.bf16.vlgmr.msra.gmra.mxu1 %vm798_vm1, %v785_v8 }
 0x1a8   :  { %8271 = vmatpush3.bf16.msra.mxu1 %v1083_v7  ;;  %8272 = vmatprep.mubr.msk.bf16.mxu1 %vm8953_vm0, %v8952_v1 }
 0x1a9   :  { %8282 = vmatprep.subr.bf16.mxu1 %v8952_v1 }
 0x1f0   :  { %v839_v9 = vpop.f32.mrf.mxu0 }
 0x1f1   :  { %v984_v10 = vsel %vm983_vm3, %v839_v9, -inf }
 0x1f2   :  { %985 = vmax.xlane.f32.xlu0 %v984_v10  ;;  %v8244_v11 = vpop.f32.mrf.mxu0 }
 0x1f4   :  { %v842_v12 = vpop.f32.mrf.mxu0  ;;  %v885_v13 = vpop.f32.mrf.mxu1 }
 0x1f5   :  { %v987_v14 = vsel %vm983_vm3, %v885_v13, -inf }
 0x1f6   :  { %v8250_v15 = vpop.f32.mrf.mxu1  ;;  %988 = vmax.xlane.f32.xlu1 %v987_v14  ;;  %v8245_v16 = vpop.f32.mrf.mxu0  ;;  %v8474_v14 = vld [vmem:[#allocation4 + $0x30] sm:$0xff]  }
 0x1f8   :  { %v888_v17 = vpop.f32.mrf.mxu1 }
 0x1f9   :  { %v8475_v17 = vld [vmem:[#allocation4 + $0x28] sm:$0xff]  }
 0x1fa   :  { %v8251_v18 = vpop.f32.mrf.mxu1 }
 0x263   :  { %v931_v19 = vpop.f32.mrf.mxu0 }
 0x264   :  { %v990_v20 = vsel %vm983_vm3, %v931_v19, -inf }
 0x265   :  { %991 = vmax.xlane.f32.xlu0 %v990_v20  ;;  %v8256_v21 = vpop.f32.mrf.mxu0 }
 0x267   :  { %v934_v22 = vpop.f32.mrf.mxu0  ;;  %v977_v23 = vpop.f32.mrf.mxu1 }
 0x268   :  { %v993_v24 = vsel %vm983_vm3, %v977_v23, -inf  ;;  %v8476_v22 = vld [vmem:[#allocation4 + $0x20] sm:$0xff]  }
 0x269   :  { %v8262_v25 = vpop.f32.mrf.mxu1  ;;  %994 = vmax.xlane.f32.xlu0 %v993_v24  ;;  %v8257_v28 = vpop.f32.mrf.mxu0 }
 0x26a   :  { %v8477_v25 = vld [vmem:[#allocation4 + $0x18] sm:$0xff]   ;;  %v8478_v28 = vld [vmem:[#allocation4 + $0x10] sm:$0xff]  }
 0x26b   :  { %v980_v29 = vpop.f32.mrf.mxu1 }
 0x26c   :  { %v8479_v29 = vld [vmem:[#allocation4 + $0x8] sm:$0xff]  }
 0x26d   :  { %v8263_v30 = vpop.f32.mrf.mxu1 }
 0x26e   :  { %v8480_v30 = vld [vmem:[#allocation4] sm:$0xff]  }
 0x27b   :  { %v986_v31 = vpop.xlane.xlu0 %985 }
 0x27c   :  { %v996_v32 = vsub.f32 %v839_v9, %v986_v31 }
 0x27e   :  { %v1000_v35 = vmul.f32 1.442695, %v996_v32 }
 0x27f   :  { %v989_v37 = vpop.xlane.xlu1 %988 }
 0x280   :  { %8785 = vpow2.f32 %v1000_v35  ;;  %v997_v38 = vsub.f32 %v885_v13, %v989_v37  ;;  %v8473_v13 = vld [vmem:[#allocation4 + $0x38] sm:$0xff]  }
 0x282   :  { %v1002_v39 = vmul.f32 1.442695, %v997_v38 }
 0x284   :  { %8787 = vpow2.f32 %v1002_v39 }
 0x28d   :  { %v8786_v40 = vpop.eup %8785 }
 0x28e   :  { %v1008_v41 = vsel %vm983_vm3, %v8786_v40, 0.0 }
 0x28f   :  { %1009 = vadd.xlane.f32.xlu1 %v1008_v41 }
 0x291   :  { %v8788_v42 = vpop.eup %8787 }
 0x292   :  { %v1011_v43 = vsel %vm983_vm3, %v8788_v42, 0.0 }
 0x293   :  { %1012 = vadd.xlane.f32.xlu0 %v1011_v43 }
 0x2ee   :  { %v992_v44 = vpop.xlane.xlu0 %991 }
 0x2ef   :  { %v998_v45 = vsub.f32 %v931_v19, %v992_v44 }
 0x2f1   :  { %v1004_v46 = vmul.f32 1.442695, %v998_v45 }
 0x2f2   :  { %v995_v47 = vpop.xlane.xlu0 %994 }
 0x2f3   :  { %8789 = vpow2.f32 %v1004_v46  ;;  %v999_v48 = vsub.f32 %v977_v23, %v995_v47 }
 0x2f5   :  { %v1006_v49 = vmul.f32 1.442695, %v999_v48 }
 0x2f7   :  { %8791 = vpow2.f32 %v1006_v49  ;;  %v99_v49 = vld [vmem:[#allocation9 + $0x81] ss:$0 sm:$0xff] }
 0x300   :  { %v8790_v50 = vpop.eup %8789 }
 0x301   :  { %v1014_v51 = vsel %vm983_vm3, %v8790_v50, 0.0 }
 0x302   :  { %1015 = vadd.xlane.f32.xlu1 %v1014_v51 }
 0x304   :  { %v8792_v52 = vpop.eup %8791 }
 0x305   :  { %v1017_v53 = vsel %vm983_vm3, %v8792_v52, 0.0 }
 0x306   :  { %1018 = vadd.xlane.f32.xlu0 %v1017_v53 }
 0x313   :  { %794 = vrot.lane.b32.xlu1 %v9067_v62, %s8940_s24 }
 0x318   :  { %v1010_v54 = vpop.xlane.xlu1 %1009 }
 0x319   :  { %8793 = vrcp.f32 %v1010_v54 }
 0x31c   :  { %796 = vrot.lane.b32.xlu0 %v9073_v6, %s8940_s24  ;;  %v1013_v55 = vpop.xlane.xlu0 %1012 }
 0x31d   :  { %8795 = vrcp.f32 %v1013_v55 }
 0x326   :  { %v8794_v56 = vpop.eup %8793 }
 0x327   :  { %v1024_v58 = vmul.f32 %v8794_v56, %v8786_v40 }
 0x329   :  { %v1028_v59 = vpack.c.bf16 %v1024_v58, %v1024_v58 }
 0x32a   :  { %v8796_v60 = vpop.eup %8795 }
 0x32b   :  { %8267 = vmatmul.mubr.msk.bf16.vlgmr.msra.gmra.mxu0 %vm983_vm3, %v1028_v59  ;;  %v1025_v61 = vmul.f32 %v8796_v60, %v8788_v42  ;;  %v273_v59 = vld [vmem:[#allocation6 + $0x380] sm:$0xff] }
 0x32c   :  { %8278 = vmatprep.mubr.msk.bf16.mxu0 %vm8953_vm0, %v8952_v1  ;;  %v281_v60 = vld [vmem:[#allocation6 + $0x3c0] sm:$0xff] }
 0x32d   :  { %v1029_v63 = vpack.c.bf16 %v1025_v61, %v1025_v61  ;;  %v274_v61 = vld [vmem:[#allocation6 + $0x388] sm:$0xff] }
 0x32f   :  { %8273 = vmatmul.mubr.msk.bf16.vlgmr.msra.gmra.mxu1 %vm983_vm3, %v1029_v63  ;;  %v7343_v63 = vcombine.low %v273_v59, %v281_v60 }
 0x330   :  { %8284 = vmatprep.mubr.msk.bf16.mxu1 %vm8953_vm0, %v8952_v1 }
 0x38b   :  { %v1016_v62 = vpop.xlane.xlu1 %1015 }
 0x38c   :  { %8797 = vrcp.f32 %v1016_v62  ;;  %v7344_v62 = vcombine.high %v273_v59, %v281_v60  ;;  %v178_v59 = vld [vmem:[#allocation6 + $0x88] sm:$0xff] }
 0x38f   :  { %v795_v2 = vpop.permute.xlu1 %794  ;;  %v1019_v3 = vpop.xlane.xlu0 %1018 }
 0x390   :  { %v1129_v4 = vsel %vm1035_vm2, %v795_v2, 0  ;;  %8799 = vrcp.f32 %v1019_v3  ;;  %v282_v2 = vld [vmem:[#allocation6 + $0x3c8] sm:$0xff] }
 0x391   :  { %8277 = vmatpush3.bf16.msra.mxu0 %v1129_v4  ;;  %v7345_v3 = vcombine.low %v274_v61, %v282_v2  ;;  %v7346_v4 = vcombine.high %v274_v61, %v282_v2  ;;  %v186_v61 = vld [vmem:[#allocation6 + $0xc8] sm:$0xff] }
 0x392   :  { %8288 = vmatprep.subr.bf16.mxu0 %v8952_v1  ;;  %v7250_v2 = vcombine.high %v178_v59, %v186_v61 }
 0x393   :  { %v797_v5 = vpop.permute.xlu0 %796 }
 0x394   :  { %v1175_v6 = vsel %vm1035_vm2, %v797_v5, 0 }
 0x395   :  { %8283 = vmatpush3.bf16.msra.mxu1 %v1175_v6 }
 0x396   :  { %2069 = vmatprep.subr.bf16.mxu1 %v7344_v62  ;;  %v7249_v62 = vcombine.low %v178_v59, %v186_v61 }
 0x399   :  { %v8798_v7 = vpop.eup %8797 }
 0x39a   :  { %v1026_v8 = vmul.f32 %v8798_v7, %v8790_v50 }
 0x39c   :  { %v1030_v9 = vpack.c.bf16 %v1026_v8, %v1026_v8 }
 0x39d   :  { %v8800_v10 = vpop.eup %8799 }
 0x39e   :  { %8279 = vmatmul.mubr.msk.bf16.vlgmr.msra.gmra.mxu0 %vm983_vm3, %v1030_v9  ;;  %v1027_v11 = vmul.f32 %v8800_v10, %v8792_v52 }
 0x39f   :  { %8304 = vmatprep.mubr.msk.bf16.mxu0 %vm8953_vm0, %v8952_v1  ;;  %8289 = vmatpush3.bf16.msra.mxu0 %v8473_v13  ;;  %v258_v13 = vld [vmem:[#allocation6 + $0x308] sm:$0xff] }
 0x3a0   :  { %v1031_v12 = vpack.c.bf16 %v1027_v11, %v1027_v11  ;;  %8290 = vmatprep.subr.bf16.mxu0 %v8952_v1  ;;  %v257_v11 = vld [vmem:[#allocation6 + $0x300] sm:$0xff] }
 0x3a2   :  { %8285 = vmatmul.mubr.msk.bf16.vlgmr.msra.gmra.mxu1 %vm983_vm3, %v1031_v12  ;;  %v265_v12 = vld [vmem:[#allocation6 + $0x340] sm:$0xff] }
 0x3a3   :  { %2101 = vmatprep.mubr.bf16.mxu1 %v8951_v0  ;;  %8291 = vmatpush3.bf16.msra.mxu0 %v8474_v14  ;;  %v7328_v14 = vcombine.high %v257_v11, %v265_v12 }
 0x3a4   :  { %8292 = vmatprep.subr.bf16.mxu0 %v8952_v1  ;;  %2070 = vmatpush1.bf16.msra.mxu1 %v7343_v63 }
 0x3a5   :  { %2071 = vmatprep.subr.bf16.mxu1 %v7328_v14 }
 0x3a7   :  { %8293 = vmatpush3.bf16.msra.mxu0 %v8475_v17 }
 0x3a8   :  { %8294 = vmatprep.subr.bf16.mxu0 %v8952_v1 }
 0x3ab   :  { %8295 = vmatpush3.bf16.msra.mxu0 %v8476_v22 }
 0x3ac   :  { %8296 = vmatprep.subr.bf16.mxu0 %v8952_v1 }
 0x3af   :  { %8297 = vmatpush3.bf16.msra.mxu0 %v8477_v25 }
 0x3b0   :  { %8298 = vmatprep.subr.bf16.mxu0 %v8952_v1 }
 0x3b3   :  { %8299 = vmatpush3.bf16.msra.mxu0 %v8478_v28 }
 0x3b4   :  { %8300 = vmatprep.subr.bf16.mxu0 %v8952_v1 }
 0x3b7   :  { %8301 = vmatpush3.bf16.msra.mxu0 %v8479_v29  ;;  %v225_v29 = vld [vmem:[#allocation6 + $0x200] sm:$0xff] }
 0x3b8   :  { %8302 = vmatprep.subr.bf16.mxu0 %v8952_v1 }
 0x3bb   :  { %8303 = vmatpush3.bf16.msra.mxu0 %v8480_v30  ;;  %v233_v30 = vld [vmem:[#allocation6 + $0x240] sm:$0xff] }
 0x3bc   :  { %2112 = vmatprep.subr.bf16.mxu0 %v7346_v4  ;;  %v169_v4 = vld [vmem:[#allocation6 + $0x40] sm:$0xff] }
 0x3eb   :  { %v1073_v15 = vpop.f32.mrf.mxu0 }
 0x3ed   :  { %v8268_v16 = vpop.f32.mrf.mxu0 }
 0x3ee   :  { %v7327_v16 = vcombine.low %v257_v11, %v265_v12  ;;  %v275_v11 = vld [vmem:[#allocation6 + $0x390] sm:$0xff] }
 0x3ef   :  { %v1076_v18 = vpop.f32.mrf.mxu0  ;;  %v1119_v19 = vpop.f32.mrf.mxu1  ;;  %v283_v12 = vld [vmem:[#allocation6 + $0x3d0] sm:$0xff] }
 0x3f0   :  { %2072 = vmatpush1.bf16.msra.mxu1 %v7327_v16  ;;  %v7348_v14 = vcombine.high %v275_v11, %v283_v12  ;;  %v7347_v16 = vcombine.low %v275_v11, %v283_v12  ;;  %v204_v11 = vld [vmem:[#allocation6 + $0x158] sm:$0xff] }
 0x3f1   :  { %v8269_v20 = vpop.f32.mrf.mxu0  ;;  %v8274_v21 = vpop.f32.mrf.mxu1 }
 0x3f2   :  { %v249_v20 = vld [vmem:[#allocation6 + $0x2c0] sm:$0xff]  ;;  %v242_v21 = vld [vmem:[#allocation6 + $0x288] sm:$0xff] }
 0x3f3   :  { %v1122_v23 = vpop.f32.mrf.mxu1 }
 0x3f4   :  { %v250_v23 = vld [vmem:[#allocation6 + $0x2c8] sm:$0xff] }
 0x3f5   :  { %v8275_v24 = vpop.f32.mrf.mxu1  ;;  %v7313_v25 = vcombine.low %v242_v21, %v250_v23  ;;  %v7314_v28 = vcombine.high %v242_v21, %v250_v23 }
 0x45e   :  { %v1165_v31 = vpop.f32.mrf.mxu0 }
 0x460   :  { %v8280_v32 = vpop.f32.mrf.mxu0 }
 0x461   :  { %v7296_v32 = vcombine.high %v225_v29, %v233_v30 }
 0x462   :  { %v1168_v35 = vpop.f32.mrf.mxu0  ;;  %v1211_v37 = vpop.f32.mrf.mxu1 }
 0x463   :  { %v8431_v38 = vpack.i.bf16 %v1211_v37, %v1165_v31  ;;  %v226_v31 = vld [vmem:[#allocation6 + $0x208] sm:$0xff]  ;;  %v7295_v37 = vcombine.low %v225_v29, %v233_v30  ;;  %v109_v29 = vld [vmem:[#allocation9 + $0x84] ss:$0 sm:$0xff] }
 0x464   :  { %v8281_v39 = vpop.f32.mrf.mxu0  ;;  %v8286_v40 = vpop.f32.mrf.mxu1  ;;  %v234_v35 = vld [vmem:[#allocation6 + $0x248] sm:$0xff] }
 0x465   :  { %8432 = vrot.lane.b32.xlu1 %v8431_v38, %s8940_s24  ;;  %v7297_v38 = vcombine.low %v226_v31, %v234_v35  ;;  %v7298_v39 = vcombine.high %v226_v31, %v234_v35  ;;  %v209_v40 = vld [vmem:[#allocation6 + $0x180] sm:$0xff] }
 0x466   :  { %v1214_v41 = vpop.f32.mrf.mxu1  ;;  %v110_v35 = vld [vmem:[#allocation9 + $0x85] ss:$0 sm:$0xff] }
 0x467   :  { %v217_v41 = vld [vmem:[#allocation6 + $0x1c0] sm:$0xff] }
 0x468   :  { %v8287_v42 = vpop.f32.mrf.mxu1 }
 0x469   :  { %v210_v42 = vld [vmem:[#allocation6 + $0x188] sm:$0xff] }
 0x4d7   :  { %v8433_v43 = vpop.permute.xlu1 %8432 }
 0x4d8   :  { %v8435_v44 = vunpack.i.h.bf16 %v8433_v43  ;;  %v8434_v45 = vunpack.i.l.bf16 %v8433_v43  ;;  %v7280_v43 = vcombine.high %v209_v40, %v217_v41 }
 0x4da   :  { %v1226_v46 = vsel %vm798_vm1, %v1119_v19, %v8435_v44  ;;  %v1225_v47 = vsel %vm798_vm1, %v1073_v15, %v8434_v45  ;;  %v266_v15 = vld [vmem:[#allocation6 + $0x348] sm:$0xff]  ;;  %v241_v19 = vld [vmem:[#allocation6 + $0x280] sm:$0xff]  ;;  %v7279_v45 = vcombine.low %v209_v40, %v217_v41  ;;  %v260_v40 = vld [vmem:[#allocation6 + $0x318] sm:$0xff] }
 0x4db   :  { %v1227_v48 = vpack.c.bf16 %v1226_v46, %v1225_v47  ;;  %v7329_v17 = vcombine.low %v258_v13, %v266_v15  ;;  %v7330_v18 = vcombine.high %v258_v13, %v266_v15  ;;  %v7312_v22 = vcombine.high %v241_v19, %v249_v20  ;;  %v218_v44 = vld [vmem:[#allocation6 + $0x1c8] sm:$0xff]  ;;  %v276_v13 = vld [vmem:[#allocation6 + $0x398] sm:$0xff] }
 0x4dc   :  { %v7311_v24 = vcombine.low %v241_v19, %v249_v20  ;;  %v7281_v46 = vcombine.low %v210_v42, %v218_v44  ;;  %v7282_v47 = vcombine.high %v210_v42, %v218_v44  ;;  %v284_v15 = vld [vmem:[#allocation6 + $0x3d8] sm:$0xff] }
 0x4dd   :  { %8305 = vmatmul.mubr.bf16.vlgmr.msra.gmra.mxu0 %v1227_v48  ;;  %2073 = vmatprep.subr.bf16.mxu1 %v7312_v22  ;;  %v193_v48 = vld [vmem:[#allocation6 + $0x100] sm:$0xff]  ;;  %v268_v41 = vld [vmem:[#allocation6 + $0x358] sm:$0xff] }
 0x4de   :  { %2144 = vmatprep.mubr.bf16.mxu0 %v8951_v0  ;;  %2113 = vmatpush1.bf16.msra.mxu0 %v7345_v3  ;;  %v161_v3 = vld [vmem:[#allocation6] sm:$0xff] }
 0x4df   :  { %2114 = vmatprep.subr.bf16.mxu0 %v7330_v18  ;;  %2074 = vmatpush1.bf16.msra.mxu1 %v7311_v24  ;;  %v7350_v18 = vcombine.high %v276_v13, %v284_v15 }
 0x4e0   :  { %2075 = vmatprep.subr.bf16.mxu1 %v7296_v32 }
 0x4e2   :  { %2115 = vmatpush1.bf16.msra.mxu0 %v7329_v17  ;;  %v7349_v17 = vcombine.low %v276_v13, %v284_v15 }
 0x4e3   :  { %2116 = vmatprep.subr.bf16.mxu0 %v7314_v28  ;;  %2076 = vmatpush1.bf16.msra.mxu1 %v7295_v37 }
 0x4e4   :  { %2077 = vmatprep.subr.bf16.mxu1 %v7280_v43 }
 0x4e6   :  { %2117 = vmatpush1.bf16.msra.mxu0 %v7313_v25 }
 0x4e7   :  { %2118 = vmatprep.subr.bf16.mxu0 %v7298_v39  ;;  %2078 = vmatpush1.bf16.msra.mxu1 %v7279_v45  ;;  %v267_v39 = vld [vmem:[#allocation6 + $0x350] sm:$0xff]  ;;  %v7334_v45 = vcombine.high %v260_v40, %v268_v41 }
 0x4ea   :  { %2119 = vmatpush1.bf16.msra.mxu0 %v7297_v38  ;;  %v259_v38 = vld [vmem:[#allocation6 + $0x310] sm:$0xff] }
 0x4eb   :  { %2120 = vmatprep.subr.bf16.mxu0 %v7282_v47  ;;  %v251_v47 = vld [vmem:[#allocation6 + $0x2d0] sm:$0xff] }
 0x4ee   :  { %2121 = vmatpush1.bf16.msra.mxu0 %v7281_v46  ;;  %v243_v46 = vld [vmem:[#allocation6 + $0x290] sm:$0xff] }
 0x59d   :  { %v1310_v50 = vpop.f32.mrf.mxu0 }
 0x59e   :  { %v1311_v51 = vadd.f32 %v1310_v50, %v99_v49  ;;  %v194_v50 = vld [vmem:[#allocation6 + $0x108] sm:$0xff] }
 0x59f   :  { %v8306_v52 = vpop.f32.mrf.mxu0 }
 0x5a0   :  { %v1317_v53 = vadd.f32 %v1311_v51, %v9020_v26  ;;  %v202_v52 = vld [vmem:[#allocation6 + $0x148] sm:$0xff] }
 0x5a1   :  { %v1313_v54 = vpop.f32.mrf.mxu0 }
 0x5a2   :  { %v1314_v55 = vadd.f32 %v1313_v54, %v99_v49  ;;  %1319 = vadd.xlane.f32.xlu1 %v1317_v53  ;;  %v201_v49 = vld [vmem:[#allocation6 + $0x140] sm:$0xff]  ;;  %v7265_v54 = vcombine.low %v194_v50, %v202_v52 }
 0x5a3   :  { %v8307_v56 = vpop.f32.mrf.mxu0  ;;  %v7264_v51 = vcombine.high %v193_v48, %v201_v49 }
 0x5a4   :  { %v1318_v58 = vadd.f32 %v1314_v55, %v9022_v27  ;;  %v7266_v55 = vcombine.high %v194_v50, %v202_v52  ;;  %v177_v56 = vld [vmem:[#allocation6 + $0x80] sm:$0xff]  ;;  %v7333_v50 = vcombine.low %v260_v40, %v268_v41  ;;  %v286_v40 = vld [vmem:[#allocation6 + $0x3e8] sm:$0xff] }
 0x5a5   :  { %2079 = vmatprep.subr.bf16.mxu1 %v7264_v51  ;;  %v7316_v51 = vcombine.high %v243_v46, %v251_v47 }
 0x5a6   :  { %1321 = vadd.xlane.f32.xlu0 %v1318_v58  ;;  %2122 = vmatprep.subr.bf16.mxu0 %v7266_v55  ;;  %v228_v55 = vld [vmem:[#allocation6 + $0x218] sm:$0xff] }
 0x5a7   :  { %2123 = vmatpush1.bf16.msra.mxu0 %v7265_v54  ;;  %v235_v54 = vld [vmem:[#allocation6 + $0x250] sm:$0xff] }
 0x5a8   :  { %2124 = vmatprep.subr.bf16.mxu0 %v7250_v2  ;;  %v212_v2 = vld [vmem:[#allocation6 + $0x198] sm:$0xff] }
 0x5ab   :  { %2125 = vmatpush1.bf16.msra.mxu0 %v7249_v62  ;;  %v219_v62 = vld [vmem:[#allocation6 + $0x1d0] sm:$0xff] }
 0x62b   :  { %v1320_v26 = vpop.xlane.xlu1 %1319 }
 0x62c   :  { %v1324_v5 = vmul.f32 0.0078125, %v1320_v26  ;;  %v162_v26 = vld [vmem:[#allocation6 + $0x8] sm:$0xff] }
 0x62e   :  { %v9125_v6 = vsub.f32 %v1317_v53, %v1324_v5  ;;  %v7263_v53 = vcombine.low %v193_v48, %v201_v49  ;;  %v7232_v5 = vcombine.high %v161_v3, %v169_v4  ;;  %v244_v48 = vld [vmem:[#allocation6 + $0x298] sm:$0xff]  ;;  %v7331_v49 = vcombine.low %v259_v38, %v267_v39 }
 0x62f   :  { %v1322_v7 = vpop.xlane.xlu0 %1321 }
 0x630   :  { %v1325_v8 = vmul.f32 0.0078125, %v1322_v7  ;;  %v1328_v27 = vmul.f32 %v9125_v6, %v9125_v6  ;;  %2080 = vmatpush1.bf16.msra.mxu1 %v7263_v53  ;;  %v170_v7 = vld [vmem:[#allocation6 + $0x48] sm:$0xff]  ;;  %v227_v53 = vld [vmem:[#allocation6 + $0x210] sm:$0xff] }
 0x632   :  { %v9129_v9 = vsub.f32 %v1318_v58, %v1325_v8  ;;  %1330 = vadd.xlane.f32.xlu0 %v1328_v27  ;;  %v185_v58 = vld [vmem:[#allocation6 + $0xc0] sm:$0xff]  ;;  %v7231_v8 = vcombine.low %v161_v3, %v169_v4  ;;  %v7233_v27 = vcombine.low %v162_v26, %v170_v7  ;;  %v220_v3 = vld [vmem:[#allocation6 + $0x1d8] sm:$0xff]  ;;  %v7299_v4 = vcombine.low %v227_v53, %v235_v54 }
 0x633   :  { %v7248_v60 = vcombine.high %v177_v56, %v185_v58  ;;  %v7247_v63 = vcombine.low %v177_v56, %v185_v58  ;;  %v236_v56 = vld [vmem:[#allocation6 + $0x258] sm:$0xff]  ;;  %v7315_v58 = vcombine.low %v243_v46, %v251_v47  ;;  %v7285_v13 = vcombine.low %v212_v2, %v220_v3  ;;  %v261_v47 = vld [vmem:[#allocation6 + $0x320] sm:$0xff] }
 0x634   :  { %v1329_v10 = vmul.f32 %v9129_v9, %v9129_v9  ;;  %v7302_v61 = vcombine.high %v228_v55, %v236_v56 }
 0x635   :  { %2081 = vmatprep.subr.bf16.mxu1 %v7248_v60  ;;  %v7300_v60 = vcombine.high %v227_v53, %v235_v54  ;;  %v245_v54 = vld [vmem:[#allocation6 + $0x2a0] sm:$0xff] }
 0x636   :  { %1332 = vadd.xlane.f32.xlu1 %v1329_v10  ;;  %2082 = vmatpush1.bf16.msra.mxu1 %v7247_v63  ;;  %v7234_v10 = vcombine.high %v162_v26, %v170_v7  ;;  %v211_v63 = vld [vmem:[#allocation6 + $0x190] sm:$0xff]  ;;  %v7301_v26 = vcombine.low %v228_v55, %v236_v56  ;;  %v7286_v7 = vcombine.high %v212_v2, %v220_v3  ;;  %v253_v55 = vld [vmem:[#allocation6 + $0x2e0] sm:$0xff]  ;;  %v246_v56 = vld [vmem:[#allocation6 + $0x2a8] sm:$0xff] }
 0x637   :  { %2083 = vmatprep.subr.bf16.mxu1 %v7232_v5  ;;  %v7284_v5 = vcombine.high %v211_v63, %v219_v62  ;;  %v7283_v12 = vcombine.low %v211_v63, %v219_v62  ;;  %v229_v62 = vld [vmem:[#allocation6 + $0x220] sm:$0xff]  ;;  %v230_v3 = vld [vmem:[#allocation6 + $0x228] sm:$0xff] }
 0x638   :  { %2126 = vmatprep.subr.bf16.mxu0 %v7234_v10  ;;  %v196_v10 = vld [vmem:[#allocation6 + $0x118] sm:$0xff]  ;;  %v237_v2 = vld [vmem:[#allocation6 + $0x260] sm:$0xff] }
 0x639   :  { %2127 = vmatpush1.bf16.msra.mxu0 %v7233_v27  ;;  %v203_v27 = vld [vmem:[#allocation6 + $0x150] sm:$0xff]  ;;  %v7270_v15 = vcombine.high %v196_v10, %v204_v11 }
 0x63a   :  { %2084 = vmatpush1.bf16.msra.mxu1 %v7231_v8  ;;  %2198 = vmatprep.subr.bf16.mxu0 %v7350_v18  ;;  %v195_v8 = vld [vmem:[#allocation6 + $0x110] sm:$0xff]  ;;  %v180_v18 = vld [vmem:[#allocation6 + $0x98] sm:$0xff] }
 0x63b   :  { %2155 = vmatprep.subr.bf16.mxu1 %v7348_v14  ;;  %v7268_v14 = vcombine.high %v195_v8, %v203_v27 }
 0x6bb   :  { %v1331_v19 = vpop.xlane.xlu0 %1330 }
 0x6bc   :  { %v1334_v20 = vmul.f32 0.0078125, %v1331_v19  ;;  %v188_v19 = vld [vmem:[#allocation6 + $0xd8] sm:$0xff] }
 0x6be   :  { %v1336_v21 = vadd.f32 1e-05, %v1334_v20  ;;  %v7267_v20 = vcombine.low %v195_v8, %v203_v27  ;;  %v213_v27 = vld [vmem:[#allocation6 + $0x1a0] sm:$0xff] }
 0x6bf   :  { %v1333_v22 = vpop.xlane.xlu1 %1332 }
 0x6c0   :  { %8801 = vrsqrt.f32 %v1336_v21  ;;  %v1335_v23 = vmul.f32 0.0078125, %v1333_v22  ;;  %v7269_v21 = vcombine.low %v196_v10, %v204_v11  ;;  %v221_v10 = vld [vmem:[#allocation6 + $0x1e0] sm:$0xff]  ;;  %v214_v11 = vld [vmem:[#allocation6 + $0x1a8] sm:$0xff] }
 0x6c2   :  { %v1337_v24 = vadd.f32 1e-05, %v1335_v23  ;;  %v7254_v23 = vcombine.high %v180_v18, %v188_v19 }
 0x6c4   :  { %8803 = vrsqrt.f32 %v1337_v24  ;;  %v163_v24 = vld [vmem:[#allocation6 + $0x10] sm:$0xff] }
 0x6cd   :  { %v8802_v25 = vpop.eup %8801 }
 0x6ce   :  { %v1340_v28 = vmul.f32 %v8802_v25, %v9125_v6  ;;  %v7332_v6 = vcombine.high %v259_v38, %v267_v39  ;;  %v171_v25 = vld [vmem:[#allocation6 + $0x50] sm:$0xff]  ;;  %v285_v38 = vld [vmem:[#allocation6 + $0x3e0] sm:$0xff]  ;;  %v278_v39 = vld [vmem:[#allocation6 + $0x3a8] sm:$0xff] }
 0x6cf   :  { %v7235_v41 = vcombine.low %v163_v24, %v171_v25  ;;  %v7354_v46 = vcombine.high %v278_v39, %v286_v40 }
 0x6d0   :  { %v1342_v31 = vmul.f32 %v1340_v28, %v109_v29  ;;  %v164_v28 = vld [vmem:[#allocation6 + $0x18] sm:$0xff] }
 0x6d1   :  { %v8804_v30 = vpop.eup %8803 }
 0x6d2   :  { %v1341_v32 = vmul.f32 %v8804_v30, %v9129_v9  ;;  %v9135_v42 = vadd.f32 %v1342_v31, %v110_v35  ;;  %v252_v9 = vld [vmem:[#allocation6 + $0x2d8] sm:$0xff]  ;;  %v7253_v31 = vcombine.low %v180_v18, %v188_v19  ;;  %v205_v18 = vld [vmem:[#allocation6 + $0x160] sm:$0xff]  ;;  %v198_v19 = vld [vmem:[#allocation6 + $0x128] sm:$0xff] }
 0x6d3   :  { %v7318_v52 = vcombine.high %v244_v48, %v252_v9  ;;  %v7317_v59 = vcombine.low %v244_v48, %v252_v9  ;;  %v269_v48 = vld [vmem:[#allocation6 + $0x360] sm:$0xff]  ;;  %v262_v9 = vld [vmem:[#allocation6 + $0x328] sm:$0xff] }
 0x6d4   :  { %v1343_v37 = vmul.f32 %v1341_v32, %v109_v29  ;;  %v172_v29 = vld [vmem:[#allocation6 + $0x58] sm:$0xff]  ;;  %v7236_v32 = vcombine.high %v163_v24, %v171_v25  ;;  %v181_v25 = vld [vmem:[#allocation6 + $0xa0] sm:$0xff] }
 0x6d6   :  { %v9137_v43 = vadd.f32 %v1343_v37, %v110_v35  ;;  %v7238_v35 = vcombine.high %v164_v28, %v172_v29  ;;  %v277_v37 = vld [vmem:[#allocation6 + $0x3a0] sm:$0xff] }
 0x6d8   :  { %v9141_v44 = vpack.c.bf16 %v9137_v43, %v9135_v42 }
 0x6da   :  { %2102 = vmatmul.mubr.bf16.vlgmr.msra.gmra.mxu1 %v9141_v44  ;;  %2145 = vmatmul.mubr.bf16.vlgmr.msra.gmra.mxu0 %v9141_v44 }
 0x6db   :  { %2156 = vmatpush1.bf16.msra.mxu1 %v7347_v16  ;;  %2199 = vmatpush1.bf16.msra.mxu0 %v7349_v17  ;;  %v179_v16 = vld [vmem:[#allocation6 + $0x90] sm:$0xff] }
 0x6dc   :  { %2157 = vmatprep.subr.bf16.mxu1 %v7332_v6  ;;  %2200 = vmatprep.subr.bf16.mxu0 %v7334_v45  ;;  %v187_v17 = vld [vmem:[#allocation6 + $0xd0] sm:$0xff]  ;;  %v7237_v6 = vcombine.low %v164_v28, %v172_v29  ;;  %v7352_v45 = vcombine.high %v277_v37, %v285_v38  ;;  %v189_v28 = vld [vmem:[#allocation6 + $0xe0] sm:$0xff]  ;;  %v182_v29 = vld [vmem:[#allocation6 + $0xa8] sm:$0xff] }
 0x6dd   :  { %2187 = vmatprep.mubr.bf16.mxu1 %v8951_v0  ;;  %2230 = vmatprep.mubr.bf16.mxu0 %v8951_v0  ;;  %v7252_v22 = vcombine.high %v179_v16, %v187_v17  ;;  %v7251_v30 = vcombine.low %v179_v16, %v187_v17  ;;  %v197_v17 = vld [vmem:[#allocation6 + $0x120] sm:$0xff] }
 0x6df   :  { %2158 = vmatpush1.bf16.msra.mxu1 %v7331_v49  ;;  %2201 = vmatpush1.bf16.msra.mxu0 %v7333_v50  ;;  %v270_v49 = vld [vmem:[#allocation6 + $0x368] sm:$0xff]  ;;  %v7351_v50 = vcombine.low %v277_v37, %v285_v38  ;;  %v165_v38 = vld [vmem:[#allocation6 + $0x20] sm:$0xff] }
 0x6e0   :  { %2159 = vmatprep.subr.bf16.mxu1 %v7316_v51  ;;  %2202 = vmatprep.subr.bf16.mxu0 %v7318_v52  ;;  %v7353_v51 = vcombine.low %v278_v39, %v286_v40  ;;  %v7336_v52 = vcombine.high %v261_v47, %v269_v48  ;;  %v7338_v53 = vcombine.high %v262_v9, %v270_v49  ;;  %v173_v39 = vld [vmem:[#allocation6 + $0x60] sm:$0xff]  ;;  %v166_v40 = vld [vmem:[#allocation6 + $0x28] sm:$0xff] }
 0x6e3   :  { %2160 = vmatpush1.bf16.msra.mxu1 %v7315_v58  ;;  %2203 = vmatpush1.bf16.msra.mxu0 %v7317_v59  ;;  %v254_v58 = vld [vmem:[#allocation6 + $0x2e8] sm:$0xff]  ;;  %v7335_v59 = vcombine.low %v261_v47, %v269_v48  ;;  %v279_v48 = vld [vmem:[#allocation6 + $0x3b0] sm:$0xff] }
 0x6e4   :  { %2161 = vmatprep.subr.bf16.mxu1 %v7300_v60  ;;  %2204 = vmatprep.subr.bf16.mxu0 %v7302_v61  ;;  %v7337_v60 = vcombine.low %v262_v9, %v270_v49  ;;  %v7320_v61 = vcombine.high %v245_v54, %v253_v55  ;;  %v7322_v63 = vcombine.high %v246_v56, %v254_v58  ;;  %v287_v9 = vld [vmem:[#allocation6 + $0x3f0] sm:$0xff]  ;;  %v280_v49 = vld [vmem:[#allocation6 + $0x3b8] sm:$0xff] }
 0x6e7   :  { %2162 = vmatpush1.bf16.msra.mxu1 %v7299_v4  ;;  %2205 = vmatpush1.bf16.msra.mxu0 %v7301_v26  ;;  %v238_v4 = vld [vmem:[#allocation6 + $0x268] sm:$0xff]  ;;  %v7319_v26 = vcombine.low %v245_v54, %v253_v55  ;;  %v263_v55 = vld [vmem:[#allocation6 + $0x330] sm:$0xff] }
 0x6e8   :  { %2163 = vmatprep.subr.bf16.mxu1 %v7284_v5  ;;  %2206 = vmatprep.subr.bf16.mxu0 %v7286_v7  ;;  %v7321_v5 = vcombine.low %v246_v56, %v254_v58  ;;  %v7304_v7 = vcombine.high %v229_v62, %v237_v2  ;;  %v7306_v8 = vcombine.high %v230_v3, %v238_v4  ;;  %v271_v56 = vld [vmem:[#allocation6 + $0x370] sm:$0xff]  ;;  %v264_v58 = vld [vmem:[#allocation6 + $0x338] sm:$0xff] }
 0x6eb   :  { %2164 = vmatpush1.bf16.msra.mxu1 %v7283_v12  ;;  %2207 = vmatpush1.bf16.msra.mxu0 %v7285_v13  ;;  %v222_v12 = vld [vmem:[#allocation6 + $0x1e8] sm:$0xff]  ;;  %v7303_v13 = vcombine.low %v229_v62, %v237_v2  ;;  %v247_v2 = vld [vmem:[#allocation6 + $0x2b0] sm:$0xff] }
 0x6ec   :  { %2165 = vmatprep.subr.bf16.mxu1 %v7268_v14  ;;  %2208 = vmatprep.subr.bf16.mxu0 %v7270_v15  ;;  %v7305_v14 = vcombine.low %v230_v3, %v238_v4  ;;  %v7288_v15 = vcombine.high %v213_v27, %v221_v10  ;;  %v7290_v16 = vcombine.high %v214_v11, %v222_v12  ;;  %v255_v3 = vld [vmem:[#allocation6 + $0x2f0] sm:$0xff]  ;;  %v248_v4 = vld [vmem:[#allocation6 + $0x2b8] sm:$0xff] }
 0x6ef   :  { %2166 = vmatpush1.bf16.msra.mxu1 %v7267_v20  ;;  %2209 = vmatpush1.bf16.msra.mxu0 %v7269_v21  ;;  %v206_v20 = vld [vmem:[#allocation6 + $0x168] sm:$0xff]  ;;  %v7287_v21 = vcombine.low %v213_v27, %v221_v10  ;;  %v231_v10 = vld [vmem:[#allocation6 + $0x230] sm:$0xff] }
 0x6f0   :  { %2167 = vmatprep.subr.bf16.mxu1 %v7252_v22  ;;  %2210 = vmatprep.subr.bf16.mxu0 %v7254_v23  ;;  %v7289_v22 = vcombine.low %v214_v11, %v222_v12  ;;  %v7272_v23 = vcombine.high %v197_v17, %v205_v18  ;;  %v7274_v24 = vcombine.high %v198_v19, %v206_v20  ;;  %v239_v11 = vld [vmem:[#allocation6 + $0x270] sm:$0xff]  ;;  %v232_v12 = vld [vmem:[#allocation6 + $0x238] sm:$0xff] }
 0x6f3   :  { %2168 = vmatpush1.bf16.msra.mxu1 %v7251_v30  ;;  %2211 = vmatpush1.bf16.msra.mxu0 %v7253_v31  ;;  %v190_v30 = vld [vmem:[#allocation6 + $0xe8] sm:$0xff]  ;;  %v7271_v31 = vcombine.low %v197_v17, %v205_v18  ;;  %v215_v18 = vld [vmem:[#allocation6 + $0x1b0] sm:$0xff] }
 0x6f4   :  { %2169 = vmatprep.subr.bf16.mxu1 %v7236_v32  ;;  %2212 = vmatprep.subr.bf16.mxu0 %v7238_v35  ;;  %v7273_v32 = vcombine.low %v198_v19, %v206_v20  ;;  %v7256_v35 = vcombine.high %v181_v25, %v189_v28  ;;  %v7258_v37 = vcombine.high %v182_v29, %v190_v30  ;;  %v223_v19 = vld [vmem:[#allocation6 + $0x1f0] sm:$0xff]  ;;  %v216_v20 = vld [vmem:[#allocation6 + $0x1b8] sm:$0xff] }
 0x6f7   :  { %2170 = vmatpush1.bf16.msra.mxu1 %v7235_v41  ;;  %2213 = vmatpush1.bf16.msra.mxu0 %v7237_v6  ;;  %v174_v41 = vld [vmem:[#allocation6 + $0x68] sm:$0xff]  ;;  %v7255_v6 = vcombine.low %v181_v25, %v189_v28  ;;  %v199_v28 = vld [vmem:[#allocation6 + $0x130] sm:$0xff] }
 0x6f8   :  { %2241 = vmatprep.subr.bf16.mxu1 %v7352_v45  ;;  %2284 = vmatprep.subr.bf16.mxu0 %v7354_v46  ;;  %v7257_v45 = vcombine.low %v182_v29, %v190_v30  ;;  %v7240_v46 = vcombine.high %v165_v38, %v173_v39  ;;  %v7242_v47 = vcombine.high %v166_v40, %v174_v41  ;;  %v207_v29 = vld [vmem:[#allocation6 + $0x170] sm:$0xff]  ;;  %v200_v30 = vld [vmem:[#allocation6 + $0x138] sm:$0xff] }
 0x6fa   :  { %2188 = vmatmul.mubr.bf16.vlgmr.msra.gmra.mxu1 %v9141_v44  ;;  %2231 = vmatmul.mubr.bf16.vlgmr.msra.gmra.mxu0 %v9141_v44 }
 0x6fb   :  { %2242 = vmatpush1.bf16.msra.mxu1 %v7351_v50  ;;  %2285 = vmatpush1.bf16.msra.mxu0 %v7353_v51  ;;  %v288_v50 = vld [vmem:[#allocation6 + $0x3f8] sm:$0xff]  ;;  %v7239_v51 = vcombine.low %v165_v38, %v173_v39  ;;  %v183_v39 = vld [vmem:[#allocation6 + $0xb0] sm:$0xff] }
 0x6fc   :  { %2243 = vmatprep.subr.bf16.mxu1 %v7336_v52  ;;  %2286 = vmatprep.subr.bf16.mxu0 %v7338_v53  ;;  %v7241_v52 = vcombine.low %v166_v40, %v174_v41  ;;  %v7356_v53 = vcombine.high %v279_v48, %v287_v9  ;;  %v7358_v54 = vcombine.high %v280_v49, %v288_v50  ;;  %v191_v40 = vld [vmem:[#allocation6 + $0xf0] sm:$0xff]  ;;  %v184_v41 = vld [vmem:[#allocation6 + $0xb8] sm:$0xff] }
 0x6fd   :  { %2273 = vmatprep.mubr.bf16.mxu1 %v8951_v0  ;;  %2316 = vmatprep.mubr.bf16.mxu0 %v8951_v0 }
 0x6ff   :  { %2244 = vmatpush1.bf16.msra.mxu1 %v7335_v59  ;;  %2287 = vmatpush1.bf16.msra.mxu0 %v7337_v60  ;;  %v272_v59 = vld [vmem:[#allocation6 + $0x378] sm:$0xff]  ;;  %v7355_v60 = vcombine.low %v279_v48, %v287_v9  ;;  %v167_v9 = vld [vmem:[#allocation6 + $0x30] sm:$0xff] }
 0x700   :  { %2245 = vmatprep.subr.bf16.mxu1 %v7320_v61  ;;  %2288 = vmatprep.subr.bf16.mxu0 %v7322_v63  ;;  %v7357_v61 = vcombine.low %v280_v49, %v288_v50  ;;  %v7340_v63 = vcombine.high %v263_v55, %v271_v56  ;;  %v7342_v62 = vcombine.high %v264_v58, %v272_v59  ;;  %v175_v49 = vld [vmem:[#allocation6 + $0x70] sm:$0xff]  ;;  %v168_v50 = vld [vmem:[#allocation6 + $0x38] sm:$0xff] }
 0x703   :  { %2246 = vmatpush1.bf16.msra.mxu1 %v7319_v26  ;;  %2289 = vmatpush1.bf16.msra.mxu0 %v7321_v5  ;;  %v256_v26 = vld [vmem:[#allocation6 + $0x2f8] sm:$0xff]  ;;  %v7339_v5 = vcombine.low %v263_v55, %v271_v56  ;;  %v7243_v56 = vcombine.low %v167_v9, %v175_v49 }
 0x704   :  { %2247 = vmatprep.subr.bf16.mxu1 %v7304_v7  ;;  %2290 = vmatprep.subr.bf16.mxu0 %v7306_v8  ;;  %v7341_v7 = vcombine.low %v264_v58, %v272_v59  ;;  %v7324_v8 = vcombine.high %v247_v2, %v255_v3  ;;  %v7326_v27 = vcombine.high %v248_v4, %v256_v26  ;;  %v8481_v59 = vld [vmem:[#allocation7 + $0x78] sm:$0xff]  }
 0x707   :  { %2248 = vmatpush1.bf16.msra.mxu1 %v7303_v13  ;;  %2291 = vmatpush1.bf16.msra.mxu0 %v7305_v14  ;;  %v240_v13 = vld [vmem:[#allocation6 + $0x278] sm:$0xff]  ;;  %v7323_v14 = vcombine.low %v247_v2, %v255_v3  ;;  %v8486_v2 = vld [vmem:[#allocation7 + $0xf0] sm:$0xff]  }
 0x708   :  { %2249 = vmatprep.subr.bf16.mxu1 %v7288_v15  ;;  %2292 = vmatprep.subr.bf16.mxu0 %v7290_v16  ;;  %v7325_v15 = vcombine.low %v248_v4, %v256_v26  ;;  %v7308_v16 = vcombine.high %v231_v10, %v239_v11  ;;  %v7310_v17 = vcombine.high %v232_v12, %v240_v13  ;;  %v8487_v3 = vld [vmem:[#allocation7 + $0x30] sm:$0xff]   ;;  %v8489_v26 = vld [vmem:[#allocation7 + $0x68] sm:$0xff]  }
 0x709   :  { %v8488_v4 = vld [vmem:[#allocation7 + $0xb0] sm:$0xff]  }
 0x70b   :  { %2250 = vmatpush1.bf16.msra.mxu1 %v7287_v21  ;;  %2293 = vmatpush1.bf16.msra.mxu0 %v7289_v22  ;;  %v224_v21 = vld [vmem:[#allocation6 + $0x1f8] sm:$0xff]  ;;  %v7307_v22 = vcombine.low %v231_v10, %v239_v11  ;;  %v8494_v10 = vld [vmem:[#allocation7 + $0xe0] sm:$0xff]  }
 0x70c   :  { %2251 = vmatprep.subr.bf16.mxu1 %v7272_v23  ;;  %2294 = vmatprep.subr.bf16.mxu0 %v7274_v24  ;;  %v7309_v23 = vcombine.low %v232_v12, %v240_v13  ;;  %v7292_v24 = vcombine.high %v215_v18, %v223_v19  ;;  %v7294_v25 = vcombine.high %v216_v20, %v224_v21  ;;  %v8495_v11 = vld [vmem:[#allocation7 + $0x20] sm:$0xff]   ;;  %v8497_v12 = vld [vmem:[#allocation7 + $0x58] sm:$0xff]  }
 0x70d   :  { %v8498_v13 = vld [vmem:[#allocation7 + $0xd8] sm:$0xff]  }
 0x70f   :  { %2252 = vmatpush1.bf16.msra.mxu1 %v7271_v31  ;;  %2295 = vmatpush1.bf16.msra.mxu0 %v7273_v32  ;;  %v208_v31 = vld [vmem:[#allocation6 + $0x178] sm:$0xff]  ;;  %v7291_v32 = vcombine.low %v215_v18, %v223_v19  ;;  %v8503_v18 = vld [vmem:[#allocation7 + $0x10] sm:$0xff]  }
 0x710   :  { %2253 = vmatprep.subr.bf16.mxu1 %v7256_v35  ;;  %2296 = vmatprep.subr.bf16.mxu0 %v7258_v37  ;;  %v7293_v35 = vcombine.low %v216_v20, %v224_v21  ;;  %v7276_v37 = vcombine.high %v199_v28, %v207_v29  ;;  %v7278_v38 = vcombine.high %v200_v30, %v208_v31  ;;  %v8504_v19 = vld [vmem:[#allocation7 + $0x90] sm:$0xff]   ;;  %v8505_v20 = vld [vmem:[#allocation7 + $0x48] sm:$0xff]  }
 0x711   :  { %v8506_v21 = vld [vmem:[#allocation7 + $0xc8] sm:$0xff]  }
 0x713   :  { %2254 = vmatpush1.bf16.msra.mxu1 %v7255_v6  ;;  %2297 = vmatpush1.bf16.msra.mxu0 %v7257_v45  ;;  %v192_v6 = vld [vmem:[#allocation6 + $0xf8] sm:$0xff]  ;;  %v7275_v45 = vcombine.low %v199_v28, %v207_v29  ;;  %v8511_v28 = vld [vmem:[#allocation7] sm:$0xff]  }
 0x714   :  { %2255 = vmatprep.subr.bf16.mxu1 %v7240_v46  ;;  %2298 = vmatprep.subr.bf16.mxu0 %v7242_v47  ;;  %v7277_v46 = vcombine.low %v200_v30, %v208_v31  ;;  %v7260_v47 = vcombine.high %v183_v39, %v191_v40  ;;  %v7262_v48 = vcombine.high %v184_v41, %v192_v6  ;;  %v8512_v29 = vld [vmem:[#allocation7 + $0x80] sm:$0xff]   ;;  %v8513_v30 = vld [vmem:[#allocation7 + $0x178] sm:$0xff]  }
 0x715   :  { %v8514_v31 = vld [vmem:[#allocation7 + $0x1f8] sm:$0xff]  }
 0x717   :  { %2256 = vmatpush1.bf16.msra.mxu1 %v7239_v51  ;;  %2299 = vmatpush1.bf16.msra.mxu0 %v7241_v52  ;;  %v176_v51 = vld [vmem:[#allocation6 + $0x78] sm:$0xff]  ;;  %v7259_v52 = vcombine.low %v183_v39, %v191_v40 }
 0x718   :  { %2327 = vmatprep.subr.bf16.mxu1 %v7356_v53  ;;  %2370 = vmatprep.subr.bf16.mxu0 %v7358_v54  ;;  %v7261_v53 = vcombine.low %v184_v41, %v192_v6  ;;  %v7244_v54 = vcombine.high %v167_v9, %v175_v49  ;;  %v7246_v55 = vcombine.high %v168_v50, %v176_v51 }
 0x719   :  { %v7245_v58 = vcombine.low %v168_v50, %v176_v51 }
 0x71a   :  { %2274 = vmatmul.mubr.bf16.vlgmr.msra.gmra.mxu1 %v9141_v44  ;;  %2317 = vmatmul.mubr.bf16.vlgmr.msra.gmra.mxu0 %v9141_v44 }
 0x71b   :  { %2328 = vmatpush1.bf16.msra.mxu1 %v7355_v60  ;;  %2371 = vmatpush1.bf16.msra.mxu0 %v7357_v61  ;;  %v8482_v60 = vld [vmem:[#allocation7 + $0xf8] sm:$0xff]  }
 0x71c   :  { %2329 = vmatprep.subr.bf16.mxu1 %v7340_v63  ;;  %2372 = vmatprep.subr.bf16.mxu0 %v7342_v62  ;;  %v8483_v61 = vld [vmem:[#allocation7 + $0x38] sm:$0xff]   ;;  %v8485_v62 = vld [vmem:[#allocation7 + $0x70] sm:$0xff]  }
 0x71d   :  { %2359 = vmatprep.mubr.bf16.mxu1 %v8951_v0  ;;  %2402 = vmatprep.mubr.bf16.mxu0 %v8951_v0  ;;  %v8484_v63 = vld [vmem:[#allocation7 + $0xb8] sm:$0xff]  }
 0x71f   :  { %2330 = vmatpush1.bf16.msra.mxu1 %v7339_v5  ;;  %2373 = vmatpush1.bf16.msra.mxu0 %v7341_v7  ;;  %v8490_v5 = vld [vmem:[#allocation7 + $0xe8] sm:$0xff]  }
 0x720   :  { %2331 = vmatprep.subr.bf16.mxu1 %v7324_v8  ;;  %2374 = vmatprep.subr.bf16.mxu0 %v7326_v27  ;;  %v8491_v7 = vld [vmem:[#allocation7 + $0x28] sm:$0xff]   ;;  %v8493_v27 = vld [vmem:[#allocation7 + $0x60] sm:$0xff]  }
 0x721   :  { %v8492_v8 = vld [vmem:[#allocation7 + $0xa8] sm:$0xff]  }
 0x723   :  { %2332 = vmatpush1.bf16.msra.mxu1 %v7323_v14  ;;  %2375 = vmatpush1.bf16.msra.mxu0 %v7325_v15  ;;  %v8499_v14 = vld [vmem:[#allocation7 + $0x18] sm:$0xff]  }
 0x724   :  { %2333 = vmatprep.subr.bf16.mxu1 %v7308_v16  ;;  %2376 = vmatprep.subr.bf16.mxu0 %v7310_v17  ;;  %v8500_v15 = vld [vmem:[#allocation7 + $0x98] sm:$0xff]   ;;  %v8501_v16 = vld [vmem:[#allocation7 + $0x50] sm:$0xff]  }
 0x725   :  { %v8502_v17 = vld [vmem:[#allocation7 + $0xd0] sm:$0xff]  }
 0x727   :  { %2334 = vmatpush1.bf16.msra.mxu1 %v7307_v22  ;;  %2377 = vmatpush1.bf16.msra.mxu0 %v7309_v23  ;;  %v8507_v22 = vld [vmem:[#allocation7 + $0x8] sm:$0xff]  }
 0x728   :  { %2335 = vmatprep.subr.bf16.mxu1 %v7292_v24  ;;  %2378 = vmatprep.subr.bf16.mxu0 %v7294_v25  ;;  %v8508_v23 = vld [vmem:[#allocation7 + $0x88] sm:$0xff]   ;;  %v8509_v24 = vld [vmem:[#allocation7 + $0x40] sm:$0xff]  }
 0x729   :  { %v8510_v25 = vld [vmem:[#allocation7 + $0xc0] sm:$0xff]  }
 0x72b   :  { %2336 = vmatpush1.bf16.msra.mxu1 %v7291_v32  ;;  %2379 = vmatpush1.bf16.msra.mxu0 %v7293_v35  ;;  %v101_v32 = vld [vmem:[#allocation9 + $0x82] ss:$8 sm:$0xf] }
 0x72c   :  { %2337 = vmatprep.subr.bf16.mxu1 %v7276_v37  ;;  %2380 = vmatprep.subr.bf16.mxu0 %v7278_v38  ;;  %v102_v35 = vld [vmem:[#allocation9 + $0x82] ss:$8 sm:$0xf0]  ;;  %v9158_v37 = vsub.s32 3, %v9038_v33 }
 0x72d   :  { %v9160_v38 = vor.u32 %v102_v35, %v101_v32  ;;  %v9171_v32 = vsub.s32 5, %v9038_v33  ;;  %v9174_v35 = vsub.s32 7, %v9038_v33 }
 0x72f   :  { %2338 = vmatpush1.bf16.msra.mxu1 %v7275_v45  ;;  %2381 = vmatpush1.bf16.msra.mxu0 %v7277_v46  ;;  %v1356_v41 = vrot.slane %v9160_v38, %v9044_v36  ;;  %v1364_v6 = vrot.slane %v9160_v38, %v9158_v37  ;;  %v1352_v45 = vrot.slane %v9160_v38, %v9041_v34 }
 0x730   :  { %2339 = vmatprep.subr.bf16.mxu1 %v7260_v47  ;;  %2382 = vmatprep.subr.bf16.mxu0 %v7262_v48  ;;  %v1360_v46 = vrot.slane %v9160_v38, %v9063_v57 }
 0x733   :  { %2340 = vmatpush1.bf16.msra.mxu1 %v7259_v52  ;;  %2383 = vmatpush1.bf16.msra.mxu0 %v7261_v53 }
 0x734   :  { %2341 = vmatprep.subr.bf16.mxu1 %v7244_v54  ;;  %2384 = vmatprep.subr.bf16.mxu0 %v7246_v55 }
 0x737   :  { %2342 = vmatpush1.bf16.msra.mxu1 %v7243_v56  ;;  %2385 = vmatpush1.bf16.msra.mxu0 %v7245_v58 }
 0x738   :  { %7825 = vmatprep.subr.bf16.mxu1 %v8481_v59  ;;  %7847 = vmatprep.subr.bf16.mxu0 %v8482_v60 }
 0x73a   :  { %2360 = vmatmul.mubr.bf16.vlgmr.msra.gmra.mxu1 %v9141_v44  ;;  %2403 = vmatmul.mubr.bf16.vlgmr.msra.gmra.mxu0 %v9141_v44  ;;  %v8496_v44 = vld [vmem:[#allocation7 + $0xa0] sm:$0xff]  }
 0x73b   :  { %7826 = vmatpush3.bf16.msra.mxu1 %v8483_v61  ;;  %7848 = vmatpush3.bf16.msra.mxu0 %v8484_v63 }
 0x73c   :  { %7827 = vmatprep.subr.bf16.mxu1 %v8485_v62  ;;  %7849 = vmatprep.subr.bf16.mxu0 %v8486_v2 }
 0x73f   :  { %7828 = vmatpush3.bf16.msra.mxu1 %v8487_v3  ;;  %7850 = vmatpush3.bf16.msra.mxu0 %v8488_v4 }
 0x740   :  { %7829 = vmatprep.subr.bf16.mxu1 %v8489_v26  ;;  %7851 = vmatprep.subr.bf16.mxu0 %v8490_v5 }
 0x743   :  { %7830 = vmatpush3.bf16.msra.mxu1 %v8491_v7  ;;  %7852 = vmatpush3.bf16.msra.mxu0 %v8492_v8 }
 0x744   :  { %7831 = vmatprep.subr.bf16.mxu1 %v8493_v27  ;;  %7853 = vmatprep.subr.bf16.mxu0 %v8494_v10  ;;  %v8515_v27 = vld [vmem:[#allocation7 + $0x138] sm:$0xff]  }
 0x745   :  { %v8516_v10 = vld [vmem:[#allocation7 + $0x1b8] sm:$0xff]  }
 0x747   :  { %7832 = vmatpush3.bf16.msra.mxu1 %v8495_v11  ;;  %7854 = vmatpush3.bf16.msra.mxu0 %v8496_v44 }
 0x748   :  { %7833 = vmatprep.subr.bf16.mxu1 %v8497_v12  ;;  %7855 = vmatprep.subr.bf16.mxu0 %v8498_v13  ;;  %v8517_v12 = vld [vmem:[#allocation7 + $0x170] sm:$0xff]  }
 0x749   :  { %v8518_v13 = vld [vmem:[#allocation7 + $0x1f0] sm:$0xff]  }
 0x74b   :  { %7834 = vmatpush3.bf16.msra.mxu1 %v8499_v14  ;;  %7856 = vmatpush3.bf16.msra.mxu0 %v8500_v15  ;;  %v8519_v14 = vld [vmem:[#allocation7 + $0x130] sm:$0xff]  }
 0x74c   :  { %7835 = vmatprep.subr.bf16.mxu1 %v8501_v16  ;;  %7857 = vmatprep.subr.bf16.mxu0 %v8502_v17  ;;  %v8520_v15 = vld [vmem:[#allocation7 + $0x1b0] sm:$0xff]   ;;  %v8521_v16 = vld [vmem:[#allocation7 + $0x168] sm:$0xff]  }
 0x74d   :  { %v8522_v17 = vld [vmem:[#allocation7 + $0x1e8] sm:$0xff]  }
 0x74f   :  { %7836 = vmatpush3.bf16.msra.mxu1 %v8503_v18  ;;  %7858 = vmatpush3.bf16.msra.mxu0 %v8504_v19  ;;  %v8523_v18 = vld [vmem:[#allocation7 + $0x128] sm:$0xff]  }
 0x750   :  { %7837 = vmatprep.subr.bf16.mxu1 %v8505_v20  ;;  %7859 = vmatprep.subr.bf16.mxu0 %v8506_v21  ;;  %v8524_v19 = vld [vmem:[#allocation7 + $0x1a8] sm:$0xff]   ;;  %v8525_v20 = vld [vmem:[#allocation7 + $0x160] sm:$0xff]  }
 0x751   :  { %v8526_v21 = vld [vmem:[#allocation7 + $0x1e0] sm:$0xff]  }
 0x753   :  { %7838 = vmatpush3.bf16.msra.mxu1 %v8507_v22  ;;  %7860 = vmatpush3.bf16.msra.mxu0 %v8508_v23  ;;  %v8527_v22 = vld [vmem:[#allocation7 + $0x120] sm:$0xff]  }
 0x754   :  { %7839 = vmatprep.subr.bf16.mxu1 %v8509_v24  ;;  %7861 = vmatprep.subr.bf16.mxu0 %v8510_v25  ;;  %v8528_v23 = vld [vmem:[#allocation7 + $0x1a0] sm:$0xff]   ;;  %v8529_v24 = vld [vmem:[#allocation7 + $0x158] sm:$0xff]  }
 0x755   :  { %v8530_v25 = vld [vmem:[#allocation7 + $0x1d8] sm:$0xff]  }
 0x757   :  { %7840 = vmatpush3.bf16.msra.mxu1 %v8511_v28  ;;  %7862 = vmatpush3.bf16.msra.mxu0 %v8512_v29  ;;  %v8531_v28 = vld [vmem:[#allocation7 + $0x118] sm:$0xff]  }
 0x758   :  { %7869 = vmatprep.subr.bf16.mxu1 %v8513_v30  ;;  %7891 = vmatprep.subr.bf16.mxu0 %v8514_v31  ;;  %v8532_v29 = vld [vmem:[#allocation7 + $0x198] sm:$0xff]   ;;  %v8533_v30 = vld [vmem:[#allocation7 + $0x150] sm:$0xff]  }
 0x759   :  { %v8534_v31 = vld [vmem:[#allocation7 + $0x1d0] sm:$0xff]  }
 0x79a   :  { %v2103_v39 = vpop.f32.mrf.mxu1  ;;  %v2146_v40 = vpop.f32.mrf.mxu0 }
 0x79b   :  { %v2104_v54 = vadd.f32 %v2103_v39, %v1352_v45  ;;  %v2147_v55 = vadd.f32 %v2146_v40, %v1360_v46  ;;  %v9177_v39 = vsub.s32 4, %v9038_v33  ;;  %v9180_v40 = vsub.s32 6, %v9038_v33 }
 0x79c   :  { %v2105_v47 = vpop.f32.mrf.mxu1  ;;  %v2148_v48 = vpop.f32.mrf.mxu0 }
 0x79d   :  { %v2106_v50 = vadd.f32 %v2105_v47, %v1356_v41  ;;  %v2149_v51 = vadd.f32 %v2148_v48, %v1364_v6  ;;  %v2413_v26 = vmax.f32 %v2104_v54, 0.0  ;;  %v2415_v5 = vmax.f32 %v2147_v55, 0.0  ;;  %v8537_v47 = vld [vmem:[#allocation7 + $0x148] sm:$0xff]  }
 0x79e   :  { %v2107_v9 = vpop.f32.mrf.mxu1  ;;  %v2150_v49 = vpop.f32.mrf.mxu0  ;;  %v8538_v48 = vld [vmem:[#allocation7 + $0x1c8] sm:$0xff]   ;;  %v1368_v33 = vrot.slane %v9160_v38, %v9177_v39 }
 0x79f   :  { %v2108_v52 = vadd.f32 %v2107_v9, %v1352_v45  ;;  %v2151_v53 = vadd.f32 %v2150_v49, %v1360_v46  ;;  %v2414_v62 = vmax.f32 %v2106_v50, 0.0  ;;  %v2416_v2 = vmax.f32 %v2149_v51, 0.0  ;;  %v8540_v54 = vld [vmem:[#allocation7 + $0x188] sm:$0xff]  }
 0x7a0   :  { %v2109_v56 = vpop.f32.mrf.mxu1  ;;  %v2152_v58 = vpop.f32.mrf.mxu0  ;;  %v1372_v9 = vrot.slane %v9160_v38, %v9171_v32  ;;  %v1380_v49 = vrot.slane %v9160_v38, %v9174_v35  ;;  %v1376_v50 = vrot.slane %v9160_v38, %v9180_v40 }
 0x7a1   :  { %v2110_v59 = vadd.f32 %v2109_v56, %v1356_v41  ;;  %v2153_v60 = vadd.f32 %v2152_v58, %v1364_v6  ;;  %v2429_v61 = vmax.f32 %v2108_v52, 0.0  ;;  %v2431_v63 = vmax.f32 %v2151_v53, 0.0  ;;  %v8535_v41 = vld [vmem:[#allocation7 + $0x110] sm:$0xff]   ;;  %v8539_v53 = vld [vmem:[#allocation7 + $0x108] sm:$0xff]   ;;  %v8541_v58 = vld [vmem:[#allocation7 + $0x140] sm:$0xff]  }
 0x7a2   :  { %v8536_v6 = vld [vmem:[#allocation7 + $0x190] sm:$0xff]  }
 0x7a3   :  { %v2430_v3 = vmax.f32 %v2110_v59, 0.0  ;;  %v2432_v4 = vmax.f32 %v2153_v60, 0.0  ;;  %v2445_v11 = vpack.c.bf16 %v2429_v61, %v2413_v26  ;;  %v2447_v44 = vpack.c.bf16 %v2431_v63, %v2415_v5  ;;  %v8542_v59 = vld [vmem:[#allocation7 + $0x1c0] sm:$0xff]  }
 0x7a5   :  { %v2446_v7 = vpack.c.bf16 %v2430_v3, %v2414_v62  ;;  %v2448_v8 = vpack.c.bf16 %v2432_v4, %v2416_v2 }
 0x7a7   :  { %3261 = vmatprep.mubr.bf16.mxu1 %v2446_v7  ;;  %3302 = vmatprep.mubr.bf16.mxu0 %v2448_v8  ;;  %v8543_v7 = vld [vmem:[#allocation7 + $0x100] sm:$0xff]  }
 0x7a8   :  { %3262 = vmatmul.mubr.bf16.vlgmr.msra.gmra.mxu1 %v2445_v11  ;;  %3303 = vmatmul.mubr.bf16.vlgmr.msra.gmra.mxu0 %v2447_v44  ;;  %v8544_v8 = vld [vmem:[#allocation7 + $0x180] sm:$0xff]   ;;  %v8545_v11 = vld [vmem:[#allocation7 + $0x278] sm:$0xff]  }
 0x7a9   :  { %7870 = vmatpush3.bf16.msra.mxu1 %v8515_v27  ;;  %7892 = vmatpush3.bf16.msra.mxu0 %v8516_v10  ;;  %v8546_v44 = vld [vmem:[#allocation7 + $0x2f8] sm:$0xff]  }
 0x7aa   :  { %7871 = vmatprep.subr.bf16.mxu1 %v8517_v12  ;;  %7893 = vmatprep.subr.bf16.mxu0 %v8518_v13 }
 0x7ad   :  { %7872 = vmatpush3.bf16.msra.mxu1 %v8519_v14  ;;  %7894 = vmatpush3.bf16.msra.mxu0 %v8520_v15 }
 0x7ae   :  { %7873 = vmatprep.subr.bf16.mxu1 %v8521_v16  ;;  %7895 = vmatprep.subr.bf16.mxu0 %v8522_v17 }
 0x7b1   :  { %7874 = vmatpush3.bf16.msra.mxu1 %v8523_v18  ;;  %7896 = vmatpush3.bf16.msra.mxu0 %v8524_v19 }
 0x7b2   :  { %7875 = vmatprep.subr.bf16.mxu1 %v8525_v20  ;;  %7897 = vmatprep.subr.bf16.mxu0 %v8526_v21  ;;  %v8547_v20 = vld [vmem:[#allocation7 + $0x238] sm:$0xff]  }
 0x7b3   :  { %v8548_v21 = vld [vmem:[#allocation7 + $0x2b8] sm:$0xff]  }
 0x7b5   :  { %7876 = vmatpush3.bf16.msra.mxu1 %v8527_v22  ;;  %7898 = vmatpush3.bf16.msra.mxu0 %v8528_v23 }
 0x7b6   :  { %7877 = vmatprep.subr.bf16.mxu1 %v8529_v24  ;;  %7899 = vmatprep.subr.bf16.mxu0 %v8530_v25  ;;  %v8549_v24 = vld [vmem:[#allocation7 + $0x270] sm:$0xff]  }
 0x7b7   :  { %v8550_v25 = vld [vmem:[#allocation7 + $0x2f0] sm:$0xff]  }
 0x7b9   :  { %7878 = vmatpush3.bf16.msra.mxu1 %v8531_v28  ;;  %7900 = vmatpush3.bf16.msra.mxu0 %v8532_v29  ;;  %v8551_v28 = vld [vmem:[#allocation7 + $0x230] sm:$0xff]  }
 0x7ba   :  { %v2189_v45 = vpop.f32.mrf.mxu1  ;;  %v2232_v46 = vpop.f32.mrf.mxu0  ;;  %7879 = vmatprep.subr.bf16.mxu1 %v8533_v30  ;;  %7901 = vmatprep.subr.bf16.mxu0 %v8534_v31  ;;  %v8552_v29 = vld [vmem:[#allocation7 + $0x2b0] sm:$0xff]   ;;  %v8553_v30 = vld [vmem:[#allocation7 + $0x268] sm:$0xff]  }
 0x7bb   :  { %v2190_v2 = vadd.f32 %v2189_v45, %v1368_v33  ;;  %v2233_v3 = vadd.f32 %v2232_v46, %v1376_v50  ;;  %v8554_v31 = vld [vmem:[#allocation7 + $0x2e8] sm:$0xff]   ;;  %v8557_v45 = vld [vmem:[#allocation7 + $0x260] sm:$0xff]  }
 0x7bc   :  { %v2191_v51 = vpop.f32.mrf.mxu1  ;;  %v2234_v52 = vpop.f32.mrf.mxu0  ;;  %v8558_v46 = vld [vmem:[#allocation7 + $0x2e0] sm:$0xff]  }
 0x7bd   :  { %7880 = vmatpush3.bf16.msra.mxu1 %v8535_v41  ;;  %7902 = vmatpush3.bf16.msra.mxu0 %v8536_v6  ;;  %v2192_v60 = vadd.f32 %v2191_v51, %v1372_v9  ;;  %v2235_v61 = vadd.f32 %v2234_v52, %v1380_v49  ;;  %v2417_v16 = vmax.f32 %v2190_v2, 0.0  ;;  %v2419_v17 = vmax.f32 %v2233_v3, 0.0  ;;  %v8555_v41 = vld [vmem:[#allocation7 + $0x228] sm:$0xff]   ;;  %v8564_v51 = vld [vmem:[#allocation7 + $0x298] sm:$0xff]  }
 0x7be   :  { %v2193_v55 = vpop.f32.mrf.mxu1  ;;  %v2236_v56 = vpop.f32.mrf.mxu0  ;;  %7881 = vmatprep.subr.bf16.mxu1 %v8537_v47  ;;  %7903 = vmatprep.subr.bf16.mxu0 %v8538_v48  ;;  %v8556_v6 = vld [vmem:[#allocation7 + $0x2a8] sm:$0xff]   ;;  %v8559_v47 = vld [vmem:[#allocation7 + $0x220] sm:$0xff]  }
 0x7bf   :  { %v2194_v63 = vadd.f32 %v2193_v55, %v1368_v33  ;;  %v2237_v62 = vadd.f32 %v2236_v56, %v1376_v50  ;;  %v2418_v12 = vmax.f32 %v2192_v60, 0.0  ;;  %v2420_v13 = vmax.f32 %v2235_v61, 0.0  ;;  %v8560_v48 = vld [vmem:[#allocation7 + $0x2a0] sm:$0xff]   ;;  %v8563_v50 = vld [vmem:[#allocation7 + $0x218] sm:$0xff]   ;;  %v8567_v56 = vld [vmem:[#allocation7 + $0x210] sm:$0xff]  }
 0x7c0   :  { %v2195_v4 = vpop.f32.mrf.mxu1  ;;  %v2238_v38 = vpop.f32.mrf.mxu0  ;;  %v105_v33 = vld [vmem:[#allocation9 + $0xc2] ss:$8 sm:$0xf] }
 0x7c1   :  { %v2196_v26 = vadd.f32 %v2195_v4, %v1372_v9  ;;  %v2239_v5 = vadd.f32 %v2238_v38, %v1380_v49  ;;  %7882 = vmatpush3.bf16.msra.mxu1 %v8539_v53  ;;  %7904 = vmatpush3.bf16.msra.mxu0 %v8540_v54  ;;  %v2433_v27 = vmax.f32 %v2194_v63, 0.0  ;;  %v2435_v10 = vmax.f32 %v2237_v62, 0.0  ;;  %v8561_v9 = vld [vmem:[#allocation7 + $0x258] sm:$0xff]   ;;  %v8565_v53 = vld [vmem:[#allocation7 + $0x250] sm:$0xff]   ;;  %v8569_v61 = vld [vmem:[#allocation7 + $0x248] sm:$0xff]  }
 0x7c2   :  { %7883 = vmatprep.subr.bf16.mxu1 %v8541_v58  ;;  %7905 = vmatprep.subr.bf16.mxu0 %v8542_v59  ;;  %v8562_v49 = vld [vmem:[#allocation7 + $0x2d8] sm:$0xff]   ;;  %v8566_v54 = vld [vmem:[#allocation7 + $0x2d0] sm:$0xff]   ;;  %v8570_v63 = vld [vmem:[#allocation7 + $0x2c8] sm:$0xff]  }
 0x7c3   :  { %v2434_v14 = vmax.f32 %v2196_v26, 0.0  ;;  %v2436_v15 = vmax.f32 %v2239_v5, 0.0  ;;  %v2449_v22 = vpack.c.bf16 %v2433_v27, %v2417_v16  ;;  %v2451_v23 = vpack.c.bf16 %v2435_v10, %v2419_v17  ;;  %v106_v52 = vld [vmem:[#allocation9 + $0xc2] ss:$8 sm:$0xf0] }
 0x7c4   :  { %v9190_v55 = vor.u32 %v106_v52, %v105_v33  ;;  %v8568_v58 = vld [vmem:[#allocation7 + $0x290] sm:$0xff]   ;;  %v8571_v5 = vld [vmem:[#allocation7 + $0x208] sm:$0xff]   ;;  %v8573_v10 = vld [vmem:[#allocation7 + $0x240] sm:$0xff]  }
 0x7c5   :  { %v2450_v18 = vpack.c.bf16 %v2434_v14, %v2418_v12  ;;  %v2452_v19 = vpack.c.bf16 %v2436_v15, %v2420_v13  ;;  %7884 = vmatpush3.bf16.msra.mxu1 %v8543_v7  ;;  %7906 = vmatpush3.bf16.msra.mxu0 %v8544_v8  ;;  %v8572_v7 = vld [vmem:[#allocation7 + $0x288] sm:$0xff]   ;;  %v8583_v52 = vld [vmem:[#allocation7 + $0x330] sm:$0xff]  }
 0x7c6   :  { %7913 = vmatprep.subr.bf16.mxu1 %v8545_v11  ;;  %7935 = vmatprep.subr.bf16.mxu0 %v8546_v44  ;;  %v1388_v62 = vrot.slane %v9190_v55, %v9044_v36  ;;  %v1396_v2 = vrot.slane %v9190_v55, %v9158_v37  ;;  %v1384_v3 = vrot.slane %v9190_v55, %v9041_v34  ;;  %v8574_v11 = vld [vmem:[#allocation7 + $0x2c0] sm:$0xff]  }
 0x7c7   :  { %3343 = vmatprep.mubr.bf16.mxu1 %v2450_v18  ;;  %3384 = vmatprep.mubr.bf16.mxu0 %v2452_v19  ;;  %v1392_v4 = vrot.slane %v9190_v55, %v9063_v57 }
 0x7c8   :  { %3344 = vmatmul.mubr.bf16.vlgmr.msra.gmra.mxu1 %v2449_v22  ;;  %3385 = vmatmul.mubr.bf16.vlgmr.msra.gmra.mxu0 %v2451_v23  ;;  %v8576_v22 = vld [vmem:[#allocation7 + $0x280] sm:$0xff]  }
 0x7c9   :  { %7914 = vmatpush3.bf16.msra.mxu1 %v8547_v20  ;;  %7936 = vmatpush3.bf16.msra.mxu0 %v8548_v21  ;;  %v8575_v21 = vld [vmem:[#allocation7 + $0x200] sm:$0xff]  }
 0x7ca   :  { %7915 = vmatprep.subr.bf16.mxu1 %v8549_v24  ;;  %7937 = vmatprep.subr.bf16.mxu0 %v8550_v25  ;;  %v8577_v25 = vld [vmem:[#allocation7 + $0x378] sm:$0xff]  }
 0x7cd   :  { %7916 = vmatpush3.bf16.msra.mxu1 %v8551_v28  ;;  %7938 = vmatpush3.bf16.msra.mxu0 %v8552_v29  ;;  %v8578_v28 = vld [vmem:[#allocation7 + $0x3f8] sm:$0xff]  }
 0x7ce   :  { %7917 = vmatprep.subr.bf16.mxu1 %v8553_v30  ;;  %7939 = vmatprep.subr.bf16.mxu0 %v8554_v31 }
 0x7d1   :  { %7918 = vmatpush3.bf16.msra.mxu1 %v8555_v41  ;;  %7940 = vmatpush3.bf16.msra.mxu0 %v8556_v6 }
 0x7d2   :  { %7919 = vmatprep.subr.bf16.mxu1 %v8557_v45  ;;  %7941 = vmatprep.subr.bf16.mxu0 %v8558_v46 }
 0x7d5   :  { %7920 = vmatpush3.bf16.msra.mxu1 %v8559_v47  ;;  %7942 = vmatpush3.bf16.msra.mxu0 %v8560_v48  ;;  %v8579_v48 = vld [vmem:[#allocation7 + $0x338] sm:$0xff]  }
 0x7d6   :  { %7921 = vmatprep.subr.bf16.mxu1 %v8561_v9  ;;  %7943 = vmatprep.subr.bf16.mxu0 %v8562_v49  ;;  %v8580_v9 = vld [vmem:[#allocation7 + $0x3b8] sm:$0xff]  }
 0x7d9   :  { %7922 = vmatpush3.bf16.msra.mxu1 %v8563_v50  ;;  %7944 = vmatpush3.bf16.msra.mxu0 %v8564_v51  ;;  %v8581_v50 = vld [vmem:[#allocation7 + $0x370] sm:$0xff]  }
 0x7da   :  { %v2275_v59 = vpop.f32.mrf.mxu1  ;;  %v2318_v60 = vpop.f32.mrf.mxu0  ;;  %7923 = vmatprep.subr.bf16.mxu1 %v8565_v53  ;;  %7945 = vmatprep.subr.bf16.mxu0 %v8566_v54  ;;  %v8582_v51 = vld [vmem:[#allocation7 + $0x3f0] sm:$0xff]   ;;  %v8585_v54 = vld [vmem:[#allocation7 + $0x368] sm:$0xff]  }
 0x7db   :  { %v2276_v15 = vadd.f32 %v2275_v59, %v1384_v3  ;;  %v2319_v16 = vadd.f32 %v2318_v60, %v1392_v4  ;;  %v8584_v53 = vld [vmem:[#allocation7 + $0x3b0] sm:$0xff]   ;;  %v8588_v59 = vld [vmem:[#allocation7 + $0x3a8] sm:$0xff]   ;;  %v8589_v60 = vld [vmem:[#allocation7 + $0x360] sm:$0xff]  }
 0x7dc   :  { %v2277_v38 = vpop.f32.mrf.mxu1  ;;  %v2320_v26 = vpop.f32.mrf.mxu0 }
 0x7dd   :  { %7924 = vmatpush3.bf16.msra.mxu1 %v8567_v56  ;;  %7946 = vmatpush3.bf16.msra.mxu0 %v8568_v58  ;;  %v2278_v44 = vadd.f32 %v2277_v38, %v1388_v62  ;;  %v2321_v12 = vadd.f32 %v2320_v26, %v1396_v2  ;;  %v2421_v6 = vmax.f32 %v2276_v15, 0.0  ;;  %v2423_v45 = vmax.f32 %v2319_v16, 0.0  ;;  %v8586_v56 = vld [vmem:[#allocation7 + $0x3e8] sm:$0xff]   ;;  %v8596_v38 = vld [vmem:[#allocation7 + $0x398] sm:$0xff]   ;;  %v8597_v26 = vld [vmem:[#allocation7 + $0x350] sm:$0xff]  }
 0x7de   :  { %v2279_v8 = vpop.f32.mrf.mxu1  ;;  %v2322_v27 = vpop.f32.mrf.mxu0  ;;  %7925 = vmatprep.subr.bf16.mxu1 %v8569_v61  ;;  %7947 = vmatprep.subr.bf16.mxu0 %v8570_v63  ;;  %v8587_v58 = vld [vmem:[#allocation7 + $0x328] sm:$0xff]   ;;  %v8590_v61 = vld [vmem:[#allocation7 + $0x3e0] sm:$0xff]   ;;  %v1408_v15 = vrot.slane %v9190_v55, %v9180_v40 }
 0x7df   :  { %v2280_v13 = vadd.f32 %v2279_v8, %v1384_v3  ;;  %v2323_v14 = vadd.f32 %v2322_v27, %v1392_v4  ;;  %v2422_v29 = vmax.f32 %v2278_v44, 0.0  ;;  %v2424_v30 = vmax.f32 %v2321_v12, 0.0  ;;  %v8591_v63 = vld [vmem:[#allocation7 + $0x320] sm:$0xff]   ;;  %v8594_v3 = vld [vmem:[#allocation7 + $0x3d8] sm:$0xff]   ;;  %v8600_v8 = vld [vmem:[#allocation7 + $0x390] sm:$0xff]  }
 0x7e0   :  { %v2281_v17 = vpop.f32.mrf.mxu1  ;;  %v2324_v18 = vpop.f32.mrf.mxu0  ;;  %v8595_v4 = vld [vmem:[#allocation7 + $0x318] sm:$0xff]   ;;  %v8602_v44 = vld [vmem:[#allocation7 + $0x3c8] sm:$0xff]   ;;  %v1404_v12 = vrot.slane %v9190_v55, %v9171_v32 }
 0x7e1   :  { %v2282_v19 = vadd.f32 %v2281_v17, %v1388_v62  ;;  %v2325_v20 = vadd.f32 %v2324_v18, %v1396_v2  ;;  %7926 = vmatpush3.bf16.msra.mxu1 %v8571_v5  ;;  %7948 = vmatpush3.bf16.msra.mxu0 %v8572_v7  ;;  %v2437_v23 = vmax.f32 %v2280_v13, 0.0  ;;  %v2439_v24 = vmax.f32 %v2323_v14, 0.0  ;;  %v8592_v62 = vld [vmem:[#allocation7 + $0x3a0] sm:$0xff]   ;;  %v8593_v2 = vld [vmem:[#allocation7 + $0x358] sm:$0xff]   ;;  %v8598_v5 = vld [vmem:[#allocation7 + $0x3d0] sm:$0xff]  }
 0x7e2   :  { %7927 = vmatprep.subr.bf16.mxu1 %v8573_v10  ;;  %7949 = vmatprep.subr.bf16.mxu0 %v8574_v11  ;;  %v8599_v7 = vld [vmem:[#allocation7 + $0x310] sm:$0xff]   ;;  %v8601_v11 = vld [vmem:[#allocation7 + $0x348] sm:$0xff]   ;;  %v1412_v13 = vrot.slane %v9190_v55, %v9174_v35  ;;  %v1400_v14 = vrot.slane %v9190_v55, %v9177_v39 }
 0x7e3   :  { %v2438_v31 = vmax.f32 %v2282_v19, 0.0  ;;  %v2440_v41 = vmax.f32 %v2325_v20, 0.0  ;;  %v2453_v49 = vpack.c.bf16 %v2437_v23, %v2421_v6  ;;  %v2455_v33 = vpack.c.bf16 %v2439_v24, %v2423_v45  ;;  %v8603_v18 = vld [vmem:[#allocation7 + $0x308] sm:$0xff]   ;;  %v8606_v23 = vld [vmem:[#allocation7 + $0x3c0] sm:$0xff]  }
 0x7e4   :  { %v8604_v19 = vld [vmem:[#allocation7 + $0x388] sm:$0xff]  }
 0x7e5   :  { %v2454_v46 = vpack.c.bf16 %v2438_v31, %v2422_v29  ;;  %v2456_v47 = vpack.c.bf16 %v2440_v41, %v2424_v30  ;;  %7928 = vmatpush3.bf16.msra.mxu1 %v8575_v21  ;;  %7950 = vmatpush3.bf16.msra.mxu0 %v8576_v22  ;;  %v8605_v22 = vld [vmem:[#allocation7 + $0x340] sm:$0xff]  }
 0x7e6   :  { %7957 = vmatprep.subr.bf16.mxu1 %v8577_v25  ;;  %7979 = vmatprep.subr.bf16.mxu0 %v8578_v28 }
 0x7e7   :  { %3425 = vmatprep.mubr.bf16.mxu1 %v2454_v46  ;;  %3466 = vmatprep.mubr.bf16.mxu0 %v2456_v47  ;;  %v8607_v46 = vld [vmem:[#allocation7 + $0x300] sm:$0xff]  }
 0x7e8   :  { %3426 = vmatmul.mubr.bf16.vlgmr.msra.gmra.mxu1 %v2453_v49  ;;  %3467 = vmatmul.mubr.bf16.vlgmr.msra.gmra.mxu0 %v2455_v33  ;;  %v8608_v47 = vld [vmem:[#allocation7 + $0x380] sm:$0xff]  }
 0x7e9   :  { %7958 = vmatpush3.bf16.msra.mxu1 %v8579_v48  ;;  %7980 = vmatpush3.bf16.msra.mxu0 %v8580_v9 }
 0x7ea   :  { %7959 = vmatprep.subr.bf16.mxu1 %v8581_v50  ;;  %7981 = vmatprep.subr.bf16.mxu0 %v8582_v51 }
 0x7ed   :  { %7960 = vmatpush3.bf16.msra.mxu1 %v8583_v52  ;;  %7982 = vmatpush3.bf16.msra.mxu0 %v8584_v53 }
 0x7ee   :  { %7961 = vmatprep.subr.bf16.mxu1 %v8585_v54  ;;  %7983 = vmatprep.subr.bf16.mxu0 %v8586_v56 }
 0x7f1   :  { %7962 = vmatpush3.bf16.msra.mxu1 %v8587_v58  ;;  %7984 = vmatpush3.bf16.msra.mxu0 %v8588_v59 }
 0x7f2   :  { %7963 = vmatprep.subr.bf16.mxu1 %v8589_v60  ;;  %7985 = vmatprep.subr.bf16.mxu0 %v8590_v61 }
 0x7f5   :  { %7964 = vmatpush3.bf16.msra.mxu1 %v8591_v63  ;;  %7986 = vmatpush3.bf16.msra.mxu0 %v8592_v62 }
 0x7f6   :  { %7965 = vmatprep.subr.bf16.mxu1 %v8593_v2  ;;  %7987 = vmatprep.subr.bf16.mxu0 %v8594_v3 }
 0x7f9   :  { %7966 = vmatpush3.bf16.msra.mxu1 %v8595_v4  ;;  %7988 = vmatpush3.bf16.msra.mxu0 %v8596_v38 }
 0x7fa   :  { %v2361_v27 = vpop.f32.mrf.mxu1  ;;  %v2404_v10 = vpop.f32.mrf.mxu0  ;;  %7967 = vmatprep.subr.bf16.mxu1 %v8597_v26  ;;  %7989 = vmatprep.subr.bf16.mxu0 %v8598_v5 }
 0x7fb   :  { %v2362_v30 = vadd.f32 %v2361_v27, %v1400_v14  ;;  %v2405_v31 = vadd.f32 %v2404_v10, %v1408_v15 }
 0x7fc   :  { %v2363_v16 = vpop.f32.mrf.mxu1  ;;  %v2406_v17 = vpop.f32.mrf.mxu0 }
 0x7fd   :  { %7968 = vmatpush3.bf16.msra.mxu1 %v8599_v7  ;;  %7990 = vmatpush3.bf16.msra.mxu0 %v8600_v8  ;;  %v2364_v24 = vadd.f32 %v2363_v16, %v1404_v12  ;;  %v2407_v25 = vadd.f32 %v2406_v17, %v1412_v13  ;;  %v2425_v52 = vmax.f32 %v2362_v30, 0.0  ;;  %v2427_v53 = vmax.f32 %v2405_v31, 0.0 }
 0x7fe   :  { %v2365_v20 = vpop.f32.mrf.mxu1  ;;  %v2408_v21 = vpop.f32.mrf.mxu0  ;;  %7969 = vmatprep.subr.bf16.mxu1 %v8601_v11  ;;  %7991 = vmatprep.subr.bf16.mxu0 %v8602_v44 }
 0x7ff   :  { %v2366_v28 = vadd.f32 %v2365_v20, %v1400_v14  ;;  %v2409_v29 = vadd.f32 %v2408_v21, %v1408_v15  ;;  %v2426_v49 = vmax.f32 %v2364_v24, 0.0  ;;  %v2428_v33 = vmax.f32 %v2407_v25, 0.0 }
 0x800   :  { %v2367_v41 = vpop.f32.mrf.mxu1  ;;  %v2410_v55 = vpop.f32.mrf.mxu0 }
 0x801   :  { %v2368_v6 = vadd.f32 %v2367_v41, %v1404_v12  ;;  %v2411_v45 = vadd.f32 %v2410_v55, %v1412_v13  ;;  %7970 = vmatpush3.bf16.msra.mxu1 %v8603_v18  ;;  %7992 = vmatpush3.bf16.msra.mxu0 %v8604_v19  ;;  %v2441_v48 = vmax.f32 %v2366_v28, 0.0  ;;  %v2443_v9 = vmax.f32 %v2409_v29, 0.0  ;;  %v108_v12 = vld [vmem:[#allocation9 + $0x83] ss:$0 sm:$0xff] }
 0x802   :  { %7971 = vmatprep.subr.bf16.mxu1 %v8605_v22  ;;  %7993 = vmatprep.subr.bf16.mxu0 %v8606_v23 }
 0x803   :  { %v2442_v50 = vmax.f32 %v2368_v6, 0.0  ;;  %v2444_v51 = vmax.f32 %v2411_v45, 0.0  ;;  %v2457_v58 = vpack.c.bf16 %v2441_v48, %v2425_v52  ;;  %v2459_v59 = vpack.c.bf16 %v2443_v9, %v2427_v53 }
 0x805   :  { %v2458_v54 = vpack.c.bf16 %v2442_v50, %v2426_v49  ;;  %v2460_v56 = vpack.c.bf16 %v2444_v51, %v2428_v33  ;;  %7972 = vmatpush3.bf16.msra.mxu1 %v8607_v46  ;;  %7994 = vmatpush3.bf16.msra.mxu0 %v8608_v47 }
 0x806   :  { %8308 = vmatprep.subr.bf16.mxu0 %v8952_v1 }
 0x807   :  { %3507 = vmatprep.mubr.bf16.mxu1 %v2458_v54  ;;  %3548 = vmatprep.mubr.bf16.mxu0 %v2460_v56 }
 0x808   :  { %3508 = vmatmul.mubr.bf16.vlgmr.msra.gmra.mxu1 %v2457_v58  ;;  %3549 = vmatmul.mubr.bf16.vlgmr.msra.gmra.mxu0 %v2459_v59 }
 0x809   :  { %4214 = vmatprep.mubr.bf16.mxu1 %v8951_v0  ;;  %8324 = vmatprep.mubr.msk.bf16.mxu0 %vm8953_vm0, %v8952_v1 }
 0x868   :  { %v7841_v60 = vpop.f32.mrf.mxu1  ;;  %v7863_v61 = vpop.f32.mrf.mxu0 }
 0x86a   :  { %v7842_v63 = vpop.f32.mrf.mxu1  ;;  %v7864_v62 = vpop.f32.mrf.mxu0 }
 0x86b   :  { %v7843_v44 = vadd.f32 %v7842_v63, %v7841_v60  ;;  %v7865_v19 = vadd.f32 %v7864_v62, %v7863_v61 }
 0x86c   :  { %v7844_v2 = vpop.f32.mrf.mxu1  ;;  %v7866_v3 = vpop.f32.mrf.mxu0 }
 0x86d   :  { %v3264_v16 = vadd.f32 %v7843_v44, %v108_v12  ;;  %v8609_v44 = vld [vmem:[#allocation2 + $0x168] ss:$12 sps:$4 sm:$0xff]  }
 0x86e   :  { %v7845_v4 = vpop.f32.mrf.mxu1  ;;  %v7867_v38 = vpop.f32.mrf.mxu0 }
 0x86f   :  { %v7846_v17 = vadd.f32 %v7845_v4, %v7844_v2  ;;  %v3305_v22 = vadd.f32 %v7865_v19, %v3264_v16  ;;  %v7868_v25 = vadd.f32 %v7867_v38, %v7866_v3 }
 0x871   :  { %v3267_v23 = vadd.f32 %v7846_v17, %v108_v12  ;;  %v8611_v12 = vld [vmem:[#allocation2 + $0x16c] ss:$12 sps:$4 sm:$0xff]  }
 0x872   :  { %4182 = vmatprep.subr.bf16.mxu1 %v8611_v12 }
 0x873   :  { %v3308_v31 = vadd.f32 %v7868_v25, %v3267_v23  ;;  %4183 = vmatpush1.bf16.msra.mxu1 %v8609_v44  ;;  %v8619_v23 = vld [vmem:[#allocation2 + $0x13c] ss:$12 sps:$4 sm:$0xff]   ;;  %v8620_v25 = vld [vmem:[#allocation2 + $0x140] ss:$12 sps:$4 sm:$0xff]  }
 0x888   :  { %v7885_v26 = vpop.f32.mrf.mxu1  ;;  %v7907_v5 = vpop.f32.mrf.mxu0 }
 0x88a   :  { %v7886_v7 = vpop.f32.mrf.mxu1  ;;  %v7908_v8 = vpop.f32.mrf.mxu0 }
 0x88b   :  { %v7887_v20 = vadd.f32 %v7886_v7, %v7885_v26  ;;  %v7909_v41 = vadd.f32 %v7908_v8, %v7907_v5 }
 0x88c   :  { %v7888_v27 = vpop.f32.mrf.mxu1  ;;  %v7910_v10 = vpop.f32.mrf.mxu0 }
 0x88d   :  { %v3346_v28 = vadd.f32 %v7887_v20, %v3305_v22  ;;  %v8615_v20 = vld [vmem:[#allocation2 + $0x154] ss:$12 sps:$4 sm:$0xff]   ;;  %v8616_v22 = vld [vmem:[#allocation2 + $0x158] ss:$12 sps:$4 sm:$0xff]  }
 0x88e   :  { %v7889_v11 = vpop.f32.mrf.mxu1  ;;  %v7911_v13 = vpop.f32.mrf.mxu0  ;;  %4184 = vmatprep.subr.bf16.mxu1 %v8615_v20 }
 0x88f   :  { %v7890_v29 = vadd.f32 %v7889_v11, %v7888_v27  ;;  %v3387_v45 = vadd.f32 %v7909_v41, %v3346_v28  ;;  %v7912_v48 = vadd.f32 %v7911_v13, %v7910_v10  ;;  %v8612_v13 = vld [vmem:[#allocation2 + $0x170] ss:$12 sps:$4 sm:$0xff]   ;;  %v8621_v28 = vld [vmem:[#allocation2 + $0x120] ss:$12 sps:$4 sm:$0xff]   ;;  %v8625_v41 = vld [vmem:[#allocation2 + $0x108] ss:$12 sps:$4 sm:$0xff]  }
 0x890   :  { %8309 = vmatpush3.bf16.msra.mxu0 %v8612_v13 }
 0x891   :  { %v3349_v46 = vadd.f32 %v7890_v29, %v3308_v31  ;;  %8310 = vmatprep.subr.bf16.mxu0 %v8952_v1  ;;  %v8623_v29 = vld [vmem:[#allocation2 + $0x124] ss:$12 sps:$4 sm:$0xff]   ;;  %v8627_v31 = vld [vmem:[#allocation2 + $0x10c] ss:$12 sps:$4 sm:$0xff]  }
 0x893   :  { %v3390_v51 = vadd.f32 %v7912_v48, %v3349_v46  ;;  %v8632_v46 = vld [vmem:[#allocation2 + $0xf8] ss:$12 sps:$4 sm:$0xff]  }
 0x894   :  { %8311 = vmatpush3.bf16.msra.mxu0 %v8616_v22  ;;  %v8633_v48 = vld [vmem:[#allocation2 + $0xd8] ss:$12 sps:$4 sm:$0xff]  }
 0x895   :  { %8312 = vmatprep.subr.bf16.mxu0 %v8952_v1 }
 0x898   :  { %8313 = vmatpush3.bf16.msra.mxu0 %v8620_v25 }
 0x899   :  { %8314 = vmatprep.subr.bf16.mxu0 %v8952_v1 }
 0x8a8   :  { %v7929_v14 = vpop.f32.mrf.mxu1  ;;  %v7951_v15 = vpop.f32.mrf.mxu0 }
 0x8aa   :  { %v7930_v18 = vpop.f32.mrf.mxu1  ;;  %v7952_v21 = vpop.f32.mrf.mxu0 }
 0x8ab   :  { %v7931_v55 = vadd.f32 %v7930_v18, %v7929_v14  ;;  %v7953_v52 = vadd.f32 %v7952_v21, %v7951_v15  ;;  %v8613_v21 = vld [vmem:[#allocation2 + $0x150] ss:$12 sps:$4 sm:$0xff]  }
 0x8ac   :  { %v7932_v24 = vpop.f32.mrf.mxu1  ;;  %v7954_v30 = vpop.f32.mrf.mxu0  ;;  %4185 = vmatpush1.bf16.msra.mxu1 %v8613_v21 }
 0x8ad   :  { %v3428_v9 = vadd.f32 %v7931_v55, %v3387_v45  ;;  %4186 = vmatprep.subr.bf16.mxu1 %v8619_v23  ;;  %v8628_v55 = vld [vmem:[#allocation2 + $0x110] ss:$12 sps:$4 sm:$0xff]  }
 0x8ae   :  { %v7933_v6 = vpop.f32.mrf.mxu1  ;;  %v7955_v47 = vpop.f32.mrf.mxu0  ;;  %v8629_v45 = vld [vmem:[#allocation2 + $0xf0] ss:$12 sps:$4 sm:$0xff]  }
 0x8af   :  { %v7934_v49 = vadd.f32 %v7933_v6, %v7932_v24  ;;  %v3469_v56 = vadd.f32 %v7953_v52, %v3428_v9  ;;  %v7956_v63 = vadd.f32 %v7955_v47, %v7954_v30  ;;  %v8617_v24 = vld [vmem:[#allocation2 + $0x138] ss:$12 sps:$4 sm:$0xff]   ;;  %v8624_v30 = vld [vmem:[#allocation2 + $0x128] ss:$12 sps:$4 sm:$0xff]   ;;  %v8636_v9 = vld [vmem:[#allocation2 + $0xe0] ss:$12 sps:$4 sm:$0xff]  }
 0x8b0   :  { %4187 = vmatpush1.bf16.msra.mxu1 %v8617_v24  ;;  %8315 = vmatpush3.bf16.msra.mxu0 %v8624_v30  ;;  %v8631_v6 = vld [vmem:[#allocation2 + $0xf4] ss:$12 sps:$4 sm:$0xff]   ;;  %v8635_v47 = vld [vmem:[#allocation2 + $0xdc] ss:$12 sps:$4 sm:$0xff]  }
 0x8b1   :  { %v3431_v58 = vadd.f32 %v7934_v49, %v3390_v51  ;;  %4188 = vmatprep.subr.bf16.mxu1 %v8623_v29  ;;  %8316 = vmatprep.subr.bf16.mxu0 %v8952_v1  ;;  %v8639_v49 = vld [vmem:[#allocation2 + $0xc4] ss:$12 sps:$4 sm:$0xff]  }
 0x8b3   :  { %v3472_v38 = vadd.f32 %v7956_v63, %v3431_v58 }
 0x8b4   :  { %4189 = vmatpush1.bf16.msra.mxu1 %v8621_v28  ;;  %8317 = vmatpush3.bf16.msra.mxu0 %v8628_v55 }
 0x8b5   :  { %4190 = vmatprep.subr.bf16.mxu1 %v8627_v31  ;;  %8318 = vmatprep.subr.bf16.mxu0 %v8952_v1 }
 0x8b8   :  { %4191 = vmatpush1.bf16.msra.mxu1 %v8625_v41  ;;  %8319 = vmatpush3.bf16.msra.mxu0 %v8632_v46 }
 0x8b9   :  { %4192 = vmatprep.subr.bf16.mxu1 %v8631_v6  ;;  %8320 = vmatprep.subr.bf16.mxu0 %v8952_v1 }
 0x8bc   :  { %4193 = vmatpush1.bf16.msra.mxu1 %v8629_v45  ;;  %8321 = vmatpush3.bf16.msra.mxu0 %v8636_v9 }
 0x8bd   :  { %4194 = vmatprep.subr.bf16.mxu1 %v8635_v47  ;;  %8322 = vmatprep.subr.bf16.mxu0 %v8952_v1 }
 0x8c0   :  { %4195 = vmatpush1.bf16.msra.mxu1 %v8633_v48 }
 0x8c1   :  { %4196 = vmatprep.subr.bf16.mxu1 %v8639_v49 }
 0x8c8   :  { %v7973_v33 = vpop.f32.mrf.mxu1  ;;  %v7995_v50 = vpop.f32.mrf.mxu0 }
 0x8ca   :  { %v7974_v53 = vpop.f32.mrf.mxu1  ;;  %v7996_v54 = vpop.f32.mrf.mxu0 }
 0x8cb   :  { %v7975_v59 = vadd.f32 %v7974_v53, %v7973_v33  ;;  %v7997_v2 = vadd.f32 %v7996_v54, %v7995_v50  ;;  %v8637_v33 = vld [vmem:[#allocation2 + $0xc0] ss:$12 sps:$4 sm:$0xff]   ;;  %v8640_v50 = vld [vmem:[#allocation2 + $0xc8] ss:$12 sps:$4 sm:$0xff]  }
 0x8cc   :  { %v7976_v60 = vpop.f32.mrf.mxu1  ;;  %v7998_v61 = vpop.f32.mrf.mxu0  ;;  %4197 = vmatpush1.bf16.msra.mxu1 %v8637_v33  ;;  %8323 = vmatpush3.bf16.msra.mxu0 %v8640_v50 }
 0x8cd   :  { %v3510_v62 = vadd.f32 %v7975_v59, %v3469_v56  ;;  %8352 = vmatprep.subr.bf16.mxu0 %v8952_v1  ;;  %8328 = vmatprep.subr.bf16.mxu1 %v8952_v1 }
 0x8ce   :  { %v7977_v3 = vpop.f32.mrf.mxu1  ;;  %v7999_v4 = vpop.f32.mrf.mxu0 }
 0x8cf   :  { %v3551_v26 = vadd.f32 %v7997_v2, %v3510_v62  ;;  %v7978_v5 = vadd.f32 %v7977_v3, %v7976_v60  ;;  %v8000_v8 = vadd.f32 %v7999_v4, %v7998_v61  ;;  %v111_v61 = vld [vmem:[#allocation9 + $0x86] ss:$0 sm:$0xff]  ;;  %v112_v3 = vld [vmem:[#allocation9 + $0x87] ss:$0 sm:$0xff] }
 0x8d1   :  { %v3513_v7 = vadd.f32 %v7978_v5, %v3472_v38  ;;  %v3557_v27 = vadd.f32 %v3551_v26, %v9135_v42 }
 0x8d3   :  { %v3554_v10 = vadd.f32 %v8000_v8, %v3513_v7  ;;  %3559 = vadd.xlane.f32.xlu0 %v3557_v27  ;;  %v3586_v7 = vld [vmem:[#allocation9 + $0x100] ss:$8 sm:$0x7] }
 0x8d4   :  { %v4042_v8 = vrot.slane %v3586_v7, %v9041_v34 }
 0x8d5   :  { %v3558_v11 = vadd.f32 %v3554_v10, %v9137_v43  ;;  %v4046_v10 = vrot.slane %v3586_v7, %v9044_v36 }
 0x8d7   :  { %3561 = vadd.xlane.f32.xlu1 %v3558_v11 }
 0x95c   :  { %v3560_v14 = vpop.xlane.xlu0 %3559 }
 0x95d   :  { %v3563_v15 = vmul.f32 0.0078125, %v3560_v14 }
 0x95f   :  { %v9215_v16 = vsub.f32 %v3557_v27, %v3563_v15  ;;  %v4050_v27 = vrot.slane %v3586_v7, %v9063_v57 }
 0x960   :  { %v3562_v17 = vpop.xlane.xlu1 %3561 }
 0x961   :  { %v3564_v18 = vmul.f32 0.0078125, %v3562_v17  ;;  %v3567_v42 = vmul.f32 %v9215_v16, %v9215_v16 }
 0x963   :  { %v9219_v19 = vsub.f32 %v3558_v11, %v3564_v18  ;;  %3569 = vadd.xlane.f32.xlu0 %v3567_v42 }
 0x965   :  { %v3568_v43 = vmul.f32 %v9219_v19, %v9219_v19 }
 0x967   :  { %3571 = vadd.xlane.f32.xlu1 %v3568_v43 }
 0x9ec   :  { %v3570_v51 = vpop.xlane.xlu0 %3569 }
 0x9ed   :  { %v3573_v52 = vmul.f32 0.0078125, %v3570_v51 }
 0x9ef   :  { %v3575_v53 = vadd.f32 1e-05, %v3573_v52 }
 0x9f0   :  { %v3572_v54 = vpop.xlane.xlu1 %3571 }
 0x9f1   :  { %8805 = vrsqrt.f32 %v3575_v53  ;;  %v3574_v56 = vmul.f32 0.0078125, %v3572_v54 }
 0x9f3   :  { %v3576_v58 = vadd.f32 1e-05, %v3574_v56 }
 0x9f5   :  { %8807 = vrsqrt.f32 %v3576_v58 }
 0x9fe   :  { %v8806_v59 = vpop.eup %8805 }
 0x9ff   :  { %v3579_v60 = vmul.f32 %v8806_v59, %v9215_v16 }
 0xa01   :  { %v3581_v2 = vmul.f32 %v3579_v60, %v111_v61 }
 0xa02   :  { %v8808_v63 = vpop.eup %8807 }
 0xa03   :  { %v3580_v62 = vmul.f32 %v8808_v63, %v9219_v19  ;;  %v9233_v38 = vadd.f32 %v3581_v2, %v112_v3 }
 0xa05   :  { %v3582_v4 = vmul.f32 %v3580_v62, %v111_v61 }
 0xa07   :  { %v9235_v26 = vadd.f32 %v3582_v4, %v112_v3 }
 0xa09   :  { %v4037_v5 = vpack.c.bf16 %v9235_v26, %v9233_v38 }
 0xa0b   :  { %4215 = vmatmul.mubr.bf16.vlgmr.msra.gmra.mxu1 %v4037_v5  ;;  %8325 = vmatmul.mubr.bf16.vlgmr.msra.gmra.mxu0 %v4037_v5 }
 0xa0c   :  { %8330 = vmatprep.mubr.msk.bf16.mxu1 %vm8953_vm0, %v8952_v1  ;;  %8354 = vmatprep.mubr.msk.bf16.mxu0 %vm8953_vm0, %v8952_v1 }
 0xacb   :  { %v4216_v11 = vpop.f32.mrf.mxu1  ;;  %v4259_v44 = vpop.f32.mrf.mxu0 }
 0xacc   :  { %v4217_v12 = vadd.f32 %v4216_v11, %v4042_v8  ;;  %v4260_v13 = vadd.f32 %v4259_v44, %v4050_v27 }
 0xacd   :  { %v4218_v14 = vpop.f32.mrf.mxu1  ;;  %v8326_v15 = vpop.f32.mrf.mxu0 }
 0xace   :  { %v4266_v16 = vpack.c.bf16 %v4217_v12, %v4217_v12  ;;  %v9246_v17 = vpack.c.bf16 %v4260_v13, %v4260_v13  ;;  %v4219_v18 = vadd.f32 %v4218_v14, %v4046_v10 }
 0xacf   :  { %v4220_v42 = vpop.f32.mrf.mxu1  ;;  %v4262_v19 = vpop.f32.mrf.mxu0 }
 0xad0   :  { %v4526_v43 = vsel %vm1035_vm2, %v9246_v17, 0  ;;  %v4268_v20 = vpack.c.bf16 %v4219_v18, %v4219_v18  ;;  %v4221_v21 = vadd.f32 %v4220_v42, %v4042_v8  ;;  %v4263_v22 = vadd.f32 %v4262_v19, %v4050_v27  ;;  %4274 = vrot.lane.b32.xlu1 %v4266_v16, %s8940_s24 }
 0xad1   :  { %v4222_v23 = vpop.f32.mrf.mxu1  ;;  %v8327_v24 = vpop.f32.mrf.mxu0  ;;  %8353 = vmatpush3.bf16.msra.mxu0 %v4526_v43 }
 0xad2   :  { %v4294_v25 = vsel %vm798_vm1, %v4268_v20, 0  ;;  %v4223_v28 = vadd.f32 %v4222_v23, %v4046_v10  ;;  %4280 = vrot.lane.b32.xlu0 %v4268_v20, %s8940_s24  ;;  %8364 = vmatprep.subr.bf16.mxu0 %v8952_v1  ;;  %v4267_v29 = vpack.c.bf16 %v4221_v21, %v4221_v21  ;;  %v4271_v47 = vpack.c.bf16 %v4263_v22, %v4263_v22 }
 0xad3   :  { %8329 = vmatpush3.bf16.xpose.msra.mxu1 %v4294_v25 }
 0xad4   :  { %v4269_v30 = vpack.c.bf16 %v4223_v28, %v4223_v28  ;;  %8334 = vmatprep.subr.bf16.mxu1 %v8952_v1  ;;  %v4572_v9 = vsel %vm1035_vm2, %v4271_v47, 0 }
 0xad6   :  { %4276 = vrot.lane.b32.xlu0 %v4267_v29, %s8940_s24  ;;  %4282 = vrot.lane.b32.xlu1 %v4269_v30, %s8940_s24  ;;  %v4340_v31 = vsel %vm798_vm1, %v4269_v30, 0 }
 0xada   :  { %8331 = vmatmul.mubr.msk.bf16.vlgmr.msra.gmra.mxu1 %vm798_vm1, %v4266_v16 }
 0xadb   :  { %8335 = vmatpush3.bf16.xpose.msra.mxu1 %v4340_v31  ;;  %8336 = vmatprep.mubr.msk.bf16.mxu1 %vm8953_vm0, %v8952_v1 }
 0xadc   :  { %8340 = vmatprep.subr.bf16.mxu1 %v8952_v1 }
 0xae2   :  { %8337 = vmatmul.mubr.msk.bf16.vlgmr.msra.gmra.mxu1 %vm798_vm1, %v4267_v29 }
 0xae3   :  { %8342 = vmatprep.mubr.msk.bf16.mxu1 %vm8953_vm0, %v8952_v1 }
 0xb42   :  { %v4275_v6 = vpop.permute.xlu1 %4274 }
 0xb44   :  { %v4281_v41 = vpop.permute.xlu0 %4280 }
 0xb45   :  { %v4386_v55 = vsel %vm798_vm1, %v4281_v41, 0 }
 0xb46   :  { %8341 = vmatpush3.bf16.xpose.msra.mxu1 %v4386_v55 }
 0xb47   :  { %8346 = vmatprep.subr.bf16.mxu1 %v8952_v1 }
 0xb48   :  { %v4283_v45 = vpop.permute.xlu1 %4282  ;;  %v4277_v48 = vpop.permute.xlu0 %4276 }
 0xb49   :  { %v4432_v46 = vsel %vm798_vm1, %v4283_v45, 0 }
 0xb4d   :  { %8343 = vmatmul.mubr.msk.bf16.vlgmr.msra.gmra.mxu1 %vm798_vm1, %v4275_v6 }
 0xb4e   :  { %8347 = vmatpush3.bf16.xpose.msra.mxu1 %v4432_v46  ;;  %8348 = vmatprep.mubr.msk.bf16.mxu1 %vm8953_vm0, %v8952_v1 }
 0xb4f   :  { %8358 = vmatprep.subr.bf16.mxu1 %v8952_v1 }
 0xb55   :  { %8349 = vmatmul.mubr.msk.bf16.vlgmr.msra.gmra.mxu1 %vm798_vm1, %v4277_v48 }
 0xb56   :  { %8359 = vmatpush3.bf16.msra.mxu1 %v4572_v9  ;;  %8360 = vmatprep.mubr.msk.bf16.mxu1 %vm8953_vm0, %v8952_v1 }
 0xb57   :  { %8370 = vmatprep.subr.bf16.mxu1 %v8952_v1 }
 0xb9a   :  { %v4330_v49 = vpop.f32.mrf.mxu1 }
 0xb9b   :  { %v4474_v33 = vsel %vm983_vm3, %v4330_v49, -inf }
 0xb9c   :  { %4475 = vmax.xlane.f32.xlu1 %v4474_v33  ;;  %v8332_v50 = vpop.f32.mrf.mxu1 }
 0xb9e   :  { %v4333_v51 = vpop.f32.mrf.mxu1 }
 0xba0   :  { %v8333_v52 = vpop.f32.mrf.mxu1 }
 0xba2   :  { %v4376_v53 = vpop.f32.mrf.mxu1 }
 0xba3   :  { %v4477_v54 = vsel %vm983_vm3, %v4376_v53, -inf }
 0xba4   :  { %4478 = vmax.xlane.f32.xlu0 %v4477_v54  ;;  %v8338_v56 = vpop.f32.mrf.mxu1 }
 0xba6   :  { %v4379_v58 = vpop.f32.mrf.mxu1 }
 0xba8   :  { %v8339_v59 = vpop.f32.mrf.mxu1 }
 0xba9   :  { %v8641_v59 = vld [vmem:[#allocation4 + $0x78] sm:$0xff]  }
 0xc0d   :  { %v4422_v60 = vpop.f32.mrf.mxu1 }
 0xc0e   :  { %v4480_v61 = vsel %vm983_vm3, %v4422_v60, -inf }
 0xc0f   :  { %4481 = vmax.xlane.f32.xlu0 %v4480_v61  ;;  %v8344_v63 = vpop.f32.mrf.mxu1  ;;  %v8642_v61 = vld [vmem:[#allocation4 + $0x70] sm:$0xff]  }
 0xc11   :  { %v4425_v62 = vpop.f32.mrf.mxu1 }
 0xc13   :  { %v8345_v2 = vpop.f32.mrf.mxu1 }
 0xc14   :  { %v8643_v2 = vld [vmem:[#allocation4 + $0x68] sm:$0xff]  }
 0xc15   :  { %v4468_v3 = vpop.f32.mrf.mxu1 }
 0xc16   :  { %v4483_v4 = vsel %vm983_vm3, %v4468_v3, -inf }
 0xc17   :  { %4484 = vmax.xlane.f32.xlu1 %v4483_v4  ;;  %v8350_v5 = vpop.f32.mrf.mxu1 }
 0xc18   :  { %v8644_v5 = vld [vmem:[#allocation4 + $0x60] sm:$0xff]  }
 0xc19   :  { %v4471_v7 = vpop.f32.mrf.mxu1 }
 0xc1b   :  { %v8351_v8 = vpop.f32.mrf.mxu1 }
 0xc25   :  { %v4476_v27 = vpop.xlane.xlu1 %4475 }
 0xc26   :  { %v4486_v10 = vsub.f32 %v4330_v49, %v4476_v27  ;;  %v8645_v27 = vld [vmem:[#allocation4 + $0x58] sm:$0xff]  }
 0xc28   :  { %v4490_v11 = vmul.f32 1.442695, %v4486_v10  ;;  %v8646_v10 = vld [vmem:[#allocation4 + $0x50] sm:$0xff]  }
 0xc2a   :  { %8809 = vpow2.f32 %v4490_v11  ;;  %v8647_v11 = vld [vmem:[#allocation4 + $0x48] sm:$0xff]  }
 0xc2d   :  { %v4479_v44 = vpop.xlane.xlu0 %4478 }
 0xc2e   :  { %v4487_v12 = vsub.f32 %v4376_v53, %v4479_v44  ;;  %v8648_v44 = vld [vmem:[#allocation4 + $0x40] sm:$0xff]  }
 0xc30   :  { %v4492_v13 = vmul.f32 1.442695, %v4487_v12 }
 0xc32   :  { %8811 = vpow2.f32 %v4492_v13 }
 0xc37   :  { %v8810_v14 = vpop.eup %8809 }
 0xc38   :  { %v4498_v15 = vsel %vm983_vm3, %v8810_v14, 0.0 }
 0xc39   :  { %4499 = vadd.xlane.f32.xlu0 %v4498_v15 }
 0xc3f   :  { %v8812_v16 = vpop.eup %8811 }
 0xc40   :  { %v4501_v18 = vsel %vm983_vm3, %v8812_v16, 0.0 }
 0xc41   :  { %4502 = vadd.xlane.f32.xlu1 %v4501_v18 }
 0xc98   :  { %v4482_v42 = vpop.xlane.xlu0 %4481 }
 0xc99   :  { %v4488_v19 = vsub.f32 %v4422_v60, %v4482_v42 }
 0xc9b   :  { %v4494_v43 = vmul.f32 1.442695, %v4488_v19 }
 0xc9d   :  { %8813 = vpow2.f32 %v4494_v43 }
 0xca0   :  { %v4485_v20 = vpop.xlane.xlu1 %4484 }
 0xca1   :  { %v4489_v21 = vsub.f32 %v4468_v3, %v4485_v20 }
 0xca3   :  { %v4496_v22 = vmul.f32 1.442695, %v4489_v21 }
 0xca5   :  { %8815 = vpow2.f32 %v4496_v22 }
 0xcaa   :  { %v8814_v23 = vpop.eup %8813 }
 0xcab   :  { %v4504_v24 = vsel %vm983_vm3, %v8814_v23, 0.0 }
 0xcac   :  { %4505 = vadd.xlane.f32.xlu0 %v4504_v24 }
 0xcb2   :  { %v8816_v25 = vpop.eup %8815 }
 0xcb3   :  { %v4507_v28 = vsel %vm983_vm3, %v8816_v25, 0.0 }
 0xcb4   :  { %4508 = vadd.xlane.f32.xlu1 %v4507_v28  ;;  %v3587_v28 = vld [vmem:[#allocation9 + $0x101] ss:$0 sm:$0xff] }
 0xcc2   :  { %4286 = vrot.lane.b32.xlu0 %v9246_v17, %s8940_s24  ;;  %v4500_v29 = vpop.xlane.xlu0 %4499 }
 0xcc3   :  { %8817 = vrcp.f32 %v4500_v29 }
 0xcc5   :  { %4288 = vrot.lane.b32.xlu1 %v4271_v47, %s8940_s24 }
 0xcca   :  { %v4503_v30 = vpop.xlane.xlu1 %4502 }
 0xccb   :  { %8819 = vrcp.f32 %v4503_v30 }
 0xcd0   :  { %v8818_v31 = vpop.eup %8817 }
 0xcd1   :  { %v4514_v41 = vmul.f32 %v8818_v31, %v8810_v14 }
 0xcd3   :  { %v4518_v55 = vpack.c.bf16 %v4514_v41, %v4514_v41 }
 0xcd5   :  { %8355 = vmatmul.mubr.msk.bf16.vlgmr.msra.gmra.mxu0 %vm983_vm3, %v4518_v55 }
 0xcd6   :  { %8366 = vmatprep.mubr.msk.bf16.mxu0 %vm8953_vm0, %v8952_v1 }
 0xcd8   :  { %v8820_v6 = vpop.eup %8819 }
 0xcd9   :  { %v4515_v45 = vmul.f32 %v8820_v6, %v8812_v16 }
 0xcdb   :  { %v4519_v46 = vpack.c.bf16 %v4515_v45, %v4515_v45 }
 0xcdd   :  { %8361 = vmatmul.mubr.msk.bf16.vlgmr.msra.gmra.mxu1 %vm983_vm3, %v4519_v46 }
 0xcde   :  { %8372 = vmatprep.mubr.msk.bf16.mxu1 %vm8953_vm0, %v8952_v1 }
 0xd35   :  { %v4506_v17 = vpop.xlane.xlu0 %4505 }
 0xd36   :  { %8821 = vrcp.f32 %v4506_v17  ;;  %v3764_v17 = vld [vmem:[#allocation6 + $0x780] sm:$0xff] }
 0xd39   :  { %v4287_v47 = vpop.permute.xlu0 %4286 }
 0xd3a   :  { %v4618_v48 = vsel %vm1035_vm2, %v4287_v47, 0  ;;  %v3772_v47 = vld [vmem:[#allocation6 + $0x7c0] sm:$0xff] }
 0xd3b   :  { %8365 = vmatpush3.bf16.msra.mxu0 %v4618_v48  ;;  %v3765_v48 = vld [vmem:[#allocation6 + $0x788] sm:$0xff] }
 0xd3c   :  { %8376 = vmatprep.subr.bf16.mxu0 %v8952_v1 }
 0xd3d   :  { %v4509_v9 = vpop.xlane.xlu1 %4508 }
 0xd3e   :  { %8823 = vrcp.f32 %v4509_v9  ;;  %v7639_v9 = vcombine.low %v3764_v17, %v3772_v47 }
 0xd41   :  { %v4289_v49 = vpop.permute.xlu1 %4288 }
 0xd42   :  { %v4664_v33 = vsel %vm1035_vm2, %v4289_v49, 0  ;;  %v7640_v49 = vcombine.high %v3764_v17, %v3772_v47 }
 0xd43   :  { %v8822_v50 = vpop.eup %8821  ;;  %8371 = vmatpush3.bf16.msra.mxu1 %v4664_v33  ;;  %v3773_v33 = vld [vmem:[#allocation6 + $0x7c8] sm:$0xff] }
 0xd44   :  { %v4516_v51 = vmul.f32 %v8822_v50, %v8814_v23  ;;  %v7641_v50 = vcombine.low %v3765_v48, %v3773_v33  ;;  %5557 = vmatprep.subr.bf16.mxu1 %v7640_v49  ;;  %v3669_v49 = vld [vmem:[#allocation6 + $0x488] sm:$0xff] }
 0xd46   :  { %v4520_v52 = vpack.c.bf16 %v4516_v51, %v4516_v51  ;;  %v7642_v51 = vcombine.high %v3765_v48, %v3773_v33  ;;  %v3668_v48 = vld [vmem:[#allocation6 + $0x480] sm:$0xff] }
 0xd48   :  { %8367 = vmatmul.mubr.msk.bf16.vlgmr.msra.gmra.mxu0 %vm983_vm3, %v4520_v52 }
 0xd49   :  { %8392 = vmatprep.mubr.msk.bf16.mxu0 %vm8953_vm0, %v8952_v1  ;;  %8377 = vmatpush3.bf16.msra.mxu0 %v8641_v59 }
 0xd4a   :  { %8378 = vmatprep.subr.bf16.mxu0 %v8952_v1 }
 0xd4b   :  { %v8824_v53 = vpop.eup %8823 }
 0xd4c   :  { %v4517_v54 = vmul.f32 %v8824_v53, %v8816_v25 }
 0xd4d   :  { %8379 = vmatpush3.bf16.msra.mxu0 %v8642_v61  ;;  %v3756_v61 = vld [vmem:[#allocation6 + $0x740] sm:$0xff] }
 0xd4e   :  { %v4521_v56 = vpack.c.bf16 %v4517_v54, %v4517_v54  ;;  %8380 = vmatprep.subr.bf16.mxu0 %v8952_v1 }
 0xd50   :  { %8373 = vmatmul.mubr.msk.bf16.vlgmr.msra.gmra.mxu1 %vm983_vm3, %v4521_v56 }
 0xd51   :  { %5589 = vmatprep.mubr.bf16.mxu1 %v8951_v0  ;;  %8381 = vmatpush3.bf16.msra.mxu0 %v8643_v2  ;;  %v3757_v2 = vld [vmem:[#allocation6 + $0x748] sm:$0xff] }
 0xd52   :  { %8382 = vmatprep.subr.bf16.mxu0 %v8952_v1  ;;  %5558 = vmatpush1.bf16.msra.mxu1 %v7639_v9  ;;  %v3676_v9 = vld [vmem:[#allocation6 + $0x4c0] sm:$0xff] }
 0xd53   :  { %v7544_v33 = vcombine.high %v3668_v48, %v3676_v9 }
 0xd55   :  { %8383 = vmatpush3.bf16.msra.mxu0 %v8644_v5 }
 0xd56   :  { %8384 = vmatprep.subr.bf16.mxu0 %v8952_v1 }
 0xd59   :  { %8385 = vmatpush3.bf16.msra.mxu0 %v8645_v27  ;;  %v3733_v27 = vld [vmem:[#allocation6 + $0x688] sm:$0xff] }
 0xd5a   :  { %8386 = vmatprep.subr.bf16.mxu0 %v8952_v1 }
 0xd5d   :  { %8387 = vmatpush3.bf16.msra.mxu0 %v8646_v10 }
 0xd5e   :  { %8388 = vmatprep.subr.bf16.mxu0 %v8952_v1 }
 0xd61   :  { %8389 = vmatpush3.bf16.msra.mxu0 %v8647_v11  ;;  %v3741_v11 = vld [vmem:[#allocation6 + $0x6c8] sm:$0xff] }
 0xd62   :  { %8390 = vmatprep.subr.bf16.mxu0 %v8952_v1 }
 0xd65   :  { %8391 = vmatpush3.bf16.msra.mxu0 %v8648_v44 }
 0xd66   :  { %5600 = vmatprep.subr.bf16.mxu0 %v7642_v51  ;;  %v7543_v51 = vcombine.low %v3668_v48, %v3676_v9  ;;  %v3718_v9 = vld [vmem:[#allocation6 + $0x610] sm:$0xff] }
 0xd95   :  { %v4562_v58 = vpop.f32.mrf.mxu0 }
 0xd97   :  { %v8356_v60 = vpop.f32.mrf.mxu0 }
 0xd98   :  { %v3748_v60 = vld [vmem:[#allocation6 + $0x700] sm:$0xff] }
 0xd99   :  { %v4565_v63 = vpop.f32.mrf.mxu0 }
 0xd9a   :  { %v3749_v63 = vld [vmem:[#allocation6 + $0x708] sm:$0xff] }
 0xd9b   :  { %v8357_v62 = vpop.f32.mrf.mxu0  ;;  %v7626_v5 = vcombine.high %v3749_v63, %v3757_v2 }
 0xd9c   :  { %v7624_v62 = vcombine.high %v3748_v60, %v3756_v61 }
 0xd9d   :  { %v4608_v3 = vpop.f32.mrf.mxu1 }
 0xd9e   :  { %5559 = vmatprep.subr.bf16.mxu1 %v7624_v62 }
 0xd9f   :  { %v8362_v4 = vpop.f32.mrf.mxu1 }
 0xda0   :  { %v7625_v4 = vcombine.low %v3749_v63, %v3757_v2  ;;  %v3766_v2 = vld [vmem:[#allocation6 + $0x790] sm:$0xff] }
 0xda1   :  { %v4611_v7 = vpop.f32.mrf.mxu1 }
 0xda2   :  { %v3732_v7 = vld [vmem:[#allocation6 + $0x680] sm:$0xff] }
 0xda3   :  { %v8363_v8 = vpop.f32.mrf.mxu1 }
 0xda4   :  { %v3740_v8 = vld [vmem:[#allocation6 + $0x6c0] sm:$0xff] }
 0xda5   :  { %v7608_v10 = vcombine.high %v3732_v7, %v3740_v8  ;;  %v7607_v44 = vcombine.low %v3732_v7, %v3740_v8  ;;  %v3775_v7 = vld [vmem:[#allocation6 + $0x7d8] sm:$0xff] }
 0xe08   :  { %v4654_v12 = vpop.f32.mrf.mxu0 }
 0xe0a   :  { %v8368_v13 = vpop.f32.mrf.mxu0 }
 0xe0b   :  { %v7610_v13 = vcombine.high %v3733_v27, %v3741_v11 }
 0xe0c   :  { %v4657_v14 = vpop.f32.mrf.mxu0 }
 0xe0d   :  { %v3716_v14 = vld [vmem:[#allocation6 + $0x600] sm:$0xff] }
 0xe0e   :  { %v8369_v15 = vpop.f32.mrf.mxu0 }
 0xe0f   :  { %v3724_v15 = vld [vmem:[#allocation6 + $0x640] sm:$0xff] }
 0xe10   :  { %v4700_v16 = vpop.f32.mrf.mxu1 }
 0xe11   :  { %v8436_v18 = vpack.i.bf16 %v4700_v16, %v4654_v12  ;;  %v7609_v12 = vcombine.low %v3733_v27, %v3741_v11  ;;  %v3717_v16 = vld [vmem:[#allocation6 + $0x608] sm:$0xff] }
 0xe12   :  { %v8374_v42 = vpop.f32.mrf.mxu1 }
 0xe13   :  { %8437 = vrot.lane.b32.xlu1 %v8436_v18, %s8940_s24  ;;  %v7592_v18 = vcombine.high %v3716_v14, %v3724_v15  ;;  %v3725_v42 = vld [vmem:[#allocation6 + $0x648] sm:$0xff] }
 0xe14   :  { %v4703_v19 = vpop.f32.mrf.mxu1 }
 0xe15   :  { %v7591_v19 = vcombine.low %v3716_v14, %v3724_v15 }
 0xe16   :  { %v8375_v43 = vpop.f32.mrf.mxu1 }
 0xe17   :  { %v7593_v43 = vcombine.low %v3717_v16, %v3725_v42 }
 0xe85   :  { %v8438_v20 = vpop.permute.xlu1 %8437 }
 0xe86   :  { %v8440_v21 = vunpack.i.h.bf16 %v8438_v20  ;;  %v8439_v22 = vunpack.i.l.bf16 %v8438_v20  ;;  %v7594_v20 = vcombine.high %v3717_v16, %v3725_v42  ;;  %v3597_v42 = vld [vmem:[#allocation9 + $0x104] ss:$0 sm:$0xff] }
 0xe88   :  { %v4715_v23 = vsel %vm798_vm1, %v4608_v3, %v8440_v21  ;;  %v4714_v24 = vsel %vm798_vm1, %v4562_v58, %v8439_v22  ;;  %v7623_v3 = vcombine.low %v3748_v60, %v3756_v61  ;;  %v3700_v21 = vld [vmem:[#allocation6 + $0x580] sm:$0xff]  ;;  %v3661_v60 = vld [vmem:[#allocation6 + $0x448] sm:$0xff] }
 0xe89   :  { %v4716_v25 = vpack.c.bf16 %v4715_v23, %v4714_v24  ;;  %v3708_v22 = vld [vmem:[#allocation6 + $0x5c0] sm:$0xff]  ;;  %v3701_v23 = vld [vmem:[#allocation6 + $0x588] sm:$0xff] }
 0xe8a   :  { %5560 = vmatpush1.bf16.msra.mxu1 %v7623_v3  ;;  %v7576_v24 = vcombine.high %v3700_v21, %v3708_v22  ;;  %v3774_v3 = vld [vmem:[#allocation6 + $0x7d0] sm:$0xff] }
 0xe8b   :  { %8393 = vmatmul.mubr.bf16.vlgmr.msra.gmra.mxu0 %v4716_v25  ;;  %5561 = vmatprep.subr.bf16.mxu1 %v7608_v10  ;;  %v3709_v25 = vld [vmem:[#allocation6 + $0x5c8] sm:$0xff]  ;;  %v7643_v8 = vcombine.low %v3766_v2, %v3774_v3 }
 0xe8c   :  { %5632 = vmatprep.mubr.bf16.mxu0 %v8951_v0  ;;  %5601 = vmatpush1.bf16.msra.mxu0 %v7641_v50  ;;  %v3677_v50 = vld [vmem:[#allocation6 + $0x4c8] sm:$0xff] }
 0xe8d   :  { %5602 = vmatprep.subr.bf16.mxu0 %v7626_v5  ;;  %v7644_v5 = vcombine.high %v3766_v2, %v3774_v3  ;;  %v3686_v3 = vld [vmem:[#allocation6 + $0x510] sm:$0xff] }
 0xe8e   :  { %5562 = vmatpush1.bf16.msra.mxu1 %v7607_v44 }
 0xe8f   :  { %5563 = vmatprep.subr.bf16.mxu1 %v7592_v18 }
 0xe90   :  { %5603 = vmatpush1.bf16.msra.mxu0 %v7625_v4  ;;  %v3767_v4 = vld [vmem:[#allocation6 + $0x798] sm:$0xff] }
 0xe91   :  { %5604 = vmatprep.subr.bf16.mxu0 %v7610_v13  ;;  %v7645_v27 = vcombine.low %v3767_v4, %v3775_v7  ;;  %v7646_v10 = vcombine.high %v3767_v4, %v3775_v7  ;;  %v3694_v4 = vld [vmem:[#allocation6 + $0x550] sm:$0xff]  ;;  %v3695_v7 = vld [vmem:[#allocation6 + $0x558] sm:$0xff] }
 0xe92   :  { %5564 = vmatpush1.bf16.msra.mxu1 %v7591_v19 }
 0xe93   :  { %5565 = vmatprep.subr.bf16.mxu1 %v7576_v24  ;;  %v3758_v24 = vld [vmem:[#allocation6 + $0x750] sm:$0xff] }
 0xe94   :  { %5605 = vmatpush1.bf16.msra.mxu0 %v7609_v12 }
 0xe95   :  { %5606 = vmatprep.subr.bf16.mxu0 %v7594_v20 }
 0xe98   :  { %5607 = vmatpush1.bf16.msra.mxu0 %v7593_v43 }
 0xf4b   :  { %v4799_v29 = vpop.f32.mrf.mxu0 }
 0xf4c   :  { %v4800_v30 = vadd.f32 %v4799_v29, %v3587_v28  ;;  %v7577_v29 = vcombine.low %v3701_v23, %v3709_v25 }
 0xf4d   :  { %v8394_v31 = vpop.f32.mrf.mxu0 }
 0xf4e   :  { %v4806_v41 = vadd.f32 %v4800_v30, %v9233_v38  ;;  %v7578_v30 = vcombine.high %v3701_v23, %v3709_v25  ;;  %v3684_v31 = vld [vmem:[#allocation6 + $0x500] sm:$0xff]  ;;  %v3750_v23 = vld [vmem:[#allocation6 + $0x710] sm:$0xff]  ;;  %v3751_v25 = vld [vmem:[#allocation6 + $0x718] sm:$0xff] }
 0xf4f   :  { %v4802_v55 = vpop.f32.mrf.mxu0 }
 0xf50   :  { %v4803_v6 = vadd.f32 %v4802_v55, %v3587_v28  ;;  %4808 = vadd.xlane.f32.xlu0 %v4806_v41  ;;  %v7575_v28 = vcombine.low %v3700_v21, %v3708_v22  ;;  %5608 = vmatprep.subr.bf16.mxu0 %v7578_v30  ;;  %v3685_v55 = vld [vmem:[#allocation6 + $0x508] sm:$0xff]  ;;  %v3598_v21 = vld [vmem:[#allocation9 + $0x105] ss:$0 sm:$0xff] }
 0xf51   :  { %v8395_v45 = vpop.f32.mrf.mxu0  ;;  %5609 = vmatpush1.bf16.msra.mxu0 %v7577_v29 }
 0xf52   :  { %v4807_v46 = vadd.f32 %v4803_v6, %v9235_v26  ;;  %5566 = vmatpush1.bf16.msra.mxu1 %v7575_v28  ;;  %v3693_v45 = vld [vmem:[#allocation6 + $0x548] sm:$0xff]  ;;  %v3759_v28 = vld [vmem:[#allocation6 + $0x758] sm:$0xff] }
 0xf53   :  { %v7561_v17 = vcombine.low %v3685_v55, %v3693_v45  ;;  %v7562_v47 = vcombine.high %v3685_v55, %v3693_v45  ;;  %v3734_v55 = vld [vmem:[#allocation6 + $0x690] sm:$0xff]  ;;  %v3735_v45 = vld [vmem:[#allocation6 + $0x698] sm:$0xff] }
 0xf54   :  { %4810 = vadd.xlane.f32.xlu1 %v4807_v46 }
 0xf55   :  { %5610 = vmatprep.subr.bf16.mxu0 %v7562_v47 }
 0xf56   :  { %5611 = vmatpush1.bf16.msra.mxu0 %v7561_v17  ;;  %v7629_v17 = vcombine.low %v3751_v25, %v3759_v28 }
 0xfd9   :  { %v4809_v38 = vpop.xlane.xlu0 %4808 }
 0xfda   :  { %v4812_v52 = vmul.f32 0.0078125, %v4809_v38  ;;  %v7545_v38 = vcombine.low %v3669_v49, %v3677_v50 }
 0xfdc   :  { %v9315_v53 = vsub.f32 %v4806_v41, %v4812_v52  ;;  %v3692_v41 = vld [vmem:[#allocation6 + $0x540] sm:$0xff]  ;;  %v7546_v52 = vcombine.high %v3669_v49, %v3677_v50  ;;  %v3726_v49 = vld [vmem:[#allocation6 + $0x650] sm:$0xff]  ;;  %v3727_v50 = vld [vmem:[#allocation6 + $0x658] sm:$0xff] }
 0xfdd   :  { %v4811_v54 = vpop.xlane.xlu1 %4810  ;;  %v7560_v6 = vcombine.high %v3684_v31, %v3692_v41 }
 0xfde   :  { %v4813_v56 = vmul.f32 0.0078125, %v4811_v54  ;;  %v4816_v26 = vmul.f32 %v9315_v53, %v9315_v53  ;;  %5612 = vmatprep.subr.bf16.mxu0 %v7546_v52  ;;  %v3652_v54 = vld [vmem:[#allocation6 + $0x400] sm:$0xff]  ;;  %v7596_v52 = vcombine.high %v3718_v9, %v3726_v49 }
 0xfdf   :  { %5567 = vmatprep.subr.bf16.mxu1 %v7560_v6  ;;  %5613 = vmatpush1.bf16.msra.mxu0 %v7545_v38  ;;  %v3742_v6 = vld [vmem:[#allocation6 + $0x6d0] sm:$0xff] }
 0xfe0   :  { %v9319_v58 = vsub.f32 %v4807_v46, %v4813_v56  ;;  %4818 = vadd.xlane.f32.xlu0 %v4816_v26  ;;  %v7559_v46 = vcombine.low %v3684_v31, %v3692_v41  ;;  %v3660_v56 = vld [vmem:[#allocation6 + $0x440] sm:$0xff]  ;;  %v3653_v26 = vld [vmem:[#allocation6 + $0x408] sm:$0xff]  ;;  %v7630_v41 = vcombine.high %v3751_v25, %v3759_v28  ;;  %v7612_v47 = vcombine.high %v3734_v55, %v3742_v6 }
 0xfe1   :  { %v7527_v61 = vcombine.low %v3652_v54, %v3660_v56  ;;  %v7529_v63 = vcombine.low %v3653_v26, %v3661_v60  ;;  %v7530_v62 = vcombine.high %v3653_v26, %v3661_v60  ;;  %v3710_v26 = vld [vmem:[#allocation6 + $0x5d0] sm:$0xff]  ;;  %v3711_v60 = vld [vmem:[#allocation6 + $0x5d8] sm:$0xff]  ;;  %v3768_v28 = vld [vmem:[#allocation6 + $0x7a0] sm:$0xff] }
 0xfe2   :  { %v4817_v59 = vmul.f32 %v9319_v58, %v9319_v58  ;;  %5568 = vmatpush1.bf16.msra.mxu1 %v7559_v46  ;;  %v7627_v46 = vcombine.low %v3750_v23, %v3758_v24 }
 0xfe3   :  { %5569 = vmatprep.subr.bf16.mxu1 %v7544_v33  ;;  %5614 = vmatprep.subr.bf16.mxu0 %v7530_v62  ;;  %v3719_v33 = vld [vmem:[#allocation6 + $0x618] sm:$0xff] }
 0xfe4   :  { %4820 = vadd.xlane.f32.xlu0 %v4817_v59  ;;  %v7528_v59 = vcombine.high %v3652_v54, %v3660_v56  ;;  %5615 = vmatpush1.bf16.msra.mxu0 %v7529_v63  ;;  %v7598_v54 = vcombine.high %v3719_v33, %v3727_v50  ;;  %v3702_v56 = vld [vmem:[#allocation6 + $0x590] sm:$0xff]  ;;  %v7597_v63 = vcombine.low %v3719_v33, %v3727_v50 }
 0xfe5   :  { %5686 = vmatprep.subr.bf16.mxu0 %v7646_v10  ;;  %v7580_v62 = vcombine.high %v3702_v56, %v3710_v26  ;;  %v7564_v10 = vcombine.high %v3686_v3, %v3694_v4 }
 0xfe6   :  { %5570 = vmatpush1.bf16.msra.mxu1 %v7543_v51  ;;  %v7611_v51 = vcombine.low %v3734_v55, %v3742_v6  ;;  %v3777_v55 = vld [vmem:[#allocation6 + $0x7e8] sm:$0xff] }
 0xfe7   :  { %5571 = vmatprep.subr.bf16.mxu1 %v7528_v59  ;;  %v3703_v59 = vld [vmem:[#allocation6 + $0x598] sm:$0xff] }
 0xfe8   :  { %v7582_v2 = vcombine.high %v3703_v59, %v3711_v60 }
 0xfea   :  { %5572 = vmatpush1.bf16.msra.mxu1 %v7527_v61  ;;  %v7595_v61 = vcombine.low %v3718_v9, %v3726_v49  ;;  %v3761_v9 = vld [vmem:[#allocation6 + $0x768] sm:$0xff] }
 0xfeb   :  { %5643 = vmatprep.subr.bf16.mxu1 %v7644_v5  ;;  %v3687_v5 = vld [vmem:[#allocation6 + $0x518] sm:$0xff] }
0x1069   :  { %v4819_v11 = vpop.xlane.xlu0 %4818 }
0x106a   :  { %v4822_v44 = vmul.f32 0.0078125, %v4819_v11  ;;  %v7566_v11 = vcombine.high %v3687_v5, %v3695_v7 }
0x106c   :  { %v4824_v12 = vadd.f32 1e-05, %v4822_v44  ;;  %v3670_v44 = vld [vmem:[#allocation6 + $0x490] sm:$0xff] }
0x106d   :  { %v4821_v13 = vpop.xlane.xlu0 %4820 }
0x106e   :  { %8825 = vrsqrt.f32 %v4824_v12  ;;  %v4823_v14 = vmul.f32 0.0078125, %v4821_v13  ;;  %v3678_v12 = vld [vmem:[#allocation6 + $0x4d0] sm:$0xff]  ;;  %v3671_v13 = vld [vmem:[#allocation6 + $0x498] sm:$0xff] }
0x1070   :  { %v4825_v15 = vadd.f32 1e-05, %v4823_v14  ;;  %v3679_v14 = vld [vmem:[#allocation6 + $0x4d8] sm:$0xff] }
0x1072   :  { %8827 = vrsqrt.f32 %v4825_v15  ;;  %v7563_v15 = vcombine.low %v3686_v3, %v3694_v4  ;;  %v3729_v3 = vld [vmem:[#allocation6 + $0x668] sm:$0xff] }
0x107b   :  { %v8826_v16 = vpop.eup %8825 }
0x107c   :  { %v4828_v18 = vmul.f32 %v8826_v16, %v9315_v53  ;;  %v7628_v53 = vcombine.high %v3750_v23, %v3758_v24  ;;  %v7565_v16 = vcombine.low %v3687_v5, %v3695_v7  ;;  %v7549_v23 = vcombine.low %v3671_v13, %v3679_v14 }
0x107e   :  { %v4830_v43 = vmul.f32 %v4828_v18, %v3597_v42  ;;  %v7548_v18 = vcombine.high %v3670_v44, %v3678_v12 }
0x107f   :  { %v8828_v19 = vpop.eup %8827 }
0x1080   :  { %v4829_v20 = vmul.f32 %v8828_v19, %v9319_v58  ;;  %v9325_v29 = vadd.f32 %v4830_v43, %v3598_v21  ;;  %v3743_v58 = vld [vmem:[#allocation6 + $0x6d8] sm:$0xff]  ;;  %v3654_v19 = vld [vmem:[#allocation6 + $0x410] sm:$0xff] }
0x1081   :  { %v7614_v48 = vcombine.high %v3735_v45, %v3743_v58  ;;  %v7613_v38 = vcombine.low %v3735_v45, %v3743_v58  ;;  %v3662_v43 = vld [vmem:[#allocation6 + $0x450] sm:$0xff] }
0x1082   :  { %v4831_v22 = vmul.f32 %v4829_v20, %v3597_v42  ;;  %v7550_v42 = vcombine.high %v3671_v13, %v3679_v14  ;;  %v3655_v20 = vld [vmem:[#allocation6 + $0x418] sm:$0xff]  ;;  %v7532_v24 = vcombine.high %v3654_v19, %v3662_v43  ;;  %v7531_v6 = vcombine.low %v3654_v19, %v3662_v43  ;;  %v3697_v19 = vld [vmem:[#allocation6 + $0x568] sm:$0xff] }
0x1084   :  { %v9327_v30 = vadd.f32 %v4831_v22, %v3598_v21  ;;  %v3663_v21 = vld [vmem:[#allocation6 + $0x458] sm:$0xff]  ;;  %v7547_v22 = vcombine.low %v3670_v44, %v3678_v12  ;;  %v3713_v44 = vld [vmem:[#allocation6 + $0x5e8] sm:$0xff] }
0x1085   :  { %v7534_v25 = vcombine.high %v3655_v20, %v3663_v21  ;;  %v7533_v45 = vcombine.low %v3655_v20, %v3663_v21 }
0x1086   :  { %v9331_v31 = vpack.c.bf16 %v9327_v30, %v9325_v29 }
0x1088   :  { %5590 = vmatmul.mubr.bf16.vlgmr.msra.gmra.mxu1 %v9331_v31  ;;  %5633 = vmatmul.mubr.bf16.vlgmr.msra.gmra.mxu0 %v9331_v31 }
0x1089   :  { %5644 = vmatpush1.bf16.msra.mxu1 %v7643_v8  ;;  %5687 = vmatpush1.bf16.msra.mxu0 %v7645_v27  ;;  %v7579_v8 = vcombine.low %v3702_v56, %v3710_v26  ;;  %v7581_v27 = vcombine.low %v3703_v59, %v3711_v60  ;;  %v3745_v56 = vld [vmem:[#allocation6 + $0x6e8] sm:$0xff] }
0x108a   :  { %5645 = vmatprep.subr.bf16.mxu1 %v7628_v53  ;;  %5688 = vmatprep.subr.bf16.mxu0 %v7630_v41  ;;  %v3776_v53 = vld [vmem:[#allocation6 + $0x7e0] sm:$0xff]  ;;  %v3769_v41 = vld [vmem:[#allocation6 + $0x7a8] sm:$0xff] }
0x108b   :  { %5675 = vmatprep.mubr.bf16.mxu1 %v8951_v0  ;;  %5718 = vmatprep.mubr.bf16.mxu0 %v8951_v0  ;;  %v7648_v58 = vcombine.high %v3768_v28, %v3776_v53  ;;  %v7647_v49 = vcombine.low %v3768_v28, %v3776_v53  ;;  %v7649_v33 = vcombine.low %v3769_v41, %v3777_v55  ;;  %v3681_v28 = vld [vmem:[#allocation6 + $0x4e8] sm:$0xff] }
0x108d   :  { %5646 = vmatpush1.bf16.msra.mxu1 %v7627_v46  ;;  %5689 = vmatpush1.bf16.msra.mxu0 %v7629_v17  ;;  %v7650_v46 = vcombine.high %v3769_v41, %v3777_v55  ;;  %v3752_v17 = vld [vmem:[#allocation6 + $0x720] sm:$0xff] }
0x108e   :  { %5647 = vmatprep.subr.bf16.mxu1 %v7612_v47  ;;  %5690 = vmatprep.subr.bf16.mxu0 %v7614_v48  ;;  %v3760_v47 = vld [vmem:[#allocation6 + $0x760] sm:$0xff]  ;;  %v3753_v48 = vld [vmem:[#allocation6 + $0x728] sm:$0xff] }
0x108f   :  { %v7632_v50 = vcombine.high %v3752_v17, %v3760_v47  ;;  %v7631_v26 = vcombine.low %v3752_v17, %v3760_v47  ;;  %v7633_v59 = vcombine.low %v3753_v48, %v3761_v9  ;;  %v3665_v17 = vld [vmem:[#allocation6 + $0x468] sm:$0xff] }
0x1091   :  { %5648 = vmatpush1.bf16.msra.mxu1 %v7611_v51  ;;  %5691 = vmatpush1.bf16.msra.mxu0 %v7613_v38  ;;  %v7634_v51 = vcombine.high %v3753_v48, %v3761_v9  ;;  %v3736_v38 = vld [vmem:[#allocation6 + $0x6a0] sm:$0xff] }
0x1092   :  { %5649 = vmatprep.subr.bf16.mxu1 %v7596_v52  ;;  %5692 = vmatprep.subr.bf16.mxu0 %v7598_v54  ;;  %v3744_v52 = vld [vmem:[#allocation6 + $0x6e0] sm:$0xff]  ;;  %v3737_v54 = vld [vmem:[#allocation6 + $0x6a8] sm:$0xff] }
0x1093   :  { %v7616_v60 = vcombine.high %v3736_v38, %v3744_v52  ;;  %v7615_v4 = vcombine.low %v3736_v38, %v3744_v52  ;;  %v7617_v5 = vcombine.low %v3737_v54, %v3745_v56  ;;  %v3779_v38 = vld [vmem:[#allocation6 + $0x7f8] sm:$0xff] }
0x1095   :  { %5650 = vmatpush1.bf16.msra.mxu1 %v7595_v61  ;;  %5693 = vmatpush1.bf16.msra.mxu0 %v7597_v63  ;;  %v7618_v61 = vcombine.high %v3737_v54, %v3745_v56  ;;  %v3720_v63 = vld [vmem:[#allocation6 + $0x620] sm:$0xff] }
0x1096   :  { %5651 = vmatprep.subr.bf16.mxu1 %v7580_v62  ;;  %5694 = vmatprep.subr.bf16.mxu0 %v7582_v2  ;;  %v3728_v62 = vld [vmem:[#allocation6 + $0x660] sm:$0xff]  ;;  %v3721_v2 = vld [vmem:[#allocation6 + $0x628] sm:$0xff] }
0x1097   :  { %v7600_v7 = vcombine.high %v3720_v63, %v3728_v62  ;;  %v7599_v12 = vcombine.low %v3720_v63, %v3728_v62  ;;  %v7601_v13 = vcombine.low %v3721_v2, %v3729_v3  ;;  %v3763_v63 = vld [vmem:[#allocation6 + $0x778] sm:$0xff] }
0x1099   :  { %5652 = vmatpush1.bf16.msra.mxu1 %v7579_v8  ;;  %5695 = vmatpush1.bf16.msra.mxu0 %v7581_v27  ;;  %v7602_v8 = vcombine.high %v3721_v2, %v3729_v3  ;;  %v3704_v27 = vld [vmem:[#allocation6 + $0x5a0] sm:$0xff] }
0x109a   :  { %5653 = vmatprep.subr.bf16.mxu1 %v7564_v10  ;;  %5696 = vmatprep.subr.bf16.mxu0 %v7566_v11  ;;  %v3712_v10 = vld [vmem:[#allocation6 + $0x5e0] sm:$0xff]  ;;  %v3705_v11 = vld [vmem:[#allocation6 + $0x5a8] sm:$0xff] }
0x109b   :  { %v7584_v14 = vcombine.high %v3704_v27, %v3712_v10  ;;  %v7583_v43 = vcombine.low %v3704_v27, %v3712_v10  ;;  %v7585_v20 = vcombine.low %v3705_v11, %v3713_v44  ;;  %v3747_v27 = vld [vmem:[#allocation6 + $0x6f8] sm:$0xff] }
0x109d   :  { %5654 = vmatpush1.bf16.msra.mxu1 %v7563_v15  ;;  %5697 = vmatpush1.bf16.msra.mxu0 %v7565_v16  ;;  %v7586_v15 = vcombine.high %v3705_v11, %v3713_v44  ;;  %v3688_v16 = vld [vmem:[#allocation6 + $0x520] sm:$0xff] }
0x109e   :  { %5655 = vmatprep.subr.bf16.mxu1 %v7548_v18  ;;  %5698 = vmatprep.subr.bf16.mxu0 %v7550_v42  ;;  %v3696_v18 = vld [vmem:[#allocation6 + $0x560] sm:$0xff]  ;;  %v3689_v42 = vld [vmem:[#allocation6 + $0x528] sm:$0xff] }
0x109f   :  { %v7568_v21 = vcombine.high %v3688_v16, %v3696_v18  ;;  %v7567_v53 = vcombine.low %v3688_v16, %v3696_v18  ;;  %v7569_v41 = vcombine.low %v3689_v42, %v3697_v19  ;;  %v3731_v16 = vld [vmem:[#allocation6 + $0x678] sm:$0xff] }
0x10a1   :  { %5656 = vmatpush1.bf16.msra.mxu1 %v7547_v22  ;;  %5699 = vmatpush1.bf16.msra.mxu0 %v7549_v23  ;;  %v7570_v22 = vcombine.high %v3689_v42, %v3697_v19  ;;  %v3672_v23 = vld [vmem:[#allocation6 + $0x4a0] sm:$0xff] }
0x10a2   :  { %5657 = vmatprep.subr.bf16.mxu1 %v7532_v24  ;;  %5700 = vmatprep.subr.bf16.mxu0 %v7534_v25  ;;  %v3680_v24 = vld [vmem:[#allocation6 + $0x4e0] sm:$0xff]  ;;  %v3673_v25 = vld [vmem:[#allocation6 + $0x4a8] sm:$0xff] }
0x10a3   :  { %v7552_v55 = vcombine.high %v3672_v23, %v3680_v24  ;;  %v7551_v47 = vcombine.low %v3672_v23, %v3680_v24  ;;  %v7553_v48 = vcombine.low %v3673_v25, %v3681_v28  ;;  %v3715_v23 = vld [vmem:[#allocation6 + $0x5f8] sm:$0xff] }
0x10a5   :  { %5658 = vmatpush1.bf16.msra.mxu1 %v7531_v6  ;;  %5701 = vmatpush1.bf16.msra.mxu0 %v7533_v45  ;;  %v7554_v6 = vcombine.high %v3673_v25, %v3681_v28  ;;  %v3656_v45 = vld [vmem:[#allocation6 + $0x420] sm:$0xff] }
0x10a6   :  { %5729 = vmatprep.subr.bf16.mxu1 %v7648_v58  ;;  %5772 = vmatprep.subr.bf16.mxu0 %v7650_v46  ;;  %v3664_v58 = vld [vmem:[#allocation6 + $0x460] sm:$0xff]  ;;  %v3657_v46 = vld [vmem:[#allocation6 + $0x428] sm:$0xff] }
0x10a7   :  { %v7536_v9 = vcombine.high %v3656_v45, %v3664_v58  ;;  %v7535_v52 = vcombine.low %v3656_v45, %v3664_v58  ;;  %v7537_v54 = vcombine.low %v3657_v46, %v3665_v17 }
0x10a8   :  { %5676 = vmatmul.mubr.bf16.vlgmr.msra.gmra.mxu1 %v9331_v31  ;;  %5719 = vmatmul.mubr.bf16.vlgmr.msra.gmra.mxu0 %v9331_v31 }
0x10a9   :  { %5730 = vmatpush1.bf16.msra.mxu1 %v7647_v49  ;;  %5773 = vmatpush1.bf16.msra.mxu0 %v7649_v33  ;;  %v7538_v49 = vcombine.high %v3657_v46, %v3665_v17  ;;  %v3770_v33 = vld [vmem:[#allocation6 + $0x7b0] sm:$0xff] }
0x10aa   :  { %5731 = vmatprep.subr.bf16.mxu1 %v7632_v50  ;;  %5774 = vmatprep.subr.bf16.mxu0 %v7634_v51  ;;  %v3778_v50 = vld [vmem:[#allocation6 + $0x7f0] sm:$0xff]  ;;  %v3771_v51 = vld [vmem:[#allocation6 + $0x7b8] sm:$0xff] }
0x10ab   :  { %5761 = vmatprep.mubr.bf16.mxu1 %v8951_v0  ;;  %5804 = vmatprep.mubr.bf16.mxu0 %v8951_v0  ;;  %v7652_v56 = vcombine.high %v3770_v33, %v3778_v50  ;;  %v7651_v62 = vcombine.low %v3770_v33, %v3778_v50  ;;  %v7653_v2 = vcombine.low %v3771_v51, %v3779_v38 }
0x10ad   :  { %5732 = vmatpush1.bf16.msra.mxu1 %v7631_v26  ;;  %5775 = vmatpush1.bf16.msra.mxu0 %v7633_v59  ;;  %v7654_v26 = vcombine.high %v3771_v51, %v3779_v38  ;;  %v3754_v59 = vld [vmem:[#allocation6 + $0x730] sm:$0xff] }
0x10ae   :  { %5733 = vmatprep.subr.bf16.mxu1 %v7616_v60  ;;  %5776 = vmatprep.subr.bf16.mxu0 %v7618_v61  ;;  %v3762_v60 = vld [vmem:[#allocation6 + $0x770] sm:$0xff]  ;;  %v3755_v61 = vld [vmem:[#allocation6 + $0x738] sm:$0xff] }
0x10af   :  { %v7636_v3 = vcombine.high %v3754_v59, %v3762_v60  ;;  %v7635_v10 = vcombine.low %v3754_v59, %v3762_v60  ;;  %v7637_v11 = vcombine.low %v3755_v61, %v3763_v63 }
0x10b1   :  { %5734 = vmatpush1.bf16.msra.mxu1 %v7615_v4  ;;  %5777 = vmatpush1.bf16.msra.mxu0 %v7617_v5  ;;  %v7638_v4 = vcombine.high %v3755_v61, %v3763_v63  ;;  %v3738_v5 = vld [vmem:[#allocation6 + $0x6b0] sm:$0xff] }
0x10b2   :  { %5735 = vmatprep.subr.bf16.mxu1 %v7600_v7  ;;  %5778 = vmatprep.subr.bf16.mxu0 %v7602_v8  ;;  %v3746_v7 = vld [vmem:[#allocation6 + $0x6f0] sm:$0xff]  ;;  %v3739_v8 = vld [vmem:[#allocation6 + $0x6b8] sm:$0xff] }
0x10b3   :  { %v7620_v44 = vcombine.high %v3738_v5, %v3746_v7  ;;  %v7619_v18 = vcombine.low %v3738_v5, %v3746_v7  ;;  %v7621_v42 = vcombine.low %v3739_v8, %v3747_v27  ;;  %v8651_v5 = vld [vmem:[#allocation7 + $0x438] sm:$0xff]  }
0x10b4   :  { %v8652_v7 = vld [vmem:[#allocation7 + $0x4b8] sm:$0xff]  }
0x10b5   :  { %5736 = vmatpush1.bf16.msra.mxu1 %v7599_v12  ;;  %5779 = vmatpush1.bf16.msra.mxu0 %v7601_v13  ;;  %v7622_v12 = vcombine.high %v3739_v8, %v3747_v27  ;;  %v3722_v13 = vld [vmem:[#allocation6 + $0x630] sm:$0xff] }
0x10b6   :  { %5737 = vmatprep.subr.bf16.mxu1 %v7584_v14  ;;  %5780 = vmatprep.subr.bf16.mxu0 %v7586_v15  ;;  %v3730_v14 = vld [vmem:[#allocation6 + $0x670] sm:$0xff]  ;;  %v3723_v15 = vld [vmem:[#allocation6 + $0x638] sm:$0xff] }
0x10b7   :  { %v7604_v19 = vcombine.high %v3722_v13, %v3730_v14  ;;  %v7603_v24 = vcombine.low %v3722_v13, %v3730_v14  ;;  %v7605_v25 = vcombine.low %v3723_v15, %v3731_v16  ;;  %v8653_v8 = vld [vmem:[#allocation7 + $0x470] sm:$0xff]   ;;  %v8659_v13 = vld [vmem:[#allocation7 + $0x428] sm:$0xff]  }
0x10b8   :  { %v8654_v27 = vld [vmem:[#allocation7 + $0x4f0] sm:$0xff]   ;;  %v8660_v14 = vld [vmem:[#allocation7 + $0x4a8] sm:$0xff]  }
0x10b9   :  { %5738 = vmatpush1.bf16.msra.mxu1 %v7583_v43  ;;  %5781 = vmatpush1.bf16.msra.mxu0 %v7585_v20  ;;  %v7606_v43 = vcombine.high %v3723_v15, %v3731_v16  ;;  %v3706_v20 = vld [vmem:[#allocation6 + $0x5b0] sm:$0xff]  ;;  %v8661_v15 = vld [vmem:[#allocation7 + $0x460] sm:$0xff]  }
0x10ba   :  { %5739 = vmatprep.subr.bf16.mxu1 %v7568_v21  ;;  %5782 = vmatprep.subr.bf16.mxu0 %v7570_v22  ;;  %v3714_v21 = vld [vmem:[#allocation6 + $0x5f0] sm:$0xff]  ;;  %v3707_v22 = vld [vmem:[#allocation6 + $0x5b8] sm:$0xff]  ;;  %v8662_v16 = vld [vmem:[#allocation7 + $0x4e0] sm:$0xff]  }
0x10bb   :  { %v7588_v28 = vcombine.high %v3706_v20, %v3714_v21  ;;  %v7587_v45 = vcombine.low %v3706_v20, %v3714_v21  ;;  %v7589_v58 = vcombine.low %v3707_v22, %v3715_v23  ;;  %v8668_v20 = vld [vmem:[#allocation7 + $0x498] sm:$0xff]   ;;  %v8669_v21 = vld [vmem:[#allocation7 + $0x450] sm:$0xff]  }
0x10bd   :  { %5740 = vmatpush1.bf16.msra.mxu1 %v7567_v53  ;;  %5783 = vmatpush1.bf16.msra.mxu0 %v7569_v41  ;;  %v3690_v53 = vld [vmem:[#allocation6 + $0x530] sm:$0xff] }
0x10be   :  { %5741 = vmatprep.subr.bf16.mxu1 %v7552_v55  ;;  %5784 = vmatprep.subr.bf16.mxu0 %v7554_v6  ;;  %v3698_v41 = vld [vmem:[#allocation6 + $0x570] sm:$0xff]  ;;  %v3691_v55 = vld [vmem:[#allocation6 + $0x538] sm:$0xff] }
0x10bf   :  { %v3699_v6 = vld [vmem:[#allocation6 + $0x578] sm:$0xff]  ;;  %v7572_v46 = vcombine.high %v3690_v53, %v3698_v41  ;;  %v7571_v33 = vcombine.low %v3690_v53, %v3698_v41  ;;  %v8676_v53 = vld [vmem:[#allocation7 + $0x488] sm:$0xff]   ;;  %v8677_v41 = vld [vmem:[#allocation7 + $0x440] sm:$0xff]  }
0x10c0   :  { %v7574_v17 = vcombine.high %v3691_v55, %v3699_v6  ;;  %v7573_v50 = vcombine.low %v3691_v55, %v3699_v6  ;;  %v8678_v55 = vld [vmem:[#allocation7 + $0x4c0] sm:$0xff]  }
0x10c1   :  { %5742 = vmatpush1.bf16.msra.mxu1 %v7551_v47  ;;  %5785 = vmatpush1.bf16.msra.mxu0 %v7553_v48  ;;  %v3674_v47 = vld [vmem:[#allocation6 + $0x4b0] sm:$0xff]  ;;  %v8679_v6 = vld [vmem:[#allocation7 + $0x400] sm:$0xff]  }
0x10c2   :  { %5743 = vmatprep.subr.bf16.mxu1 %v7536_v9  ;;  %5786 = vmatprep.subr.bf16.mxu0 %v7538_v49  ;;  %v3682_v48 = vld [vmem:[#allocation6 + $0x4f0] sm:$0xff]  ;;  %v3675_v9 = vld [vmem:[#allocation6 + $0x4b8] sm:$0xff] }
0x10c3   :  { %v3683_v49 = vld [vmem:[#allocation6 + $0x4f8] sm:$0xff]  ;;  %v7556_v51 = vcombine.high %v3674_v47, %v3682_v48  ;;  %v7555_v59 = vcombine.low %v3674_v47, %v3682_v48 }
0x10c4   :  { %v7558_v38 = vcombine.high %v3675_v9, %v3683_v49  ;;  %v7557_v60 = vcombine.low %v3675_v9, %v3683_v49  ;;  %v3590_v47 = vld [vmem:[#allocation9 + $0x102] ss:$8 sm:$0xf0] }
0x10c5   :  { %5744 = vmatpush1.bf16.msra.mxu1 %v7535_v52  ;;  %5787 = vmatpush1.bf16.msra.mxu0 %v7537_v54  ;;  %v3658_v52 = vld [vmem:[#allocation6 + $0x430] sm:$0xff] }
0x10c6   :  { %5815 = vmatprep.subr.bf16.mxu1 %v7652_v56  ;;  %5858 = vmatprep.subr.bf16.mxu0 %v7654_v26  ;;  %v3666_v54 = vld [vmem:[#allocation6 + $0x470] sm:$0xff]  ;;  %v3659_v56 = vld [vmem:[#allocation6 + $0x438] sm:$0xff] }
0x10c7   :  { %v3667_v26 = vld [vmem:[#allocation6 + $0x478] sm:$0xff]  ;;  %v7540_v61 = vcombine.high %v3658_v52, %v3666_v54 }
0x10c8   :  { %5762 = vmatmul.mubr.bf16.vlgmr.msra.gmra.mxu1 %v9331_v31  ;;  %5805 = vmatmul.mubr.bf16.vlgmr.msra.gmra.mxu0 %v9331_v31  ;;  %v7542_v63 = vcombine.high %v3659_v56, %v3667_v26 }
0x10c9   :  { %5816 = vmatpush1.bf16.msra.mxu1 %v7651_v62  ;;  %5859 = vmatpush1.bf16.msra.mxu0 %v7653_v2  ;;  %v7539_v62 = vcombine.low %v3658_v52, %v3666_v54  ;;  %v7541_v2 = vcombine.low %v3659_v56, %v3667_v26 }
0x10ca   :  { %5817 = vmatprep.subr.bf16.mxu1 %v7636_v3  ;;  %5860 = vmatprep.subr.bf16.mxu0 %v7638_v4  ;;  %v8649_v3 = vld [vmem:[#allocation7 + $0x478] sm:$0xff]  }
0x10cb   :  { %5847 = vmatprep.mubr.bf16.mxu1 %v8951_v0  ;;  %5890 = vmatprep.mubr.bf16.mxu0 %v8951_v0  ;;  %v7590_v0 = vcombine.high %v3707_v22, %v3715_v23  ;;  %v8650_v4 = vld [vmem:[#allocation7 + $0x4f8] sm:$0xff]   ;;  %v8670_v22 = vld [vmem:[#allocation7 + $0x4d0] sm:$0xff]  }
0x10cc   :  { %v8671_v23 = vld [vmem:[#allocation7 + $0x410] sm:$0xff]  }
0x10cd   :  { %5818 = vmatpush1.bf16.msra.mxu1 %v7635_v10  ;;  %5861 = vmatpush1.bf16.msra.mxu0 %v7637_v11  ;;  %v8655_v10 = vld [vmem:[#allocation7 + $0x430] sm:$0xff]  }
0x10ce   :  { %5819 = vmatprep.subr.bf16.mxu1 %v7620_v44  ;;  %5862 = vmatprep.subr.bf16.mxu0 %v7622_v12  ;;  %v8656_v11 = vld [vmem:[#allocation7 + $0x4b0] sm:$0xff]   ;;  %v8657_v44 = vld [vmem:[#allocation7 + $0x468] sm:$0xff]  }
0x10cf   :  { %v8658_v12 = vld [vmem:[#allocation7 + $0x4e8] sm:$0xff]  }
0x10d1   :  { %5820 = vmatpush1.bf16.msra.mxu1 %v7619_v18  ;;  %5863 = vmatpush1.bf16.msra.mxu0 %v7621_v42  ;;  %v8663_v18 = vld [vmem:[#allocation7 + $0x420] sm:$0xff]   ;;  %v8665_v42 = vld [vmem:[#allocation7 + $0x458] sm:$0xff]  }
0x10d2   :  { %5821 = vmatprep.subr.bf16.mxu1 %v7604_v19  ;;  %5864 = vmatprep.subr.bf16.mxu0 %v7606_v43  ;;  %v8666_v19 = vld [vmem:[#allocation7 + $0x4d8] sm:$0xff]  }
0x10d3   :  { %v8667_v43 = vld [vmem:[#allocation7 + $0x418] sm:$0xff]  }
0x10d5   :  { %5822 = vmatpush1.bf16.msra.mxu1 %v7603_v24  ;;  %5865 = vmatpush1.bf16.msra.mxu0 %v7605_v25  ;;  %v8672_v24 = vld [vmem:[#allocation7 + $0x490] sm:$0xff]   ;;  %v8673_v25 = vld [vmem:[#allocation7 + $0x448] sm:$0xff]  }
0x10d6   :  { %5823 = vmatprep.subr.bf16.mxu1 %v7588_v28  ;;  %5866 = vmatprep.subr.bf16.mxu0 %v7590_v0  ;;  %v8674_v28 = vld [vmem:[#allocation7 + $0x4c8] sm:$0xff]  }
0x10d7   :  { %v8675_v0 = vld [vmem:[#allocation7 + $0x408] sm:$0xff]  }
0x10d9   :  { %5824 = vmatpush1.bf16.msra.mxu1 %v7587_v45  ;;  %5867 = vmatpush1.bf16.msra.mxu0 %v7589_v58  ;;  %v8680_v45 = vld [vmem:[#allocation7 + $0x480] sm:$0xff]   ;;  %v8681_v58 = vld [vmem:[#allocation7 + $0x578] sm:$0xff]  }
0x10da   :  { %5825 = vmatprep.subr.bf16.mxu1 %v7572_v46  ;;  %5868 = vmatprep.subr.bf16.mxu0 %v7574_v17  ;;  %v8682_v46 = vld [vmem:[#allocation7 + $0x5f8] sm:$0xff]  }
0x10db   :  { %v3589_v17 = vld [vmem:[#allocation9 + $0x102] ss:$8 sm:$0xf] }
0x10dc   :  { %v9347_v48 = vor.u32 %v3590_v47, %v3589_v17  ;;  %v8701_v17 = vld [vmem:[#allocation7 + $0x550] sm:$0xff]  }
0x10dd   :  { %5826 = vmatpush1.bf16.msra.mxu1 %v7571_v33  ;;  %5869 = vmatpush1.bf16.msra.mxu0 %v7573_v50  ;;  %v8702_v47 = vld [vmem:[#allocation7 + $0x5d0] sm:$0xff]  }
0x10de   :  { %5827 = vmatprep.subr.bf16.mxu1 %v7556_v51  ;;  %5870 = vmatprep.subr.bf16.mxu0 %v7558_v38  ;;  %v4844_v33 = vrot.slane %v9347_v48, %v9044_v36  ;;  %v4852_v50 = vrot.slane %v9347_v48, %v9158_v37  ;;  %v4840_v51 = vrot.slane %v9347_v48, %v9041_v34 }
0x10df   :  { %v4848_v38 = vrot.slane %v9347_v48, %v9063_v57 }
0x10e1   :  { %5828 = vmatpush1.bf16.msra.mxu1 %v7555_v59  ;;  %5871 = vmatpush1.bf16.msra.mxu0 %v7557_v60 }
0x10e2   :  { %5829 = vmatprep.subr.bf16.mxu1 %v7540_v61  ;;  %5872 = vmatprep.subr.bf16.mxu0 %v7542_v63 }
0x10e5   :  { %5830 = vmatpush1.bf16.msra.mxu1 %v7539_v62  ;;  %5873 = vmatpush1.bf16.msra.mxu0 %v7541_v2 }
0x10e6   :  { %8035 = vmatprep.subr.bf16.mxu1 %v8649_v3  ;;  %8057 = vmatprep.subr.bf16.mxu0 %v8650_v4 }
0x10e8   :  { %5848 = vmatmul.mubr.bf16.vlgmr.msra.gmra.mxu1 %v9331_v31  ;;  %5891 = vmatmul.mubr.bf16.vlgmr.msra.gmra.mxu0 %v9331_v31  ;;  %v8664_v31 = vld [vmem:[#allocation7 + $0x4a0] sm:$0xff]  }
0x10e9   :  { %8036 = vmatpush3.bf16.msra.mxu1 %v8651_v5  ;;  %8058 = vmatpush3.bf16.msra.mxu0 %v8652_v7 }
0x10ea   :  { %8037 = vmatprep.subr.bf16.mxu1 %v8653_v8  ;;  %8059 = vmatprep.subr.bf16.mxu0 %v8654_v27 }
0x10ed   :  { %8038 = vmatpush3.bf16.msra.mxu1 %v8655_v10  ;;  %8060 = vmatpush3.bf16.msra.mxu0 %v8656_v11 }
0x10ee   :  { %8039 = vmatprep.subr.bf16.mxu1 %v8657_v44  ;;  %8061 = vmatprep.subr.bf16.mxu0 %v8658_v12 }
0x10f1   :  { %8040 = vmatpush3.bf16.msra.mxu1 %v8659_v13  ;;  %8062 = vmatpush3.bf16.msra.mxu0 %v8660_v14 }
0x10f2   :  { %8041 = vmatprep.subr.bf16.mxu1 %v8661_v15  ;;  %8063 = vmatprep.subr.bf16.mxu0 %v8662_v16 }
0x10f5   :  { %8042 = vmatpush3.bf16.msra.mxu1 %v8663_v18  ;;  %8064 = vmatpush3.bf16.msra.mxu0 %v8664_v31  ;;  %v8683_v18 = vld [vmem:[#allocation7 + $0x538] sm:$0xff]  }
0x10f6   :  { %8043 = vmatprep.subr.bf16.mxu1 %v8665_v42  ;;  %8065 = vmatprep.subr.bf16.mxu0 %v8666_v19  ;;  %v8684_v31 = vld [vmem:[#allocation7 + $0x5b8] sm:$0xff]  }
0x10f9   :  { %8044 = vmatpush3.bf16.msra.mxu1 %v8667_v43  ;;  %8066 = vmatpush3.bf16.msra.mxu0 %v8668_v20  ;;  %v8685_v43 = vld [vmem:[#allocation7 + $0x570] sm:$0xff]  }
0x10fa   :  { %8045 = vmatprep.subr.bf16.mxu1 %v8669_v21  ;;  %8067 = vmatprep.subr.bf16.mxu0 %v8670_v22  ;;  %v8686_v20 = vld [vmem:[#allocation7 + $0x5f0] sm:$0xff]  }
0x10fb   :  { %v8687_v21 = vld [vmem:[#allocation7 + $0x530] sm:$0xff]  }
0x10fc   :  { %v8688_v22 = vld [vmem:[#allocation7 + $0x5b0] sm:$0xff]  }
0x10fd   :  { %8046 = vmatpush3.bf16.msra.mxu1 %v8671_v23  ;;  %8068 = vmatpush3.bf16.msra.mxu0 %v8672_v24  ;;  %v8689_v23 = vld [vmem:[#allocation7 + $0x568] sm:$0xff]  }
0x10fe   :  { %8047 = vmatprep.subr.bf16.mxu1 %v8673_v25  ;;  %8069 = vmatprep.subr.bf16.mxu0 %v8674_v28  ;;  %v8690_v24 = vld [vmem:[#allocation7 + $0x5e8] sm:$0xff]  }
0x10ff   :  { %v8691_v25 = vld [vmem:[#allocation7 + $0x528] sm:$0xff]  }
0x1100   :  { %v8692_v28 = vld [vmem:[#allocation7 + $0x5a8] sm:$0xff]  }
0x1101   :  { %8048 = vmatpush3.bf16.msra.mxu1 %v8675_v0  ;;  %8070 = vmatpush3.bf16.msra.mxu0 %v8676_v53  ;;  %v8693_v0 = vld [vmem:[#allocation7 + $0x560] sm:$0xff]  }
0x1102   :  { %8049 = vmatprep.subr.bf16.mxu1 %v8677_v41  ;;  %8071 = vmatprep.subr.bf16.mxu0 %v8678_v55  ;;  %v8694_v53 = vld [vmem:[#allocation7 + $0x5e0] sm:$0xff]  }
0x1103   :  { %v8695_v41 = vld [vmem:[#allocation7 + $0x520] sm:$0xff]  }
0x1104   :  { %v8696_v55 = vld [vmem:[#allocation7 + $0x5a0] sm:$0xff]  }
0x1105   :  { %8050 = vmatpush3.bf16.msra.mxu1 %v8679_v6  ;;  %8072 = vmatpush3.bf16.msra.mxu0 %v8680_v45  ;;  %v8697_v6 = vld [vmem:[#allocation7 + $0x558] sm:$0xff]  }
0x1106   :  { %8079 = vmatprep.subr.bf16.mxu1 %v8681_v58  ;;  %8101 = vmatprep.subr.bf16.mxu0 %v8682_v46  ;;  %v8698_v45 = vld [vmem:[#allocation7 + $0x5d8] sm:$0xff]  }
0x1107   :  { %v8699_v58 = vld [vmem:[#allocation7 + $0x518] sm:$0xff]  }
0x1108   :  { %v8700_v46 = vld [vmem:[#allocation7 + $0x598] sm:$0xff]  }
0x1148   :  { %v5591_v9 = vpop.f32.mrf.mxu1  ;;  %v5634_v49 = vpop.f32.mrf.mxu0 }
0x1149   :  { %v5592_v62 = vadd.f32 %v5591_v9, %v4840_v51  ;;  %v5635_v2 = vadd.f32 %v5634_v49, %v4848_v38  ;;  %v8703_v9 = vld [vmem:[#allocation7 + $0x510] sm:$0xff]  }
0x114a   :  { %v5593_v52 = vpop.f32.mrf.mxu1  ;;  %v5636_v54 = vpop.f32.mrf.mxu0  ;;  %v8704_v49 = vld [vmem:[#allocation7 + $0x590] sm:$0xff]  }
0x114b   :  { %v5594_v59 = vadd.f32 %v5593_v52, %v4844_v33  ;;  %v5637_v60 = vadd.f32 %v5636_v54, %v4852_v50  ;;  %v5901_v13 = vmax.f32 %v5592_v62, 0.0  ;;  %v5903_v14 = vmax.f32 %v5635_v2, 0.0 }
0x114c   :  { %v5595_v56 = vpop.f32.mrf.mxu1  ;;  %v5638_v26 = vpop.f32.mrf.mxu0  ;;  %v4860_v52 = vrot.slane %v9347_v48, %v9171_v32  ;;  %v4868_v54 = vrot.slane %v9347_v48, %v9174_v35 }
0x114d   :  { %v5596_v61 = vadd.f32 %v5595_v56, %v4840_v51  ;;  %v5639_v63 = vadd.f32 %v5638_v26, %v4848_v38  ;;  %v5902_v10 = vmax.f32 %v5594_v59, 0.0  ;;  %v5904_v11 = vmax.f32 %v5637_v60, 0.0  ;;  %v8705_v51 = vld [vmem:[#allocation7 + $0x548] sm:$0xff]  }
0x114e   :  { %v5597_v3 = vpop.f32.mrf.mxu1  ;;  %v5640_v4 = vpop.f32.mrf.mxu0  ;;  %v8706_v38 = vld [vmem:[#allocation7 + $0x5c8] sm:$0xff]   ;;  %v4856_v56 = vrot.slane %v9347_v48, %v9177_v39  ;;  %v4864_v26 = vrot.slane %v9347_v48, %v9180_v40 }
0x114f   :  { %v5598_v5 = vadd.f32 %v5597_v3, %v4844_v33  ;;  %v5641_v7 = vadd.f32 %v5640_v4, %v4852_v50  ;;  %v5917_v8 = vmax.f32 %v5596_v61, 0.0  ;;  %v5919_v27 = vmax.f32 %v5639_v63, 0.0  ;;  %v8707_v61 = vld [vmem:[#allocation7 + $0x508] sm:$0xff]   ;;  %v8709_v3 = vld [vmem:[#allocation7 + $0x540] sm:$0xff]  }
0x1150   :  { %v8708_v63 = vld [vmem:[#allocation7 + $0x588] sm:$0xff]   ;;  %v8710_v4 = vld [vmem:[#allocation7 + $0x5c0] sm:$0xff]  }
0x1151   :  { %v5918_v44 = vmax.f32 %v5598_v5, 0.0  ;;  %v5920_v12 = vmax.f32 %v5641_v7, 0.0  ;;  %v5933_v42 = vpack.c.bf16 %v5917_v8, %v5901_v13  ;;  %v5935_v19 = vpack.c.bf16 %v5919_v27, %v5903_v14  ;;  %v8711_v14 = vld [vmem:[#allocation7 + $0x500] sm:$0xff]  }
0x1153   :  { %v5934_v15 = vpack.c.bf16 %v5918_v44, %v5902_v10  ;;  %v5936_v16 = vpack.c.bf16 %v5920_v12, %v5904_v11 }
0x1155   :  { %6749 = vmatprep.mubr.bf16.mxu1 %v5934_v15  ;;  %6790 = vmatprep.mubr.bf16.mxu0 %v5936_v16  ;;  %v8712_v15 = vld [vmem:[#allocation7 + $0x580] sm:$0xff]  }
0x1156   :  { %6750 = vmatmul.mubr.bf16.vlgmr.msra.gmra.mxu1 %v5933_v42  ;;  %6791 = vmatmul.mubr.bf16.vlgmr.msra.gmra.mxu0 %v5935_v19  ;;  %v8714_v42 = vld [vmem:[#allocation7 + $0x6f8] sm:$0xff]  }
0x1157   :  { %8080 = vmatpush3.bf16.msra.mxu1 %v8683_v18  ;;  %8102 = vmatpush3.bf16.msra.mxu0 %v8684_v31  ;;  %v8713_v31 = vld [vmem:[#allocation7 + $0x678] sm:$0xff]  }
0x1158   :  { %8081 = vmatprep.subr.bf16.mxu1 %v8685_v43  ;;  %8103 = vmatprep.subr.bf16.mxu0 %v8686_v20 }
0x115b   :  { %8082 = vmatpush3.bf16.msra.mxu1 %v8687_v21  ;;  %8104 = vmatpush3.bf16.msra.mxu0 %v8688_v22 }
0x115c   :  { %8083 = vmatprep.subr.bf16.mxu1 %v8689_v23  ;;  %8105 = vmatprep.subr.bf16.mxu0 %v8690_v24 }
0x115f   :  { %8084 = vmatpush3.bf16.msra.mxu1 %v8691_v25  ;;  %8106 = vmatpush3.bf16.msra.mxu0 %v8692_v28  ;;  %v8715_v28 = vld [vmem:[#allocation7 + $0x638] sm:$0xff]  }
0x1160   :  { %8085 = vmatprep.subr.bf16.mxu1 %v8693_v0  ;;  %8107 = vmatprep.subr.bf16.mxu0 %v8694_v53  ;;  %v8716_v0 = vld [vmem:[#allocation7 + $0x6b8] sm:$0xff]  }
0x1163   :  { %8086 = vmatpush3.bf16.msra.mxu1 %v8695_v41  ;;  %8108 = vmatpush3.bf16.msra.mxu0 %v8696_v55  ;;  %v8717_v55 = vld [vmem:[#allocation7 + $0x670] sm:$0xff]  }
0x1164   :  { %8087 = vmatprep.subr.bf16.mxu1 %v8697_v6  ;;  %8109 = vmatprep.subr.bf16.mxu0 %v8698_v45  ;;  %v8718_v6 = vld [vmem:[#allocation7 + $0x6f0] sm:$0xff]  }
0x1165   :  { %v8719_v45 = vld [vmem:[#allocation7 + $0x630] sm:$0xff]  }
0x1167   :  { %8088 = vmatpush3.bf16.msra.mxu1 %v8699_v58  ;;  %8110 = vmatpush3.bf16.msra.mxu0 %v8700_v46  ;;  %v8720_v58 = vld [vmem:[#allocation7 + $0x6b0] sm:$0xff]   ;;  %v8721_v46 = vld [vmem:[#allocation7 + $0x668] sm:$0xff]  }
0x1168   :  { %v5677_v33 = vpop.f32.mrf.mxu1  ;;  %v5720_v50 = vpop.f32.mrf.mxu0  ;;  %8089 = vmatprep.subr.bf16.mxu1 %v8701_v17  ;;  %8111 = vmatprep.subr.bf16.mxu0 %v8702_v47  ;;  %v8722_v17 = vld [vmem:[#allocation7 + $0x6e8] sm:$0xff]  }
0x1169   :  { %v5678_v10 = vadd.f32 %v5677_v33, %v4856_v56  ;;  %v5721_v11 = vadd.f32 %v5720_v50, %v4864_v26  ;;  %v8723_v47 = vld [vmem:[#allocation7 + $0x628] sm:$0xff]   ;;  %v8726_v33 = vld [vmem:[#allocation7 + $0x6e0] sm:$0xff]  }
0x116a   :  { %v5679_v59 = vpop.f32.mrf.mxu1  ;;  %v5722_v60 = vpop.f32.mrf.mxu0  ;;  %v8727_v50 = vld [vmem:[#allocation7 + $0x620] sm:$0xff]  }
0x116b   :  { %8090 = vmatpush3.bf16.msra.mxu1 %v8703_v9  ;;  %8112 = vmatpush3.bf16.msra.mxu0 %v8704_v49  ;;  %v5680_v5 = vadd.f32 %v5679_v59, %v4860_v52  ;;  %v5723_v7 = vadd.f32 %v5722_v60, %v4868_v54  ;;  %v5905_v22 = vmax.f32 %v5678_v10, 0.0  ;;  %v5907_v23 = vmax.f32 %v5721_v11, 0.0  ;;  %v8724_v9 = vld [vmem:[#allocation7 + $0x6a8] sm:$0xff]   ;;  %v8725_v49 = vld [vmem:[#allocation7 + $0x660] sm:$0xff]   ;;  %v8733_v60 = vld [vmem:[#allocation7 + $0x650] sm:$0xff]  }
0x116c   :  { %v5681_v62 = vpop.f32.mrf.mxu1  ;;  %v5724_v2 = vpop.f32.mrf.mxu0  ;;  %8091 = vmatprep.subr.bf16.mxu1 %v8705_v51  ;;  %8113 = vmatprep.subr.bf16.mxu0 %v8706_v38  ;;  %v8728_v51 = vld [vmem:[#allocation7 + $0x6a0] sm:$0xff]   ;;  %v8729_v38 = vld [vmem:[#allocation7 + $0x658] sm:$0xff]  }
0x116d   :  { %v5682_v8 = vadd.f32 %v5681_v62, %v4856_v56  ;;  %v5725_v27 = vadd.f32 %v5724_v2, %v4864_v26  ;;  %v5906_v19 = vmax.f32 %v5680_v5, 0.0  ;;  %v5908_v43 = vmax.f32 %v5723_v7, 0.0  ;;  %v8731_v56 = vld [vmem:[#allocation7 + $0x618] sm:$0xff]   ;;  %v8735_v62 = vld [vmem:[#allocation7 + $0x610] sm:$0xff]   ;;  %v8737_v5 = vld [vmem:[#allocation7 + $0x648] sm:$0xff]  }
0x116e   :  { %v5683_v44 = vpop.f32.mrf.mxu1  ;;  %v5726_v48 = vpop.f32.mrf.mxu0  ;;  %v8732_v26 = vld [vmem:[#allocation7 + $0x698] sm:$0xff]   ;;  %v8736_v2 = vld [vmem:[#allocation7 + $0x690] sm:$0xff]   ;;  %v8738_v7 = vld [vmem:[#allocation7 + $0x6c8] sm:$0xff]  }
0x116f   :  { %v5684_v12 = vadd.f32 %v5683_v44, %v4860_v52  ;;  %v5727_v13 = vadd.f32 %v5726_v48, %v4868_v54  ;;  %8092 = vmatpush3.bf16.msra.mxu1 %v8707_v61  ;;  %8114 = vmatpush3.bf16.msra.mxu0 %v8708_v63  ;;  %v5921_v16 = vmax.f32 %v5682_v8, 0.0  ;;  %v5923_v18 = vmax.f32 %v5725_v27, 0.0  ;;  %v8730_v52 = vld [vmem:[#allocation7 + $0x6d8] sm:$0xff]   ;;  %v8734_v61 = vld [vmem:[#allocation7 + $0x6d0] sm:$0xff]  }
0x1170   :  { %8093 = vmatprep.subr.bf16.mxu1 %v8709_v3  ;;  %8115 = vmatprep.subr.bf16.mxu0 %v8710_v4  ;;  %v3593_v54 = vld [vmem:[#allocation9 + $0x142] ss:$8 sm:$0xf] }
0x1171   :  { %v5922_v20 = vmax.f32 %v5684_v12, 0.0  ;;  %v5924_v21 = vmax.f32 %v5727_v13, 0.0  ;;  %v5937_v53 = vpack.c.bf16 %v5921_v16, %v5905_v22  ;;  %v5939_v41 = vpack.c.bf16 %v5923_v18, %v5907_v23  ;;  %v3594_v59 = vld [vmem:[#allocation9 + $0x142] ss:$8 sm:$0xf0] }
0x1172   :  { %v9365_v63 = vor.u32 %v3594_v59, %v3593_v54  ;;  %v8739_v12 = vld [vmem:[#allocation7 + $0x608] sm:$0xff]   ;;  %v8742_v16 = vld [vmem:[#allocation7 + $0x6c0] sm:$0xff]  }
0x1173   :  { %v5938_v24 = vpack.c.bf16 %v5922_v20, %v5906_v19  ;;  %v5940_v25 = vpack.c.bf16 %v5924_v21, %v5908_v43  ;;  %8094 = vmatpush3.bf16.msra.mxu1 %v8711_v14  ;;  %8116 = vmatpush3.bf16.msra.mxu0 %v8712_v15  ;;  %v8740_v13 = vld [vmem:[#allocation7 + $0x688] sm:$0xff]   ;;  %v8743_v22 = vld [vmem:[#allocation7 + $0x600] sm:$0xff]  }
0x1174   :  { %8123 = vmatprep.subr.bf16.mxu1 %v8713_v31  ;;  %8145 = vmatprep.subr.bf16.mxu0 %v8714_v42  ;;  %v4876_v8 = vrot.slane %v9365_v63, %v9044_v36  ;;  %v4884_v27 = vrot.slane %v9365_v63, %v9158_v37  ;;  %v4872_v10 = vrot.slane %v9365_v63, %v9041_v34  ;;  %v8741_v36 = vld [vmem:[#allocation7 + $0x640] sm:$0xff]   ;;  %v8753_v54 = vld [vmem:[#allocation7 + $0x768] sm:$0xff]  }
0x1175   :  { %6831 = vmatprep.mubr.bf16.mxu1 %v5938_v24  ;;  %6872 = vmatprep.mubr.bf16.mxu0 %v5940_v25  ;;  %v4880_v11 = vrot.slane %v9365_v63, %v9063_v57  ;;  %v8744_v23 = vld [vmem:[#allocation7 + $0x680] sm:$0xff]   ;;  %v8756_v59 = vld [vmem:[#allocation7 + $0x7a8] sm:$0xff]  }
0x1176   :  { %6832 = vmatmul.mubr.bf16.vlgmr.msra.gmra.mxu1 %v5937_v53  ;;  %6873 = vmatmul.mubr.bf16.vlgmr.msra.gmra.mxu0 %v5939_v41 }
0x1177   :  { %8124 = vmatpush3.bf16.msra.mxu1 %v8715_v28  ;;  %8146 = vmatpush3.bf16.msra.mxu0 %v8716_v0  ;;  %v8745_v28 = vld [vmem:[#allocation7 + $0x778] sm:$0xff]  }
0x1178   :  { %8125 = vmatprep.subr.bf16.mxu1 %v8717_v55  ;;  %8147 = vmatprep.subr.bf16.mxu0 %v8718_v6  ;;  %v8746_v0 = vld [vmem:[#allocation7 + $0x7f8] sm:$0xff]  }
0x117b   :  { %8126 = vmatpush3.bf16.msra.mxu1 %v8719_v45  ;;  %8148 = vmatpush3.bf16.msra.mxu0 %v8720_v58 }
0x117c   :  { %8127 = vmatprep.subr.bf16.mxu1 %v8721_v46  ;;  %8149 = vmatprep.subr.bf16.mxu0 %v8722_v17 }
0x117f   :  { %8128 = vmatpush3.bf16.msra.mxu1 %v8723_v47  ;;  %8150 = vmatpush3.bf16.msra.mxu0 %v8724_v9  ;;  %v8747_v47 = vld [vmem:[#allocation7 + $0x738] sm:$0xff]  }
0x1180   :  { %8129 = vmatprep.subr.bf16.mxu1 %v8725_v49  ;;  %8151 = vmatprep.subr.bf16.mxu0 %v8726_v33  ;;  %v8748_v9 = vld [vmem:[#allocation7 + $0x7b8] sm:$0xff]  }
0x1183   :  { %8130 = vmatpush3.bf16.msra.mxu1 %v8727_v50  ;;  %8152 = vmatpush3.bf16.msra.mxu0 %v8728_v51  ;;  %v8749_v50 = vld [vmem:[#allocation7 + $0x770] sm:$0xff]  }
0x1184   :  { %8131 = vmatprep.subr.bf16.mxu1 %v8729_v38  ;;  %8153 = vmatprep.subr.bf16.mxu0 %v8730_v52  ;;  %v8750_v51 = vld [vmem:[#allocation7 + $0x7f0] sm:$0xff]  }
0x1185   :  { %v8751_v38 = vld [vmem:[#allocation7 + $0x730] sm:$0xff]  }
0x1186   :  { %v8752_v52 = vld [vmem:[#allocation7 + $0x7b0] sm:$0xff]  }
0x1187   :  { %8132 = vmatpush3.bf16.msra.mxu1 %v8731_v56  ;;  %8154 = vmatpush3.bf16.msra.mxu0 %v8732_v26  ;;  %v8754_v56 = vld [vmem:[#allocation7 + $0x7e8] sm:$0xff]  }
0x1188   :  { %v5763_v3 = vpop.f32.mrf.mxu1  ;;  %v5806_v4 = vpop.f32.mrf.mxu0  ;;  %8133 = vmatprep.subr.bf16.mxu1 %v8733_v60  ;;  %8155 = vmatprep.subr.bf16.mxu0 %v8734_v61  ;;  %v8755_v26 = vld [vmem:[#allocation7 + $0x728] sm:$0xff]   ;;  %v8757_v60 = vld [vmem:[#allocation7 + $0x760] sm:$0xff]  }
0x1189   :  { %v5764_v34 = vadd.f32 %v5763_v3, %v4872_v10  ;;  %v5807_v19 = vadd.f32 %v5806_v4, %v4880_v11  ;;  %v8758_v61 = vld [vmem:[#allocation7 + $0x7e0] sm:$0xff]   ;;  %v8761_v3 = vld [vmem:[#allocation7 + $0x758] sm:$0xff]  }
0x118a   :  { %v5765_v44 = vpop.f32.mrf.mxu1  ;;  %v5808_v48 = vpop.f32.mrf.mxu0  ;;  %v8762_v4 = vld [vmem:[#allocation7 + $0x7d8] sm:$0xff]  }
0x118b   :  { %8134 = vmatpush3.bf16.msra.mxu1 %v8735_v62  ;;  %8156 = vmatpush3.bf16.msra.mxu0 %v8736_v2  ;;  %v5766_v18 = vadd.f32 %v5765_v44, %v4876_v8  ;;  %v5809_v37 = vadd.f32 %v5808_v48, %v4884_v27  ;;  %v5909_v45 = vmax.f32 %v5764_v34, 0.0  ;;  %v5911_v58 = vmax.f32 %v5807_v19, 0.0  ;;  %v8759_v62 = vld [vmem:[#allocation7 + $0x720] sm:$0xff]  }
0x118c   :  { %v5767_v14 = vpop.f32.mrf.mxu1  ;;  %v5810_v15 = vpop.f32.mrf.mxu0  ;;  %8135 = vmatprep.subr.bf16.mxu1 %v8737_v5  ;;  %8157 = vmatprep.subr.bf16.mxu0 %v8738_v7  ;;  %v8760_v2 = vld [vmem:[#allocation7 + $0x7a0] sm:$0xff]   ;;  %v8763_v5 = vld [vmem:[#allocation7 + $0x718] sm:$0xff]  }
0x118d   :  { %v5768_v31 = vadd.f32 %v5767_v14, %v4872_v10  ;;  %v5811_v42 = vadd.f32 %v5810_v15, %v4880_v11  ;;  %v5910_v53 = vmax.f32 %v5766_v18, 0.0  ;;  %v5912_v41 = vmax.f32 %v5809_v37, 0.0  ;;  %v8764_v7 = vld [vmem:[#allocation7 + $0x798] sm:$0xff]   ;;  %v8767_v10 = vld [vmem:[#allocation7 + $0x710] sm:$0xff]  }
0x118e   :  { %v5769_v43 = vpop.f32.mrf.mxu1  ;;  %v5812_v57 = vpop.f32.mrf.mxu0  ;;  %v8768_v11 = vld [vmem:[#allocation7 + $0x790] sm:$0xff]   ;;  %v4892_v14 = vrot.slane %v9365_v63, %v9171_v32  ;;  %v4900_v15 = vrot.slane %v9365_v63, %v9174_v35  ;;  %v8773_v32 = vld [vmem:[#allocation7 + $0x740] sm:$0xff]  }
0x118f   :  { %v5770_v20 = vadd.f32 %v5769_v43, %v4876_v8  ;;  %v5813_v21 = vadd.f32 %v5812_v57, %v4884_v27  ;;  %8136 = vmatpush3.bf16.msra.mxu1 %v8739_v12  ;;  %8158 = vmatpush3.bf16.msra.mxu0 %v8740_v13  ;;  %v5925_v24 = vmax.f32 %v5768_v31, 0.0  ;;  %v5927_v25 = vmax.f32 %v5811_v42, 0.0  ;;  %v8765_v8 = vld [vmem:[#allocation7 + $0x750] sm:$0xff]   ;;  %v8769_v12 = vld [vmem:[#allocation7 + $0x748] sm:$0xff]   ;;  %v8774_v43 = vld [vmem:[#allocation7 + $0x7c0] sm:$0xff]  }
0x1190   :  { %8137 = vmatprep.subr.bf16.mxu1 %v8741_v36  ;;  %8159 = vmatprep.subr.bf16.mxu0 %v8742_v16  ;;  %v8766_v27 = vld [vmem:[#allocation7 + $0x7d0] sm:$0xff]   ;;  %v8770_v13 = vld [vmem:[#allocation7 + $0x7c8] sm:$0xff]   ;;  %v4888_v36 = vrot.slane %v9365_v63, %v9177_v39  ;;  %v4896_v16 = vrot.slane %v9365_v63, %v9180_v40 }
0x1191   :  { %v5926_v55 = vmax.f32 %v5770_v20, 0.0  ;;  %v5928_v6 = vmax.f32 %v5813_v21, 0.0  ;;  %v5941_v49 = vpack.c.bf16 %v5925_v24, %v5909_v45  ;;  %v5943_v33 = vpack.c.bf16 %v5927_v25, %v5911_v58  ;;  %v8771_v31 = vld [vmem:[#allocation7 + $0x708] sm:$0xff]   ;;  %v8775_v25 = vld [vmem:[#allocation7 + $0x700] sm:$0xff]  }
0x1192   :  { %v8772_v42 = vld [vmem:[#allocation7 + $0x788] sm:$0xff]  }
0x1193   :  { %v5942_v46 = vpack.c.bf16 %v5926_v55, %v5910_v53  ;;  %v5944_v17 = vpack.c.bf16 %v5928_v6, %v5912_v41  ;;  %8138 = vmatpush3.bf16.msra.mxu1 %v8743_v22  ;;  %8160 = vmatpush3.bf16.msra.mxu0 %v8744_v23 }
0x1194   :  { %8167 = vmatprep.subr.bf16.mxu1 %v8745_v28  ;;  %8189 = vmatprep.subr.bf16.mxu0 %v8746_v0  ;;  %v8776_v28 = vld [vmem:[#allocation7 + $0x780] sm:$0xff]  }
0x1195   :  { %6913 = vmatprep.mubr.bf16.mxu1 %v5942_v46  ;;  %6954 = vmatprep.mubr.bf16.mxu0 %v5944_v17 }
0x1196   :  { %6914 = vmatmul.mubr.bf16.vlgmr.msra.gmra.mxu1 %v5941_v49  ;;  %6955 = vmatmul.mubr.bf16.vlgmr.msra.gmra.mxu0 %v5943_v33 }
0x1197   :  { %8168 = vmatpush3.bf16.msra.mxu1 %v8747_v47  ;;  %8190 = vmatpush3.bf16.msra.mxu0 %v8748_v9 }
0x1198   :  { %8169 = vmatprep.subr.bf16.mxu1 %v8749_v50  ;;  %8191 = vmatprep.subr.bf16.mxu0 %v8750_v51 }
0x119b   :  { %8170 = vmatpush3.bf16.msra.mxu1 %v8751_v38  ;;  %8192 = vmatpush3.bf16.msra.mxu0 %v8752_v52 }
0x119c   :  { %8171 = vmatprep.subr.bf16.mxu1 %v8753_v54  ;;  %8193 = vmatprep.subr.bf16.mxu0 %v8754_v56 }
0x119f   :  { %8172 = vmatpush3.bf16.msra.mxu1 %v8755_v26  ;;  %8194 = vmatpush3.bf16.msra.mxu0 %v8756_v59 }
0x11a0   :  { %8173 = vmatprep.subr.bf16.mxu1 %v8757_v60  ;;  %8195 = vmatprep.subr.bf16.mxu0 %v8758_v61 }
0x11a3   :  { %8174 = vmatpush3.bf16.msra.mxu1 %v8759_v62  ;;  %8196 = vmatpush3.bf16.msra.mxu0 %v8760_v2 }
0x11a4   :  { %8175 = vmatprep.subr.bf16.mxu1 %v8761_v3  ;;  %8197 = vmatprep.subr.bf16.mxu0 %v8762_v4 }
0x11a7   :  { %8176 = vmatpush3.bf16.msra.mxu1 %v8763_v5  ;;  %8198 = vmatpush3.bf16.msra.mxu0 %v8764_v7  ;;  %v3596_v7 = vld [vmem:[#allocation9 + $0x103] ss:$0 sm:$0xff] }
0x11a8   :  { %v5849_v44 = vpop.f32.mrf.mxu1  ;;  %v5892_v48 = vpop.f32.mrf.mxu0  ;;  %8177 = vmatprep.subr.bf16.mxu1 %v8765_v8  ;;  %8199 = vmatprep.subr.bf16.mxu0 %v8766_v27 }
0x11a9   :  { %v5850_v39 = vadd.f32 %v5849_v44, %v4888_v36  ;;  %v5893_v22 = vadd.f32 %v5892_v48, %v4896_v16 }
0x11aa   :  { %v5851_v18 = vpop.f32.mrf.mxu1  ;;  %v5894_v37 = vpop.f32.mrf.mxu0 }
0x11ab   :  { %8178 = vmatpush3.bf16.msra.mxu1 %v8767_v10  ;;  %8200 = vmatpush3.bf16.msra.mxu0 %v8768_v11  ;;  %v5852_v57 = vadd.f32 %v5851_v18, %v4892_v14  ;;  %v5895_v35 = vadd.f32 %v5894_v37, %v4900_v15  ;;  %v5913_v58 = vmax.f32 %v5850_v39, 0.0  ;;  %v5915_v46 = vmax.f32 %v5893_v22, 0.0 }
0x11ac   :  { %v5853_v34 = vpop.f32.mrf.mxu1  ;;  %v5896_v19 = vpop.f32.mrf.mxu0  ;;  %8179 = vmatprep.subr.bf16.mxu1 %v8769_v12  ;;  %8201 = vmatprep.subr.bf16.mxu0 %v8770_v13 }
0x11ad   :  { %v5854_v20 = vadd.f32 %v5853_v34, %v4888_v36  ;;  %v5897_v21 = vadd.f32 %v5896_v19, %v4896_v16  ;;  %v5914_v41 = vmax.f32 %v5852_v57, 0.0  ;;  %v5916_v55 = vmax.f32 %v5895_v35, 0.0 }
0x11ae   :  { %v5855_v23 = vpop.f32.mrf.mxu1  ;;  %v5898_v40 = vpop.f32.mrf.mxu0 }
0x11af   :  { %v5856_v63 = vadd.f32 %v5855_v23, %v4892_v14  ;;  %v5899_v24 = vadd.f32 %v5898_v40, %v4900_v15  ;;  %8180 = vmatpush3.bf16.msra.mxu1 %v8771_v31  ;;  %8202 = vmatpush3.bf16.msra.mxu0 %v8772_v42  ;;  %v5929_v0 = vmax.f32 %v5854_v20, 0.0  ;;  %v5931_v53 = vmax.f32 %v5897_v21, 0.0 }
0x11b0   :  { %8181 = vmatprep.subr.bf16.mxu1 %v8773_v32  ;;  %8203 = vmatprep.subr.bf16.mxu0 %v8774_v43 }
0x11b1   :  { %v5930_v6 = vmax.f32 %v5856_v63, 0.0  ;;  %v5932_v45 = vmax.f32 %v5899_v24, 0.0  ;;  %v5945_v9 = vpack.c.bf16 %v5929_v0, %v5913_v58  ;;  %v5947_v49 = vpack.c.bf16 %v5931_v53, %v5915_v46 }
0x11b3   :  { %v5946_v17 = vpack.c.bf16 %v5930_v6, %v5914_v41  ;;  %v5948_v47 = vpack.c.bf16 %v5932_v45, %v5916_v55  ;;  %8182 = vmatpush3.bf16.msra.mxu1 %v8775_v25  ;;  %8204 = vmatpush3.bf16.msra.mxu0 %v8776_v28 }
0x11b4   :  { %8396 = vmatprep.subr.bf16.mxu1 %v8952_v1 }
0x11b5   :  { %6995 = vmatprep.mubr.bf16.mxu1 %v5946_v17  ;;  %7036 = vmatprep.mubr.bf16.mxu0 %v5948_v47 }
0x11b6   :  { %6996 = vmatmul.mubr.bf16.vlgmr.msra.gmra.mxu1 %v5945_v9  ;;  %7037 = vmatmul.mubr.bf16.vlgmr.msra.gmra.mxu0 %v5947_v49 }
0x11b7   :  { %8412 = vmatprep.mubr.msk.bf16.mxu1 %vm8953_vm0, %v8952_v1 }
0x1216   :  { %v8051_v33 = vpop.f32.mrf.mxu1  ;;  %v8073_v50 = vpop.f32.mrf.mxu0 }
0x1218   :  { %v8052_v51 = vpop.f32.mrf.mxu1  ;;  %v8074_v38 = vpop.f32.mrf.mxu0 }
0x1219   :  { %v8053_v5 = vadd.f32 %v8052_v51, %v8051_v33  ;;  %v8075_v12 = vadd.f32 %v8074_v38, %v8073_v50 }
0x121a   :  { %v8054_v52 = vpop.f32.mrf.mxu1  ;;  %v8076_v54 = vpop.f32.mrf.mxu0 }
0x121b   :  { %v6752_v11 = vadd.f32 %v8053_v5, %v3596_v7  ;;  %v8780_v5 = vld [vmem:[#allocation4 + $0xa0] sm:$0xff]  }
0x121c   :  { %v8055_v56 = vpop.f32.mrf.mxu1  ;;  %v8077_v26 = vpop.f32.mrf.mxu0 }
0x121d   :  { %v8056_v44 = vadd.f32 %v8055_v56, %v8054_v52  ;;  %v6793_v15 = vadd.f32 %v8075_v12, %v6752_v11  ;;  %v8078_v18 = vadd.f32 %v8077_v26, %v8076_v54 }
0x121f   :  { %v6755_v36 = vadd.f32 %v8056_v44, %v3596_v7  ;;  %v8781_v7 = vld [vmem:[#allocation4 + $0x98] sm:$0xff]  }
0x1221   :  { %v6796_v34 = vadd.f32 %v8078_v18, %v6755_v36 }
0x1236   :  { %v8095_v59 = vpop.f32.mrf.mxu1  ;;  %v8117_v60 = vpop.f32.mrf.mxu0 }
0x1238   :  { %v8096_v61 = vpop.f32.mrf.mxu1  ;;  %v8118_v62 = vpop.f32.mrf.mxu0 }
0x1239   :  { %v8097_v13 = vadd.f32 %v8096_v61, %v8095_v59  ;;  %v8119_v19 = vadd.f32 %v8118_v62, %v8117_v60 }
0x123a   :  { %v8098_v2 = vpop.f32.mrf.mxu1  ;;  %v8120_v3 = vpop.f32.mrf.mxu0 }
0x123b   :  { %v6834_v37 = vadd.f32 %v8097_v13, %v6793_v15 }
0x123c   :  { %v8099_v4 = vpop.f32.mrf.mxu1  ;;  %v8121_v8 = vpop.f32.mrf.mxu0 }
0x123d   :  { %v8100_v31 = vadd.f32 %v8099_v4, %v8098_v2  ;;  %v6875_v57 = vadd.f32 %v8119_v19, %v6834_v37  ;;  %v8122_v21 = vadd.f32 %v8121_v8, %v8120_v3  ;;  %v8777_v4 = vld [vmem:[#allocation4 + $0xb8] sm:$0xff]   ;;  %v8782_v8 = vld [vmem:[#allocation4 + $0x90] sm:$0xff]  }
0x123e   :  { %8397 = vmatpush3.bf16.msra.mxu1 %v8777_v4 }
0x123f   :  { %v6837_v35 = vadd.f32 %v8100_v31, %v6796_v34  ;;  %8398 = vmatprep.subr.bf16.mxu1 %v8952_v1 }
0x1241   :  { %v6878_v63 = vadd.f32 %v8122_v21, %v6837_v35  ;;  %v7076_v35 = vld [vmem:[#allocation9 + $0x180] ss:$0 sm:$0xff] }
0x1256   :  { %v8139_v27 = vpop.f32.mrf.mxu1  ;;  %v8161_v10 = vpop.f32.mrf.mxu0 }
0x1258   :  { %v8140_v48 = vpop.f32.mrf.mxu1  ;;  %v8162_v14 = vpop.f32.mrf.mxu0 }
0x1259   :  { %v8141_v32 = vadd.f32 %v8140_v48, %v8139_v27  ;;  %v8163_v24 = vadd.f32 %v8162_v14, %v8161_v10  ;;  %v8783_v27 = vld [vmem:[#allocation4 + $0x88] sm:$0xff]   ;;  %v8784_v10 = vld [vmem:[#allocation4 + $0x80] sm:$0xff]  }
0x125a   :  { %v8142_v16 = vpop.f32.mrf.mxu1  ;;  %v8164_v42 = vpop.f32.mrf.mxu0 }
0x125b   :  { %v6916_v39 = vadd.f32 %v8141_v32, %v6875_v57 }
0x125c   :  { %v8143_v43 = vpop.f32.mrf.mxu1  ;;  %v8165_v20 = vpop.f32.mrf.mxu0 }
0x125d   :  { %v8144_v22 = vadd.f32 %v8143_v43, %v8142_v16  ;;  %v6957_v0 = vadd.f32 %v8163_v24, %v6916_v39  ;;  %v8166_v45 = vadd.f32 %v8165_v20, %v8164_v42  ;;  %v3599_v16 = vld [vmem:[#allocation9 + $0x106] ss:$0 sm:$0xff]  ;;  %v3600_v42 = vld [vmem:[#allocation9 + $0x107] ss:$0 sm:$0xff] }
0x125f   :  { %v6919_v53 = vadd.f32 %v8144_v22, %v6878_v63 }
0x1261   :  { %v6960_v9 = vadd.f32 %v8166_v45, %v6919_v53 }
0x1276   :  { %v8183_v23 = vpop.f32.mrf.mxu1  ;;  %v8205_v40 = vpop.f32.mrf.mxu0 }
0x1278   :  { %v8184_v25 = vpop.f32.mrf.mxu1  ;;  %v8206_v28 = vpop.f32.mrf.mxu0 }
0x1279   :  { %v8185_v41 = vadd.f32 %v8184_v25, %v8183_v23  ;;  %v8207_v46 = vadd.f32 %v8206_v28, %v8205_v40 }
0x127a   :  { %v8186_v55 = vpop.f32.mrf.mxu1  ;;  %v8208_v6 = vpop.f32.mrf.mxu0 }
0x127b   :  { %v6998_v58 = vadd.f32 %v8185_v41, %v6957_v0 }
0x127c   :  { %v8187_v17 = vpop.f32.mrf.mxu1  ;;  %v8209_v47 = vpop.f32.mrf.mxu0 }
0x127d   :  { %v7039_v49 = vadd.f32 %v8207_v46, %v6998_v58  ;;  %v8188_v33 = vadd.f32 %v8187_v17, %v8186_v55  ;;  %v8210_v51 = vadd.f32 %v8209_v47, %v8208_v6 }
0x127f   :  { %v7001_v50 = vadd.f32 %v8188_v33, %v6960_v9  ;;  %v7045_v38 = vadd.f32 %v7039_v49, %v9325_v29  ;;  %v8778_v29 = vld [vmem:[#allocation4 + $0xb0] sm:$0xff]  }
0x1280   :  { %8399 = vmatpush3.bf16.msra.mxu1 %v8778_v29 }
0x1281   :  { %v7042_v52 = vadd.f32 %v8210_v51, %v7001_v50  ;;  %7047 = vadd.xlane.f32.xlu1 %v7045_v38  ;;  %8400 = vmatprep.subr.bf16.mxu1 %v8952_v1 }
0x1283   :  { %v7046_v54 = vadd.f32 %v7042_v52, %v9327_v30  ;;  %v8779_v30 = vld [vmem:[#allocation4 + $0xa8] sm:$0xff]  }
0x1284   :  { %8401 = vmatpush3.bf16.msra.mxu1 %v8779_v30 }
0x1285   :  { %7049 = vadd.xlane.f32.xlu0 %v7046_v54  ;;  %8402 = vmatprep.subr.bf16.mxu1 %v8952_v1 }
0x1288   :  { %8403 = vmatpush3.bf16.msra.mxu1 %v8780_v5 }
0x1289   :  { %8404 = vmatprep.subr.bf16.mxu1 %v8952_v1 }
0x128c   :  { %8405 = vmatpush3.bf16.msra.mxu1 %v8781_v7 }
0x128d   :  { %8406 = vmatprep.subr.bf16.mxu1 %v8952_v1 }
0x1290   :  { %8407 = vmatpush3.bf16.msra.mxu1 %v8782_v8 }
0x1291   :  { %8408 = vmatprep.subr.bf16.mxu1 %v8952_v1 }
0x1294   :  { %8409 = vmatpush3.bf16.msra.mxu1 %v8783_v27 }
0x1295   :  { %8410 = vmatprep.subr.bf16.mxu1 %v8952_v1 }
0x1298   :  { %8411 = vmatpush3.bf16.msra.mxu1 %v8784_v10 }
0x130a   :  { %v7048_v56 = vpop.xlane.xlu1 %7047 }
0x130b   :  { %v7051_v26 = vmul.f32 0.0078125, %v7048_v56 }
0x130d   :  { %v7053_v59 = vsub.f32 %v7045_v38, %v7051_v26 }
0x130e   :  { %v7050_v60 = vpop.xlane.xlu0 %7049 }
0x130f   :  { %v7052_v61 = vmul.f32 0.0078125, %v7050_v60  ;;  %v7055_v62 = vmul.f32 %v7053_v59, %v7053_v59 }
0x1311   :  { %v7054_v2 = vsub.f32 %v7046_v54, %v7052_v61  ;;  %7057 = vadd.xlane.f32.xlu1 %v7055_v62 }
0x1313   :  { %v7056_v3 = vmul.f32 %v7054_v2, %v7054_v2 }
0x1315   :  { %7059 = vadd.xlane.f32.xlu0 %v7056_v3 }
0x139a   :  { %v7058_v11 = vpop.xlane.xlu1 %7057 }
0x139b   :  { %v7061_v44 = vmul.f32 0.0078125, %v7058_v11 }
0x139d   :  { %v7063_v48 = vadd.f32 1e-05, %v7061_v44 }
0x139e   :  { %v7060_v12 = vpop.xlane.xlu0 %7059 }
0x139f   :  { %8829 = vrsqrt.f32 %v7063_v48  ;;  %v7062_v13 = vmul.f32 0.0078125, %v7060_v12 }
0x13a1   :  { %v7064_v14 = vadd.f32 1e-05, %v7062_v13 }
0x13a3   :  { %8831 = vrsqrt.f32 %v7064_v14 }
0x13ac   :  { %v8830_v15 = vpop.eup %8829 }
0x13ad   :  { %v7067_v36 = vmul.f32 %v8830_v15, %v7053_v59 }
0x13af   :  { %v7069_v37 = vmul.f32 %v7067_v36, %v3599_v16 }
0x13b0   :  { %v8832_v18 = vpop.eup %8831 }
0x13b1   :  { %v7068_v31 = vmul.f32 %v8832_v18, %v7054_v2  ;;  %v7071_v19 = vadd.f32 %v7069_v37, %v3600_v42 }
0x13b3   :  { %v7070_v34 = vmul.f32 %v7068_v31, %v3599_v16 }
0x13b5   :  { %v7072_v32 = vadd.f32 %v7070_v34, %v3600_v42 }
0x13b7   :  { %v7073_v1 = vadd.f32 %v7072_v32, %v7071_v19 }
0x13b9   :  { %v7075_v43 = vmul.f32 0.5, %v7073_v1 }
0x13bb   :  { %v7077_v57 = vpack.c.bf16 %v7075_v43, %v7075_v43 }
0x13bd   :  { %8413 = vmatmul.mubr.bf16.vlgmr.msra.gmra.mxu1 %v7077_v57 }
0x147d   :  { %v7177_v20 = vpop.f32.mrf.mxu1 }
0x147e   :  { %v7178_v21 = vadd.f32 %v7177_v20, %v7076_v35 }
0x147f   :  { %v8414_v39 = vpop.f32.mrf.mxu1 }
0x1480   :  { %7183 = vst [vmem:[%s9404_s6] sm:$0xff] %v7178_v21 }
0x1481   :  { %v7180_v22 = vpop.f32.mrf.mxu1 }
0x1483   :  { %v8415_v23 = vpop.f32.mrf.mxu1 }
0x1484   :  { %7188 = vsyncpa [#allocation3], 1 }
0x1485   :  { %7189 = vsyncpa [#allocation5], 1 }
0x1486   :  { %7190 = vsyncpa [#allocation8], 1 }

</bundles_post_ra>
